<compile_context>
chip_gen: v7x
topology: tpu7x:2x2x1
jax: 0.10.0
libtpu: 0.0.40
codegen_flags: <defaults>
</compile_context>

<pallas_src>
import functools

import jax
import jax.numpy as jnp
from jax import lax
from jax.experimental import pallas as pl
from jax.experimental.pallas import tpu as pltpu


# ----------------------------------------------------------------------------
# Fused kernel: one batch image per grid step.
# ----------------------------------------------------------------------------
def _fused_model_kernel(x_ref, m_ref, wA_ref, bA_ref, wB_ref, bB_ref, o_ref,
                        vpad_ref, *, H, W, CB):
    """Channels-first, spatial flattened into the lane dim with row stride Wp2.

    x_ref    : (1, 16, Lx)        zero-padded input, x[y,x'] at (y+4)*Wp2+(x'+4)
    m_ref    : (1, L2)            f32 validity mask over the stage-1 flat frame
    wA_ref   : (9, 64, 16)        per-tap merged [conv1 | conv3] weights
    bA_ref   : (64, 1)            merged [b1 | b3]
    wB_ref   : (9, 128, 64)       per-tap block-diagonal [conv2 ; conv4] weights
    bB_ref   : (128, 1)           merged [b2 | b4]
    o_ref    : (1, 64, Ho*Wp2)    sigmoid(v4)+tanh(v2) at row stride Wp2
    vpad_ref : VMEM (64, L2)      zero-padded [v1 | v3] (pad = 3), row stride Wp2
    """
    f32 = jnp.float32
    Wp2 = W + 6                    # unified row stride
    Ho = H + 4                     # final output rows
    L2 = (H + 7) * Wp2             # stage-1 compute width == vpad width

    # ---- stage 1: conv1 & conv3 fused into one (64,16) weight per tap ------
    # Every 3x3 tap is ONE fat matmul over the whole flat frame (shifted
    # flat-window trick); all window starts are static.
    acc1 = jnp.broadcast_to(bA_ref[...], (64, L2))          # bias folded in
    for t in range(9):
        ky, kx = divmod(t, 3)
        win = x_ref[0, :, pl.ds(ky * Wp2 + kx, L2)]          # (16, L2)
        acc1 = acc1 + jnp.dot(wA_ref[t], win, preferred_element_type=f32)

    # One full-width masked store: the mask zeroes the pad-3 halo, the
    # wrap-around columns and the bias outside the valid region, so vpad is
    # exactly the zero-padded [v1 | v3] and no memset is needed.
    vpad_ref[...] = acc1 * m_ref[...]

    # ---- stage 2: conv2 & conv4 as one block-diagonal (128,64) weight ------
    bB = bB_ref[...]                                          # (128, 1)
    accB_full = jnp.broadcast_to(bB, (128, CB * Wp2))         # hoisted (full chunks)
    for r0 in range(0, Ho, CB):
        rows = min(CB, Ho - r0)
        cw = rows * Wp2
        base = r0 * Wp2
        acc2 = accB_full if rows == CB else jnp.broadcast_to(bB, (128, cw))
        for t in range(9):
            ky, kx = divmod(t, 3)
            win = vpad_ref[:, pl.ds(base + ky * Wp2 + kx, cw)]   # (64, cw)
            acc2 = acc2 + jnp.dot(wB_ref[t], win, preferred_element_type=f32)
        # rows 0:64 = v2 (conv2), rows 64:128 = v4 (conv4); fused epilogue,
        # one wide contiguous store per chunk (lane-dense output).
        res = jax.nn.sigmoid(acc2[64:, :]) + jnp.tanh(acc2[:64, :])  # (64, cw)
        o_ref[0, :, pl.ds(base, cw)] = res


# ----------------------------------------------------------------------------
# Host-side weight packing (PyTorch layouts -> merged / block-diagonal mats).
# ----------------------------------------------------------------------------
def _pack_params(params):
    w1, b1, w2, b2, w3, b3, w4, b4 = params   # (O, I/g, 3, 3) and (O,)
    # Stage 1: conv1 / conv3 merged along output channels -> per-tap (64, 16).
    wA = jnp.concatenate([w1, w3], axis=0)                       # (64, 16, 3, 3)
    wA = jnp.transpose(wA, (2, 3, 0, 1)).reshape(9, 64, 16)      # [ky*3+kx, out, in]
    bA = jnp.concatenate([b1, b3], axis=0).reshape(64, 1)

    # Stage 2: block-diagonal merge of the grouped conv2/conv4 weights
    # -> per-tap (128, 64); off-diagonal blocks are exactly zero so group
    # separation is preserved bit-exactly.
    wB = jnp.zeros((3, 3, 128, 64), jnp.float32)

    def _put(dst, w, row0, col0):
        return dst.at[:, :, row0:row0 + 32, col0:col0 + 16].set(
            jnp.transpose(w, (2, 3, 0, 1)))

    wB = _put(wB, w2[:32], 0, 0)     # conv2 group 0: v1[ 0:16] -> v2[ 0:32]
    wB = _put(wB, w2[32:], 32, 16)   # conv2 group 1: v1[16:32] -> v2[32:64]
    wB = _put(wB, w4[:32], 64, 32)   # conv4 group 0: v3[ 0:16] -> v4[ 0:32]
    wB = _put(wB, w4[32:], 96, 48)   # conv4 group 1: v3[16:32] -> v4[32:64]
    wB = wB.reshape(9, 128, 64)
    bB = jnp.concatenate([b2, b4], axis=0).reshape(128, 1)
    return wA, bA, wB, bB


def model_forward(x, params):
    """x: (N, 16, H, W) NCHW like the PyTorch module.  Returns (N, 64, H+4, W+4)."""
    N, C, H, W = x.shape
    assert C == 16
    Wp2 = W + 6
    Ho, Wo = H + 4, W + 4
    L2 = (H + 7) * Wp2                 # vpad / stage-1 compute width
    rows_x = H + 10                    # padded-input rows (covers max tap read)
    Lx = rows_x * Wp2

    wA, bA, wB, bB = _pack_params(params)

    # Wrapper-side zero padding straight into the unified flat layout:
    # x[n,c,y,x'] -> flat index (y+4)*Wp2 + (x'+4); everything else is 0.
    x_pad = jnp.pad(x.astype(jnp.float32),
                    ((0, 0), (0, 0), (4, rows_x - H - 4), (4, Wp2 - W - 4)))
    x_flat = x_pad.reshape(N, C, Lx)

    # Validity mask over the flat stage-1 frame (valid rows 3..H+2, cols 3..W+2).
    idx = jnp.arange(L2, dtype=jnp.int32)
    rowi, coli = idx // Wp2, idx % Wp2
    mask = (((rowi >= 3) & (rowi < H + 3) & (coli >= 3) & (coli < W + 3))
            .astype(jnp.float32).reshape(1, L2))

    # Stage-2 chunk size: ~2 lane tiles per matmul keeps the (128,cw) acc
    # register-resident without spilling the 9-tap loop.
    CB = max(1, min(Ho, 256 // Wp2))

    flops = 2 * N * (9 * 64 * 16 * L2 + 9 * 128 * 64 * Ho * Wp2)
    trans = 2 * N * 64 * Ho * Wp2
    bytes_accessed = 4 * (N * 16 * Lx + N * 64 * Ho * Wp2
                          + wA.size + bA.size + wB.size + bB.size + mask.size)

    # VMEM budget safety valve for large spatial sizes (notably v7x's 64 MiB).
    # TODO(synk): for very large H,W (whole-image vpad no longer fits) tile the
    # grid over output-row bands with a 3-row stage-2 halo instead.
    vmem_estimate = 4 * (2 * 16 * Lx + 2 * 64 * Ho * Wp2 + 64 * L2
                         + 2 * (wA.size + wB.size + bA.size + bB.size + mask.size))
    vmem_limit = None
    if vmem_estimate > (24 << 20):
        vmem_limit = min(int(vmem_estimate * 3 // 2), 96 << 20)

    out_flat = pl.pallas_call(
        functools.partial(_fused_model_kernel, H=H, W=W, CB=CB),
        out_shape=jax.ShapeDtypeStruct((N, 64, Ho * Wp2), jnp.float32),
        grid=(N,),
        in_specs=[
            pl.BlockSpec((1, C, Lx), lambda i: (i, 0, 0)),
            pl.BlockSpec((1, L2), lambda i: (0, 0)),
            pl.BlockSpec((9, 64, 16), lambda i: (0, 0, 0)),
            pl.BlockSpec((64, 1), lambda i: (0, 0)),
            pl.BlockSpec((9, 128, 64), lambda i: (0, 0, 0)),
            pl.BlockSpec((128, 1), lambda i: (0, 0)),
        ],
        out_specs=pl.BlockSpec((1, 64, Ho * Wp2), lambda i: (i, 0, 0)),
        scratch_shapes=[
            pltpu.VMEM((64, L2), jnp.float32),   # zero-padded [v1 | v3]
        ],
        compiler_params=pltpu.CompilerParams(
            dimension_semantics=("parallel",),
            vmem_limit_bytes=vmem_limit),
        cost_estimate=pl.CostEstimate(flops=flops, transcendentals=trans,
                                      bytes_accessed=bytes_accessed),
    )(x_flat, mask, wA, bA, wB, bB)

    # Strip the 2 garbage columns per row (lane-dense kernel output at stride Wp2).
    return out_flat.reshape(N, 64, Ho, Wp2)[:, :, :, :Wo]


# ----------------------------------------------------------------------------
# Pure-JAX reference (for correctness check).
# ----------------------------------------------------------------------------
def _conv_ref(x, w, b, padding, groups):
    out = lax.conv_general_dilated(
        x, w, window_strides=(1, 1),
        padding=[(padding, padding), (padding, padding)],
        dimension_numbers=("NCHW", "OIHW", "NCHW"),
        feature_group_count=groups)
    return out + b.reshape(1, -1, 1, 1)


def model_ref(x, params):
    w1, b1, w2, b2, w3, b3, w4, b4 = params
    v1 = _conv_ref(x, w1, b1, 1, 1)
    v2 = _conv_ref(v1, w2, b2, 3, 2)
    v3 = _conv_ref(x, w3, b3, 1, 1)
    v4 = _conv_ref(v3, w4, b4, 3, 2)
    return jax.nn.sigmoid(v4) + jnp.tanh(v2)


if __name__ == "__main__":
    key = jax.random.PRNGKey(0)
    ks = jax.random.split(key, 9)

    # Small shapes consistent with the module (channel counts fixed by it).
    N, H, W = 2, 16, 16
    x = jax.random.normal(ks[0], (N, 16, H, W), jnp.float32)          # NCHW

    # Deterministic synthetic parameters in PyTorch layouts.
    w1 = 0.1 * jax.random.normal(ks[1], (32, 16, 3, 3), jnp.float32)
    b1 = 0.1 * jax.random.normal(ks[2], (32,), jnp.float32)
    w2 = 0.1 * jax.random.normal(ks[3], (64, 16, 3, 3), jnp.float32)  # groups=2
    b2 = 0.1 * jax.random.normal(ks[4], (64,), jnp.float32)
    w3 = 0.1 * jax.random.normal(ks[5], (32, 16, 3, 3), jnp.float32)
    b3 = 0.1 * jax.random.normal(ks[6], (32,), jnp.float32)
    w4 = 0.1 * jax.random.normal(ks[7], (64, 16, 3, 3), jnp.float32)  # groups=2
    b4 = 0.1 * jax.random.normal(ks[8], (64,), jnp.float32)
    params = (w1, b1, w2, b2, w3, b3, w4, b4)

    out = jax.jit(model_forward)(x, params)
    out = jax.block_until_ready(out)

    ref = model_ref(x, params)
    assert out.shape == (N, 64, H + 4, W + 4), out.shape
    err = float(jnp.max(jnp.abs(out - ref)))
    assert jnp.allclose(out, ref, atol=2e-4, rtol=2e-4), err
    print("KERNEL_OK")
</pallas_src>

<mosaic_0001>
module attributes {stable_mosaic.version = 11 : i64} {
  func.func @_fused_model_kernel(%arg0: i32, %arg1: memref<1x16x572xf32, #tpu.memory_space<vmem>>, %arg2: memref<1x506xf32, #tpu.memory_space<vmem>>, %arg3: memref<9x64x16xf32, #tpu.memory_space<vmem>>, %arg4: memref<64x1xf32, #tpu.memory_space<vmem>>, %arg5: memref<9x128x64xf32, #tpu.memory_space<vmem>>, %arg6: memref<128x1xf32, #tpu.memory_space<vmem>>, %arg7: memref<1x64x440xf32, #tpu.memory_space<vmem>>, %arg8: memref<64x506xf32, #tpu.memory_space<vmem>>) attributes {dimension_semantics = [#tpu.dimension_semantics<parallel>], iteration_bounds = array<i64: 2>, scalar_prefetch = 0 : i64, scratch_operands = 1 : i64, tpu.core_type = #tpu.core_type<tc>, window_params = [{transform_indices = @transform_0, window_bounds = array<i64: 1, 16, 572>}, {pipeline_mode = #tpu.pipeline_mode<synchronous>, transform_indices = @transform_1, window_bounds = array<i64: 1, 506>}, {pipeline_mode = #tpu.pipeline_mode<synchronous>, transform_indices = @transform_2, window_bounds = array<i64: 9, 64, 16>}, {pipeline_mode = #tpu.pipeline_mode<synchronous>, transform_indices = @transform_3, window_bounds = array<i64: 64, 1>}, {pipeline_mode = #tpu.pipeline_mode<synchronous>, transform_indices = @transform_4, window_bounds = array<i64: 9, 128, 64>}, {pipeline_mode = #tpu.pipeline_mode<synchronous>, transform_indices = @transform_5, window_bounds = array<i64: 128, 1>}, {transform_indices = @transform_6, window_bounds = array<i64: 1, 64, 440>}]} {
    %c0 = arith.constant 0 : index
    %c0_0 = arith.constant 0 : index
    %0 = vector.load %arg4[%c0, %c0_0] : memref<64x1xf32, #tpu.memory_space<vmem>>, vector<64x1xf32>
    %1 = vector.shape_cast %0 : vector<64x1xf32> to vector<64x1xf32>
    %2 = vector.broadcast %1 : vector<64x1xf32> to vector<64x506xf32>
    %c0_1 = arith.constant 0 : index
    %c0_2 = arith.constant 0 : index
    %c0_3 = arith.constant 0 : index
    %3 = vector.load %arg1[%c0_1, %c0_2, %c0_3] : memref<1x16x572xf32, #tpu.memory_space<vmem>>, vector<1x16x506xf32>
    %4 = vector.shape_cast %3 : vector<1x16x506xf32> to vector<16x506xf32>
    %c0_4 = arith.constant 0 : index
    %c0_5 = arith.constant 0 : index
    %c0_6 = arith.constant 0 : index
    %5 = vector.load %arg3[%c0_4, %c0_5, %c0_6] : memref<9x64x16xf32, #tpu.memory_space<vmem>>, vector<1x64x16xf32>
    %6 = vector.shape_cast %5 : vector<1x64x16xf32> to vector<64x16xf32>
    %cst = arith.constant dense<0.000000e+00> : vector<64x506xf32>
    %7 = tpu.matmul %6, %4, %cst {dimension_numbers = #tpu.dot_dimension_numbers<[1], [0], [0], [1], [0, 0, 1, 1], [], []>} : vector<64x16xf32>, vector<16x506xf32>, vector<64x506xf32> -> vector<64x506xf32>
    %8 = arith.addf %2, %7 : vector<64x506xf32>
    %c0_7 = arith.constant 0 : index
    %c0_8 = arith.constant 0 : index
    %c1 = arith.constant 1 : index
    %9 = vector.load %arg1[%c0_7, %c0_8, %c1] : memref<1x16x572xf32, #tpu.memory_space<vmem>>, vector<1x16x506xf32>
    %10 = vector.shape_cast %9 : vector<1x16x506xf32> to vector<16x506xf32>
    %c1_9 = arith.constant 1 : index
    %c0_10 = arith.constant 0 : index
    %c0_11 = arith.constant 0 : index
    %11 = vector.load %arg3[%c1_9, %c0_10, %c0_11] : memref<9x64x16xf32, #tpu.memory_space<vmem>>, vector<1x64x16xf32>
    %12 = vector.shape_cast %11 : vector<1x64x16xf32> to vector<64x16xf32>
    %cst_12 = arith.constant dense<0.000000e+00> : vector<64x506xf32>
    %13 = tpu.matmul %12, %10, %cst_12 {dimension_numbers = #tpu.dot_dimension_numbers<[1], [0], [0], [1], [0, 0, 1, 1], [], []>} : vector<64x16xf32>, vector<16x506xf32>, vector<64x506xf32> -> vector<64x506xf32>
    %14 = arith.addf %8, %13 : vector<64x506xf32>
    %c0_13 = arith.constant 0 : index
    %c0_14 = arith.constant 0 : index
    %c2 = arith.constant 2 : index
    %15 = vector.load %arg1[%c0_13, %c0_14, %c2] : memref<1x16x572xf32, #tpu.memory_space<vmem>>, vector<1x16x506xf32>
    %16 = vector.shape_cast %15 : vector<1x16x506xf32> to vector<16x506xf32>
    %c2_15 = arith.constant 2 : index
    %c0_16 = arith.constant 0 : index
    %c0_17 = arith.constant 0 : index
    %17 = vector.load %arg3[%c2_15, %c0_16, %c0_17] : memref<9x64x16xf32, #tpu.memory_space<vmem>>, vector<1x64x16xf32>
    %18 = vector.shape_cast %17 : vector<1x64x16xf32> to vector<64x16xf32>
    %cst_18 = arith.constant dense<0.000000e+00> : vector<64x506xf32>
    %19 = tpu.matmul %18, %16, %cst_18 {dimension_numbers = #tpu.dot_dimension_numbers<[1], [0], [0], [1], [0, 0, 1, 1], [], []>} : vector<64x16xf32>, vector<16x506xf32>, vector<64x506xf32> -> vector<64x506xf32>
    %20 = arith.addf %14, %19 : vector<64x506xf32>
    %c0_19 = arith.constant 0 : index
    %c0_20 = arith.constant 0 : index
    %c22 = arith.constant 22 : index
    %21 = vector.load %arg1[%c0_19, %c0_20, %c22] : memref<1x16x572xf32, #tpu.memory_space<vmem>>, vector<1x16x506xf32>
    %22 = vector.shape_cast %21 : vector<1x16x506xf32> to vector<16x506xf32>
    %c3 = arith.constant 3 : index
    %c0_21 = arith.constant 0 : index
    %c0_22 = arith.constant 0 : index
    %23 = vector.load %arg3[%c3, %c0_21, %c0_22] : memref<9x64x16xf32, #tpu.memory_space<vmem>>, vector<1x64x16xf32>
    %24 = vector.shape_cast %23 : vector<1x64x16xf32> to vector<64x16xf32>
    %cst_23 = arith.constant dense<0.000000e+00> : vector<64x506xf32>
    %25 = tpu.matmul %24, %22, %cst_23 {dimension_numbers = #tpu.dot_dimension_numbers<[1], [0], [0], [1], [0, 0, 1, 1], [], []>} : vector<64x16xf32>, vector<16x506xf32>, vector<64x506xf32> -> vector<64x506xf32>
    %26 = arith.addf %20, %25 : vector<64x506xf32>
    %c0_24 = arith.constant 0 : index
    %c0_25 = arith.constant 0 : index
    %c23 = arith.constant 23 : index
    %27 = vector.load %arg1[%c0_24, %c0_25, %c23] : memref<1x16x572xf32, #tpu.memory_space<vmem>>, vector<1x16x506xf32>
    %28 = vector.shape_cast %27 : vector<1x16x506xf32> to vector<16x506xf32>
    %c4 = arith.constant 4 : index
    %c0_26 = arith.constant 0 : index
    %c0_27 = arith.constant 0 : index
    %29 = vector.load %arg3[%c4, %c0_26, %c0_27] : memref<9x64x16xf32, #tpu.memory_space<vmem>>, vector<1x64x16xf32>
    %30 = vector.shape_cast %29 : vector<1x64x16xf32> to vector<64x16xf32>
    %cst_28 = arith.constant dense<0.000000e+00> : vector<64x506xf32>
    %31 = tpu.matmul %30, %28, %cst_28 {dimension_numbers = #tpu.dot_dimension_numbers<[1], [0], [0], [1], [0, 0, 1, 1], [], []>} : vector<64x16xf32>, vector<16x506xf32>, vector<64x506xf32> -> vector<64x506xf32>
    %32 = arith.addf %26, %31 : vector<64x506xf32>
    %c0_29 = arith.constant 0 : index
    %c0_30 = arith.constant 0 : index
    %c24 = arith.constant 24 : index
    %33 = vector.load %arg1[%c0_29, %c0_30, %c24] : memref<1x16x572xf32, #tpu.memory_space<vmem>>, vector<1x16x506xf32>
    %34 = vector.shape_cast %33 : vector<1x16x506xf32> to vector<16x506xf32>
    %c5 = arith.constant 5 : index
    %c0_31 = arith.constant 0 : index
    %c0_32 = arith.constant 0 : index
    %35 = vector.load %arg3[%c5, %c0_31, %c0_32] : memref<9x64x16xf32, #tpu.memory_space<vmem>>, vector<1x64x16xf32>
    %36 = vector.shape_cast %35 : vector<1x64x16xf32> to vector<64x16xf32>
    %cst_33 = arith.constant dense<0.000000e+00> : vector<64x506xf32>
    %37 = tpu.matmul %36, %34, %cst_33 {dimension_numbers = #tpu.dot_dimension_numbers<[1], [0], [0], [1], [0, 0, 1, 1], [], []>} : vector<64x16xf32>, vector<16x506xf32>, vector<64x506xf32> -> vector<64x506xf32>
    %38 = arith.addf %32, %37 : vector<64x506xf32>
    %c0_34 = arith.constant 0 : index
    %c0_35 = arith.constant 0 : index
    %c44 = arith.constant 44 : index
    %39 = vector.load %arg1[%c0_34, %c0_35, %c44] : memref<1x16x572xf32, #tpu.memory_space<vmem>>, vector<1x16x506xf32>
    %40 = vector.shape_cast %39 : vector<1x16x506xf32> to vector<16x506xf32>
    %c6 = arith.constant 6 : index
    %c0_36 = arith.constant 0 : index
    %c0_37 = arith.constant 0 : index
    %41 = vector.load %arg3[%c6, %c0_36, %c0_37] : memref<9x64x16xf32, #tpu.memory_space<vmem>>, vector<1x64x16xf32>
    %42 = vector.shape_cast %41 : vector<1x64x16xf32> to vector<64x16xf32>
    %cst_38 = arith.constant dense<0.000000e+00> : vector<64x506xf32>
    %43 = tpu.matmul %42, %40, %cst_38 {dimension_numbers = #tpu.dot_dimension_numbers<[1], [0], [0], [1], [0, 0, 1, 1], [], []>} : vector<64x16xf32>, vector<16x506xf32>, vector<64x506xf32> -> vector<64x506xf32>
    %44 = arith.addf %38, %43 : vector<64x506xf32>
    %c0_39 = arith.constant 0 : index
    %c0_40 = arith.constant 0 : index
    %c45 = arith.constant 45 : index
    %45 = vector.load %arg1[%c0_39, %c0_40, %c45] : memref<1x16x572xf32, #tpu.memory_space<vmem>>, vector<1x16x506xf32>
    %46 = vector.shape_cast %45 : vector<1x16x506xf32> to vector<16x506xf32>
    %c7 = arith.constant 7 : index
    %c0_41 = arith.constant 0 : index
    %c0_42 = arith.constant 0 : index
    %47 = vector.load %arg3[%c7, %c0_41, %c0_42] : memref<9x64x16xf32, #tpu.memory_space<vmem>>, vector<1x64x16xf32>
    %48 = vector.shape_cast %47 : vector<1x64x16xf32> to vector<64x16xf32>
    %cst_43 = arith.constant dense<0.000000e+00> : vector<64x506xf32>
    %49 = tpu.matmul %48, %46, %cst_43 {dimension_numbers = #tpu.dot_dimension_numbers<[1], [0], [0], [1], [0, 0, 1, 1], [], []>} : vector<64x16xf32>, vector<16x506xf32>, vector<64x506xf32> -> vector<64x506xf32>
    %50 = arith.addf %44, %49 : vector<64x506xf32>
    %c0_44 = arith.constant 0 : index
    %c0_45 = arith.constant 0 : index
    %c46 = arith.constant 46 : index
    %51 = vector.load %arg1[%c0_44, %c0_45, %c46] : memref<1x16x572xf32, #tpu.memory_space<vmem>>, vector<1x16x506xf32>
    %52 = vector.shape_cast %51 : vector<1x16x506xf32> to vector<16x506xf32>
    %c8 = arith.constant 8 : index
    %c0_46 = arith.constant 0 : index
    %c0_47 = arith.constant 0 : index
    %53 = vector.load %arg3[%c8, %c0_46, %c0_47] : memref<9x64x16xf32, #tpu.memory_space<vmem>>, vector<1x64x16xf32>
    %54 = vector.shape_cast %53 : vector<1x64x16xf32> to vector<64x16xf32>
    %cst_48 = arith.constant dense<0.000000e+00> : vector<64x506xf32>
    %55 = tpu.matmul %54, %52, %cst_48 {dimension_numbers = #tpu.dot_dimension_numbers<[1], [0], [0], [1], [0, 0, 1, 1], [], []>} : vector<64x16xf32>, vector<16x506xf32>, vector<64x506xf32> -> vector<64x506xf32>
    %56 = arith.addf %50, %55 : vector<64x506xf32>
    %c0_49 = arith.constant 0 : index
    %c0_50 = arith.constant 0 : index
    %57 = vector.load %arg2[%c0_49, %c0_50] : memref<1x506xf32, #tpu.memory_space<vmem>>, vector<1x506xf32>
    %58 = vector.broadcast %57 : vector<1x506xf32> to vector<64x506xf32>
    %59 = arith.mulf %56, %58 : vector<64x506xf32>
    %c0_51 = arith.constant 0 : index
    %c0_52 = arith.constant 0 : index
    %60 = vector.load %arg8[%c0_51, %c0_52] : memref<64x506xf32, #tpu.memory_space<vmem>>, vector<64x506xf32>
    tpu.vector_store %arg8[%c0_51, %c0_52], %59 {strides = array<i32>} : memref<64x506xf32, #tpu.memory_space<vmem>>, vector<64x506xf32>,
    %c0_53 = arith.constant 0 : index
    %c0_54 = arith.constant 0 : index
    %61 = vector.load %arg6[%c0_53, %c0_54] : memref<128x1xf32, #tpu.memory_space<vmem>>, vector<128x1xf32>
    %62 = vector.shape_cast %61 : vector<128x1xf32> to vector<128x1xf32>
    %63 = vector.broadcast %62 : vector<128x1xf32> to vector<128x242xf32>
    %c0_55 = arith.constant 0 : index
    %c0_56 = arith.constant 0 : index
    %64 = vector.load %arg8[%c0_55, %c0_56] : memref<64x506xf32, #tpu.memory_space<vmem>>, vector<64x242xf32>
    %c0_57 = arith.constant 0 : index
    %c0_58 = arith.constant 0 : index
    %c0_59 = arith.constant 0 : index
    %65 = vector.load %arg5[%c0_57, %c0_58, %c0_59] : memref<9x128x64xf32, #tpu.memory_space<vmem>>, vector<1x128x64xf32>
    %66 = vector.shape_cast %65 : vector<1x128x64xf32> to vector<128x64xf32>
    %cst_60 = arith.constant dense<0.000000e+00> : vector<128x242xf32>
    %67 = tpu.matmul %66, %64, %cst_60 {dimension_numbers = #tpu.dot_dimension_numbers<[1], [0], [0], [1], [0, 0, 1, 1], [], []>} : vector<128x64xf32>, vector<64x242xf32>, vector<128x242xf32> -> vector<128x242xf32>
    %68 = arith.addf %63, %67 : vector<128x242xf32>
    %c0_61 = arith.constant 0 : index
    %c1_62 = arith.constant 1 : index
    %69 = vector.load %arg8[%c0_61, %c1_62] : memref<64x506xf32, #tpu.memory_space<vmem>>, vector<64x242xf32>
    %c1_63 = arith.constant 1 : index
    %c0_64 = arith.constant 0 : index
    %c0_65 = arith.constant 0 : index
    %70 = vector.load %arg5[%c1_63, %c0_64, %c0_65] : memref<9x128x64xf32, #tpu.memory_space<vmem>>, vector<1x128x64xf32>
    %71 = vector.shape_cast %70 : vector<1x128x64xf32> to vector<128x64xf32>
    %cst_66 = arith.constant dense<0.000000e+00> : vector<128x242xf32>
    %72 = tpu.matmul %71, %69, %cst_66 {dimension_numbers = #tpu.dot_dimension_numbers<[1], [0], [0], [1], [0, 0, 1, 1], [], []>} : vector<128x64xf32>, vector<64x242xf32>, vector<128x242xf32> -> vector<128x242xf32>
    %73 = arith.addf %68, %72 : vector<128x242xf32>
    %c0_67 = arith.constant 0 : index
    %c2_68 = arith.constant 2 : index
    %74 = vector.load %arg8[%c0_67, %c2_68] : memref<64x506xf32, #tpu.memory_space<vmem>>, vector<64x242xf32>
    %c2_69 = arith.constant 2 : index
    %c0_70 = arith.constant 0 : index
    %c0_71 = arith.constant 0 : index
    %75 = vector.load %arg5[%c2_69, %c0_70, %c0_71] : memref<9x128x64xf32, #tpu.memory_space<vmem>>, vector<1x128x64xf32>
    %76 = vector.shape_cast %75 : vector<1x128x64xf32> to vector<128x64xf32>
    %cst_72 = arith.constant dense<0.000000e+00> : vector<128x242xf32>
    %77 = tpu.matmul %76, %74, %cst_72 {dimension_numbers = #tpu.dot_dimension_numbers<[1], [0], [0], [1], [0, 0, 1, 1], [], []>} : vector<128x64xf32>, vector<64x242xf32>, vector<128x242xf32> -> vector<128x242xf32>
    %78 = arith.addf %73, %77 : vector<128x242xf32>
    %c0_73 = arith.constant 0 : index
    %c22_74 = arith.constant 22 : index
    %79 = vector.load %arg8[%c0_73, %c22_74] : memref<64x506xf32, #tpu.memory_space<vmem>>, vector<64x242xf32>
    %c3_75 = arith.constant 3 : index
    %c0_76 = arith.constant 0 : index
    %c0_77 = arith.constant 0 : index
    %80 = vector.load %arg5[%c3_75, %c0_76, %c0_77] : memref<9x128x64xf32, #tpu.memory_space<vmem>>, vector<1x128x64xf32>
    %81 = vector.shape_cast %80 : vector<1x128x64xf32> to vector<128x64xf32>
    %cst_78 = arith.constant dense<0.000000e+00> : vector<128x242xf32>
    %82 = tpu.matmul %81, %79, %cst_78 {dimension_numbers = #tpu.dot_dimension_numbers<[1], [0], [0], [1], [0, 0, 1, 1], [], []>} : vector<128x64xf32>, vector<64x242xf32>, vector<128x242xf32> -> vector<128x242xf32>
    %83 = arith.addf %78, %82 : vector<128x242xf32>
    %c0_79 = arith.constant 0 : index
    %c23_80 = arith.constant 23 : index
    %84 = vector.load %arg8[%c0_79, %c23_80] : memref<64x506xf32, #tpu.memory_space<vmem>>, vector<64x242xf32>
    %c4_81 = arith.constant 4 : index
    %c0_82 = arith.constant 0 : index
    %c0_83 = arith.constant 0 : index
    %85 = vector.load %arg5[%c4_81, %c0_82, %c0_83] : memref<9x128x64xf32, #tpu.memory_space<vmem>>, vector<1x128x64xf32>
    %86 = vector.shape_cast %85 : vector<1x128x64xf32> to vector<128x64xf32>
    %cst_84 = arith.constant dense<0.000000e+00> : vector<128x242xf32>
    %87 = tpu.matmul %86, %84, %cst_84 {dimension_numbers = #tpu.dot_dimension_numbers<[1], [0], [0], [1], [0, 0, 1, 1], [], []>} : vector<128x64xf32>, vector<64x242xf32>, vector<128x242xf32> -> vector<128x242xf32>
    %88 = arith.addf %83, %87 : vector<128x242xf32>
    %c0_85 = arith.constant 0 : index
    %c24_86 = arith.constant 24 : index
    %89 = vector.load %arg8[%c0_85, %c24_86] : memref<64x506xf32, #tpu.memory_space<vmem>>, vector<64x242xf32>
    %c5_87 = arith.constant 5 : index
    %c0_88 = arith.constant 0 : index
    %c0_89 = arith.constant 0 : index
    %90 = vector.load %arg5[%c5_87, %c0_88, %c0_89] : memref<9x128x64xf32, #tpu.memory_space<vmem>>, vector<1x128x64xf32>
    %91 = vector.shape_cast %90 : vector<1x128x64xf32> to vector<128x64xf32>
    %cst_90 = arith.constant dense<0.000000e+00> : vector<128x242xf32>
    %92 = tpu.matmul %91, %89, %cst_90 {dimension_numbers = #tpu.dot_dimension_numbers<[1], [0], [0], [1], [0, 0, 1, 1], [], []>} : vector<128x64xf32>, vector<64x242xf32>, vector<128x242xf32> -> vector<128x242xf32>
    %93 = arith.addf %88, %92 : vector<128x242xf32>
    %c0_91 = arith.constant 0 : index
    %c44_92 = arith.constant 44 : index
    %94 = vector.load %arg8[%c0_91, %c44_92] : memref<64x506xf32, #tpu.memory_space<vmem>>, vector<64x242xf32>
    %c6_93 = arith.constant 6 : index
    %c0_94 = arith.constant 0 : index
    %c0_95 = arith.constant 0 : index
    %95 = vector.load %arg5[%c6_93, %c0_94, %c0_95] : memref<9x128x64xf32, #tpu.memory_space<vmem>>, vector<1x128x64xf32>
    %96 = vector.shape_cast %95 : vector<1x128x64xf32> to vector<128x64xf32>
    %cst_96 = arith.constant dense<0.000000e+00> : vector<128x242xf32>
    %97 = tpu.matmul %96, %94, %cst_96 {dimension_numbers = #tpu.dot_dimension_numbers<[1], [0], [0], [1], [0, 0, 1, 1], [], []>} : vector<128x64xf32>, vector<64x242xf32>, vector<128x242xf32> -> vector<128x242xf32>
    %98 = arith.addf %93, %97 : vector<128x242xf32>
    %c0_97 = arith.constant 0 : index
    %c45_98 = arith.constant 45 : index
    %99 = vector.load %arg8[%c0_97, %c45_98] : memref<64x506xf32, #tpu.memory_space<vmem>>, vector<64x242xf32>
    %c7_99 = arith.constant 7 : index
    %c0_100 = arith.constant 0 : index
    %c0_101 = arith.constant 0 : index
    %100 = vector.load %arg5[%c7_99, %c0_100, %c0_101] : memref<9x128x64xf32, #tpu.memory_space<vmem>>, vector<1x128x64xf32>
    %101 = vector.shape_cast %100 : vector<1x128x64xf32> to vector<128x64xf32>
    %cst_102 = arith.constant dense<0.000000e+00> : vector<128x242xf32>
    %102 = tpu.matmul %101, %99, %cst_102 {dimension_numbers = #tpu.dot_dimension_numbers<[1], [0], [0], [1], [0, 0, 1, 1], [], []>} : vector<128x64xf32>, vector<64x242xf32>, vector<128x242xf32> -> vector<128x242xf32>
    %103 = arith.addf %98, %102 : vector<128x242xf32>
    %c0_103 = arith.constant 0 : index
    %c46_104 = arith.constant 46 : index
    %104 = vector.load %arg8[%c0_103, %c46_104] : memref<64x506xf32, #tpu.memory_space<vmem>>, vector<64x242xf32>
    %c8_105 = arith.constant 8 : index
    %c0_106 = arith.constant 0 : index
    %c0_107 = arith.constant 0 : index
    %105 = vector.load %arg5[%c8_105, %c0_106, %c0_107] : memref<9x128x64xf32, #tpu.memory_space<vmem>>, vector<1x128x64xf32>
    %106 = vector.shape_cast %105 : vector<1x128x64xf32> to vector<128x64xf32>
    %cst_108 = arith.constant dense<0.000000e+00> : vector<128x242xf32>
    %107 = tpu.matmul %106, %104, %cst_108 {dimension_numbers = #tpu.dot_dimension_numbers<[1], [0], [0], [1], [0, 0, 1, 1], [], []>} : vector<128x64xf32>, vector<64x242xf32>, vector<128x242xf32> -> vector<128x242xf32>
    %108 = arith.addf %103, %107 : vector<128x242xf32>
    %109 = vector.extract_strided_slice %108 {offsets = [64, 0], sizes = [64, 242], strides = [1, 1]} : vector<128x242xf32> to vector<64x242xf32>
    %110 = arith.negf %109 : vector<64x242xf32>
    %111 = math.exp %110 : vector<64x242xf32>
    %cst_109 = arith.constant 1.000000e+00 : f32
    %112 = vector.broadcast %cst_109 : f32 to vector<64x242xf32>
    %113 = arith.addf %112, %111 : vector<64x242xf32>
    %114 = arith.divf %112, %113 : vector<64x242xf32>
    %115 = vector.extract_strided_slice %108 {offsets = [0, 0], sizes = [64, 242], strides = [1, 1]} : vector<128x242xf32> to vector<64x242xf32>
    %116 = math.tanh %115 : vector<64x242xf32>
    %117 = arith.addf %114, %116 : vector<64x242xf32>
    %c0_110 = arith.constant 0 : index
    %c0_111 = arith.constant 0 : index
    %c0_112 = arith.constant 0 : index
    %118 = vector.load %arg7[%c0_110, %c0_111, %c0_112] : memref<1x64x440xf32, #tpu.memory_space<vmem>>, vector<1x64x242xf32>
    %119 = vector.shape_cast %118 : vector<1x64x242xf32> to vector<64x242xf32>
    %120 = vector.shape_cast %117 : vector<64x242xf32> to vector<1x64x242xf32>
    tpu.vector_store %arg7[%c0_110, %c0_111, %c0_112], %120 {strides = array<i32>} : memref<1x64x440xf32, #tpu.memory_space<vmem>>, vector<1x64x242xf32>,
    %121 = vector.shape_cast %61 : vector<128x1xf32> to vector<128x1xf32>
    %122 = vector.broadcast %121 : vector<128x1xf32> to vector<128x198xf32>
    %c0_113 = arith.constant 0 : index
    %c242 = arith.constant 242 : index
    %123 = vector.load %arg8[%c0_113, %c242] : memref<64x506xf32, #tpu.memory_space<vmem>>, vector<64x198xf32>
    %c0_114 = arith.constant 0 : index
    %c0_115 = arith.constant 0 : index
    %c0_116 = arith.constant 0 : index
    %124 = vector.load %arg5[%c0_114, %c0_115, %c0_116] : memref<9x128x64xf32, #tpu.memory_space<vmem>>, vector<1x128x64xf32>
    %125 = vector.shape_cast %124 : vector<1x128x64xf32> to vector<128x64xf32>
    %cst_117 = arith.constant dense<0.000000e+00> : vector<128x198xf32>
    %126 = tpu.matmul %125, %123, %cst_117 {dimension_numbers = #tpu.dot_dimension_numbers<[1], [0], [0], [1], [0, 0, 1, 1], [], []>} : vector<128x64xf32>, vector<64x198xf32>, vector<128x198xf32> -> vector<128x198xf32>
    %127 = arith.addf %122, %126 : vector<128x198xf32>
    %c0_118 = arith.constant 0 : index
    %c243 = arith.constant 243 : index
    %128 = vector.load %arg8[%c0_118, %c243] : memref<64x506xf32, #tpu.memory_space<vmem>>, vector<64x198xf32>
    %c1_119 = arith.constant 1 : index
    %c0_120 = arith.constant 0 : index
    %c0_121 = arith.constant 0 : index
    %129 = vector.load %arg5[%c1_119, %c0_120, %c0_121] : memref<9x128x64xf32, #tpu.memory_space<vmem>>, vector<1x128x64xf32>
    %130 = vector.shape_cast %129 : vector<1x128x64xf32> to vector<128x64xf32>
    %cst_122 = arith.constant dense<0.000000e+00> : vector<128x198xf32>
    %131 = tpu.matmul %130, %128, %cst_122 {dimension_numbers = #tpu.dot_dimension_numbers<[1], [0], [0], [1], [0, 0, 1, 1], [], []>} : vector<128x64xf32>, vector<64x198xf32>, vector<128x198xf32> -> vector<128x198xf32>
    %132 = arith.addf %127, %131 : vector<128x198xf32>
    %c0_123 = arith.constant 0 : index
    %c244 = arith.constant 244 : index
    %133 = vector.load %arg8[%c0_123, %c244] : memref<64x506xf32, #tpu.memory_space<vmem>>, vector<64x198xf32>
    %c2_124 = arith.constant 2 : index
    %c0_125 = arith.constant 0 : index
    %c0_126 = arith.constant 0 : index
    %134 = vector.load %arg5[%c2_124, %c0_125, %c0_126] : memref<9x128x64xf32, #tpu.memory_space<vmem>>, vector<1x128x64xf32>
    %135 = vector.shape_cast %134 : vector<1x128x64xf32> to vector<128x64xf32>
    %cst_127 = arith.constant dense<0.000000e+00> : vector<128x198xf32>
    %136 = tpu.matmul %135, %133, %cst_127 {dimension_numbers = #tpu.dot_dimension_numbers<[1], [0], [0], [1], [0, 0, 1, 1], [], []>} : vector<128x64xf32>, vector<64x198xf32>, vector<128x198xf32> -> vector<128x198xf32>
    %137 = arith.addf %132, %136 : vector<128x198xf32>
    %c0_128 = arith.constant 0 : index
    %c264 = arith.constant 264 : index
    %138 = vector.load %arg8[%c0_128, %c264] : memref<64x506xf32, #tpu.memory_space<vmem>>, vector<64x198xf32>
    %c3_129 = arith.constant 3 : index
    %c0_130 = arith.constant 0 : index
    %c0_131 = arith.constant 0 : index
    %139 = vector.load %arg5[%c3_129, %c0_130, %c0_131] : memref<9x128x64xf32, #tpu.memory_space<vmem>>, vector<1x128x64xf32>
    %140 = vector.shape_cast %139 : vector<1x128x64xf32> to vector<128x64xf32>
    %cst_132 = arith.constant dense<0.000000e+00> : vector<128x198xf32>
    %141 = tpu.matmul %140, %138, %cst_132 {dimension_numbers = #tpu.dot_dimension_numbers<[1], [0], [0], [1], [0, 0, 1, 1], [], []>} : vector<128x64xf32>, vector<64x198xf32>, vector<128x198xf32> -> vector<128x198xf32>
    %142 = arith.addf %137, %141 : vector<128x198xf32>
    %c0_133 = arith.constant 0 : index
    %c265 = arith.constant 265 : index
    %143 = vector.load %arg8[%c0_133, %c265] : memref<64x506xf32, #tpu.memory_space<vmem>>, vector<64x198xf32>
    %c4_134 = arith.constant 4 : index
    %c0_135 = arith.constant 0 : index
    %c0_136 = arith.constant 0 : index
    %144 = vector.load %arg5[%c4_134, %c0_135, %c0_136] : memref<9x128x64xf32, #tpu.memory_space<vmem>>, vector<1x128x64xf32>
    %145 = vector.shape_cast %144 : vector<1x128x64xf32> to vector<128x64xf32>
    %cst_137 = arith.constant dense<0.000000e+00> : vector<128x198xf32>
    %146 = tpu.matmul %145, %143, %cst_137 {dimension_numbers = #tpu.dot_dimension_numbers<[1], [0], [0], [1], [0, 0, 1, 1], [], []>} : vector<128x64xf32>, vector<64x198xf32>, vector<128x198xf32> -> vector<128x198xf32>
    %147 = arith.addf %142, %146 : vector<128x198xf32>
    %c0_138 = arith.constant 0 : index
    %c266 = arith.constant 266 : index
    %148 = vector.load %arg8[%c0_138, %c266] : memref<64x506xf32, #tpu.memory_space<vmem>>, vector<64x198xf32>
    %c5_139 = arith.constant 5 : index
    %c0_140 = arith.constant 0 : index
    %c0_141 = arith.constant 0 : index
    %149 = vector.load %arg5[%c5_139, %c0_140, %c0_141] : memref<9x128x64xf32, #tpu.memory_space<vmem>>, vector<1x128x64xf32>
    %150 = vector.shape_cast %149 : vector<1x128x64xf32> to vector<128x64xf32>
    %cst_142 = arith.constant dense<0.000000e+00> : vector<128x198xf32>
    %151 = tpu.matmul %150, %148, %cst_142 {dimension_numbers = #tpu.dot_dimension_numbers<[1], [0], [0], [1], [0, 0, 1, 1], [], []>} : vector<128x64xf32>, vector<64x198xf32>, vector<128x198xf32> -> vector<128x198xf32>
    %152 = arith.addf %147, %151 : vector<128x198xf32>
    %c0_143 = arith.constant 0 : index
    %c286 = arith.constant 286 : index
    %153 = vector.load %arg8[%c0_143, %c286] : memref<64x506xf32, #tpu.memory_space<vmem>>, vector<64x198xf32>
    %c6_144 = arith.constant 6 : index
    %c0_145 = arith.constant 0 : index
    %c0_146 = arith.constant 0 : index
    %154 = vector.load %arg5[%c6_144, %c0_145, %c0_146] : memref<9x128x64xf32, #tpu.memory_space<vmem>>, vector<1x128x64xf32>
    %155 = vector.shape_cast %154 : vector<1x128x64xf32> to vector<128x64xf32>
    %cst_147 = arith.constant dense<0.000000e+00> : vector<128x198xf32>
    %156 = tpu.matmul %155, %153, %cst_147 {dimension_numbers = #tpu.dot_dimension_numbers<[1], [0], [0], [1], [0, 0, 1, 1], [], []>} : vector<128x64xf32>, vector<64x198xf32>, vector<128x198xf32> -> vector<128x198xf32>
    %157 = arith.addf %152, %156 : vector<128x198xf32>
    %c0_148 = arith.constant 0 : index
    %c287 = arith.constant 287 : index
    %158 = vector.load %arg8[%c0_148, %c287] : memref<64x506xf32, #tpu.memory_space<vmem>>, vector<64x198xf32>
    %c7_149 = arith.constant 7 : index
    %c0_150 = arith.constant 0 : index
    %c0_151 = arith.constant 0 : index
    %159 = vector.load %arg5[%c7_149, %c0_150, %c0_151] : memref<9x128x64xf32, #tpu.memory_space<vmem>>, vector<1x128x64xf32>
    %160 = vector.shape_cast %159 : vector<1x128x64xf32> to vector<128x64xf32>
    %cst_152 = arith.constant dense<0.000000e+00> : vector<128x198xf32>
    %161 = tpu.matmul %160, %158, %cst_152 {dimension_numbers = #tpu.dot_dimension_numbers<[1], [0], [0], [1], [0, 0, 1, 1], [], []>} : vector<128x64xf32>, vector<64x198xf32>, vector<128x198xf32> -> vector<128x198xf32>
    %162 = arith.addf %157, %161 : vector<128x198xf32>
    %c0_153 = arith.constant 0 : index
    %c288 = arith.constant 288 : index
    %163 = vector.load %arg8[%c0_153, %c288] : memref<64x506xf32, #tpu.memory_space<vmem>>, vector<64x198xf32>
    %c8_154 = arith.constant 8 : index
    %c0_155 = arith.constant 0 : index
    %c0_156 = arith.constant 0 : index
    %164 = vector.load %arg5[%c8_154, %c0_155, %c0_156] : memref<9x128x64xf32, #tpu.memory_space<vmem>>, vector<1x128x64xf32>
    %165 = vector.shape_cast %164 : vector<1x128x64xf32> to vector<128x64xf32>
    %cst_157 = arith.constant dense<0.000000e+00> : vector<128x198xf32>
    %166 = tpu.matmul %165, %163, %cst_157 {dimension_numbers = #tpu.dot_dimension_numbers<[1], [0], [0], [1], [0, 0, 1, 1], [], []>} : vector<128x64xf32>, vector<64x198xf32>, vector<128x198xf32> -> vector<128x198xf32>
    %167 = arith.addf %162, %166 : vector<128x198xf32>
    %168 = vector.extract_strided_slice %167 {offsets = [64, 0], sizes = [64, 198], strides = [1, 1]} : vector<128x198xf32> to vector<64x198xf32>
    %169 = arith.negf %168 : vector<64x198xf32>
    %170 = math.exp %169 : vector<64x198xf32>
    %cst_158 = arith.constant 1.000000e+00 : f32
    %171 = vector.broadcast %cst_158 : f32 to vector<64x198xf32>
    %172 = arith.addf %171, %170 : vector<64x198xf32>
    %173 = arith.divf %171, %172 : vector<64x198xf32>
    %174 = vector.extract_strided_slice %167 {offsets = [0, 0], sizes = [64, 198], strides = [1, 1]} : vector<128x198xf32> to vector<64x198xf32>
    %175 = math.tanh %174 : vector<64x198xf32>
    %176 = arith.addf %173, %175 : vector<64x198xf32>
    %c0_159 = arith.constant 0 : index
    %c0_160 = arith.constant 0 : index
    %c242_161 = arith.constant 242 : index
    %177 = vector.load %arg7[%c0_159, %c0_160, %c242_161] : memref<1x64x440xf32, #tpu.memory_space<vmem>>, vector<1x64x198xf32>
    %178 = vector.shape_cast %177 : vector<1x64x198xf32> to vector<64x198xf32>
    %179 = vector.shape_cast %176 : vector<64x198xf32> to vector<1x64x198xf32>
    tpu.vector_store %arg7[%c0_159, %c0_160, %c242_161], %179 {strides = array<i32>} : memref<1x64x440xf32, #tpu.memory_space<vmem>>, vector<1x64x198xf32>,
    return
  }
  func.func @transform_0(%arg0: i32) -> (i32, i32, i32) {
    %c0_i32 = arith.constant 0 : i32
    %c0_i32_0 = arith.constant 0 : i32
    %c0_i32_1 = arith.constant 0 : i32
    return %arg0, %c0_i32, %c0_i32_0 : i32, i32, i32
  }
  func.func @transform_1(%arg0: i32) -> (i32, i32) {
    %c0_i32 = arith.constant 0 : i32
    %c0_i32_0 = arith.constant 0 : i32
    %c0_i32_1 = arith.constant 0 : i32
    return %c0_i32, %c0_i32_0 : i32, i32
  }
  func.func @transform_2(%arg0: i32) -> (i32, i32, i32) {
    %c0_i32 = arith.constant 0 : i32
    %c0_i32_0 = arith.constant 0 : i32
    %c0_i32_1 = arith.constant 0 : i32
    %c0_i32_2 = arith.constant 0 : i32
    return %c0_i32, %c0_i32_0, %c0_i32_1 : i32, i32, i32
  }
  func.func @transform_3(%arg0: i32) -> (i32, i32) {
    %c0_i32 = arith.constant 0 : i32
    %c0_i32_0 = arith.constant 0 : i32
    %c0_i32_1 = arith.constant 0 : i32
    return %c0_i32, %c0_i32_0 : i32, i32
  }
  func.func @transform_4(%arg0: i32) -> (i32, i32, i32) {
    %c0_i32 = arith.constant 0 : i32
    %c0_i32_0 = arith.constant 0 : i32
    %c0_i32_1 = arith.constant 0 : i32
    %c0_i32_2 = arith.constant 0 : i32
    return %c0_i32, %c0_i32_0, %c0_i32_1 : i32, i32, i32
  }
  func.func @transform_5(%arg0: i32) -> (i32, i32) {
    %c0_i32 = arith.constant 0 : i32
    %c0_i32_0 = arith.constant 0 : i32
    %c0_i32_1 = arith.constant 0 : i32
    return %c0_i32, %c0_i32_0 : i32, i32
  }
  func.func @transform_6(%arg0: i32) -> (i32, i32, i32) {
    %c0_i32 = arith.constant 0 : i32
    %c0_i32_0 = arith.constant 0 : i32
    %c0_i32_1 = arith.constant 0 : i32
    return %arg0, %c0_i32, %c0_i32_0 : i32, i32, i32
  }
}

</mosaic_0001>

<bundles_post_ra>
// kernel: model_forward.1
= control target key start
LH: loop header
LB: loop body
LE: loop exit
PB: predicated region body
PF: predicated region fallthrough
CT: control target
= control target key end

     0   :  { %s13151_s21 = smov 0   ;;  %s16841_s0 = inlined_call_operand.vmem [shape: f32[2,16,572], index: 0, kind: input, shape index: {}]   ;;  %s16842_s1 = inlined_call_operand.vmem [shape: f32[1,506], index: 1, kind: input, shape index: {}]   ;;  %s16843_s2 = inlined_call_operand.vmem [shape: f32[9,64,16], index: 2, kind: input, shape index: {}]   ;;  %s16844_s3 = inlined_call_operand.vmem [shape: f32[64,1], index: 3, kind: input, shape index: {}]   ;;  %s16845_s4 = inlined_call_operand.vmem [shape: f32[9,128,64], index: 4, kind: input, shape index: {}]   ;;  %s16846_s5 = inlined_call_operand.vmem [shape: f32[128,1], index: 5, kind: input, shape index: {}]   ;;  %s16847_s6 = inlined_call_operand.vmem [shape: f32[2,64,440], index: 6, kind: output, shape index: {}]  }
   0x1 LB: > { %s9796_s22 = sadd.s32 4294967295, %s13094_s21   ;;  %p9800_p0 = scmp.ge.s32.totalorder %s13094_s21, 1  ;;  %s13094_s21 = sphi %s13151_s21, %s16_s21  }
   0x2   : > { %p212_p1 = scmp.lt.s32.totalorder %s13094_s21, 3 }
   0x4   : > { %p213_p2 = pnand %p9800_p0, %p212_p1 }
   0x6   : > { %216 = sbr.rel (%p213_p2) target bundleno = 1715 (0x6b3), region = 44 }
   0xd   : > { %p242_p3 = scmp.lt.s32.totalorder %s9796_s22, 1  ;;  %v16859_v0 = vmov 0.0   ;;  %s13097_s27 = smov 127   ;;  %v308_v17 = vld [vmem:[%s16843_s2] sm:$0xff]  ;;  %vm316_vm0 = vcmask 130048   ;;  %v309_v18 = vld [vmem:[%s16843_s2 + $0x8] sm:$0xff] }
   0xe   : > { %518 = vmatprep.mubr.f32.mxu1 %v16859_v0  ;;  %405 = vmatprep.mubr.f32.mxu0 %v16859_v0  ;;  %s13098_s8 = smov 126   ;;  %v310_v21 = vld [vmem:[%s16843_s2 + $0x10] sm:$0xff]  ;;  %v311_v24 = vld [vmem:[%s16843_s2 + $0x18] sm:$0xff]  ;;  %s13099_s13 = smov 106   ;;  %v312_v26 = vld [vmem:[%s16843_s2 + $0x20] sm:$0xff]  ;;  %vm632_vm1 = vcmask 1039360  }
   0xf   : > { %s16939_s22 = smov (!%p242_p3, %s9796_s22), 1  ;;  %v313_v27 = vld [vmem:[%s16843_s2 + $0x28] sm:$0xff]  ;;  %s13100_s18 = smov 105   ;;  %v314_v28 = vld [vmem:[%s16843_s2 + $0x30] sm:$0xff]  ;;  %v315_v29 = vld [vmem:[%s16843_s2 + $0x38] sm:$0xff]  ;;  %vm954_vm2 = vcmask 1031168  }
  0x10   : > { %s11815_s23 = smul.u32 80, %s16939_s22  ;;  %s13101_s25 = smov 104   ;;  %v9820_v57 = vld [vmem:[%s16843_s2 + $0x40] sm:$0xff]  ;;  %vm1300_vm3 = vcmask 867328   ;;  %vm1628_vm4 = vcmask 859136   ;;  %vm1956_vm5 = vcmask 850944  }
  0x11   : > { %s13103_s28 = smov 83   ;;  %s13104_s29 = smov 82   ;;  %vm2284_vm6 = vcmask 687104   ;;  %vm2612_vm7 = vcmask 678912   ;;  %vm2940_vm8 = vcmask 670720   ;;  %vm3296_vm9 = vcmask 998400  }
  0x12   : > { %s13167_s26 = scalar_lea.vmem %s16841_s0, %s11815_s23  ;;  %s13106_s14 = smov 14   ;;  %vm3454_vm10 = vcmask 523264   ;;  %vm6673_vm11 = vcmask 113664   ;;  %vm7011_vm12 = vcmask 105472   ;;  %vm7349_vm13 = vcmask 97280  }
  0x13   : > { %v306_v1 = vld [vmem:[%s13167_s26 + $0x38] sm:$0xff]  ;;  %v307_v2 = vld [vmem:[%s13167_s26 + $0x40] sm:$0xff]  ;;  %v301_v3 = vld [vmem:[%s13167_s26 + $0x8] sm:$0xff]  ;;  %s13107_s24 = smov 13   ;;  %s13108_s9 = smov 12   ;;  %vm7671_vm14 = vcmask 982016  }
  0x14   : > { %v11854_v4 = vpack.i.bf16 %v307_v2, %v306_v1  ;;  %v302_v5 = vld [vmem:[%s13167_s26 + $0x10] sm:$0xff]  ;;  %v303_v6 = vld [vmem:[%s13167_s26 + $0x18] sm:$0xff]  ;;  %v300_v9 = vld [vmem:[%s13167_s26] sm:$0xff]  ;;  %s13113_s16 = smov 97   ;;  %s13114_s17 = smov 96   ;;  %vm7985_vm15 = vcmask 973824  }
  0x15   : > { %v305_v7 = vld [vmem:[%s13167_s26 + $0x30] sm:$0xff]  ;;  %v13175_v8 = vpack.i.bf16 %v302_v5, %v301_v3  ;;  %v304_v10 = vld [vmem:[%s13167_s26 + $0x28] sm:$0xff]  ;;  %v10595_v11 = vpack.c.bf16 %v307_v2, %v303_v6  ;;  %v10597_v14 = vpack.c.bf16 %v306_v1, %v302_v5  ;;  %v1255_v20 = vld [vmem:[%s13167_s26 + $0x20] sm:$0xff]  ;;  %s13115_s23 = smov 114  }
  0x16   : > { %11855 = vrot.lane.b32.xlu1 %v11854_v4, %s13097_s27  ;;  %v13180_v12 = vpack.i.bf16 %v304_v10, %v300_v9  ;;  %v10591_v13 = vpack.c.bf16 %v305_v7, %v301_v3  ;;  %v11849_v15 = vpack.i.bf16 %v305_v7, %v303_v6  ;;  %v10593_v16 = vpack.c.bf16 %v304_v10, %v300_v9  ;;  %v1260_v19 = vld [vmem:[%s13167_s26 + $0x48] sm:$0xff]  ;;  %s13102_s26 = smov 84  }
  0x17   : > { %11845 = vrot.lane.b32.xlu0 %v13175_v8, %s13097_s27  ;;  %10596 = vmatprep.subr.bf16.mxu1 %v10595_v11  ;;  %v13211_v22 = vpack.i.bf16 %v1260_v19, %v307_v2  ;;  %v11884_v23 = vpack.i.bf16 %v1255_v20, %v303_v6  ;;  %v11899_v25 = vpack.i.bf16 %v306_v1, %v305_v7  ;;  %v9822_v19 = vld [vmem:[%s16843_s2 + $0x50] sm:$0xff] }
  0x18   : > { %10592 = vmatprep.subr.bf16.mxu0 %v10591_v13  ;;  %10598 = vmatpush1.bf16.msra.mxu1 %v10597_v14 }
  0x19   : > { %10594 = vmatpush1.bf16.msra.mxu0 %v10593_v16 }
  0x1a   : > { %11860 = vrot.lane.b32.xlu1 %v13180_v12, %s13097_s27 }
  0x1b   : > { %11850 = vrot.lane.b32.xlu0 %v11849_v15, %s13097_s27  ;;  %9812 = vmatmul.mubr.msk.f32.vlgmr.msra.gmra.mrb[0].mxu1 %vm316_vm0, %v308_v17 }
  0x1c   : > { %9804 = vmatmul.mubr.msk.f32.vlgmr.msra.gmra.mrb[0].mxu0 %vm316_vm0, %v308_v17  ;;  %524 = vmatprep.mubr.f32.mxu1 %v16859_v0 }
  0x1d   : > { %411 = vmatprep.mubr.f32.mxu0 %v16859_v0 }
  0x1e   : > { %11870 = vrot.lane.b32.xlu1 %v11849_v15, %s13098_s8 }
  0x1f   : > { %11865 = vrot.lane.b32.xlu0 %v13175_v8, %s13098_s8  ;;  %9813 = vmatmul.mubr.msk.f32.gmra.mrb[2].mxu1 %vm316_vm0, %v309_v18 }
  0x20   : > { %9805 = vmatmul.mubr.msk.f32.gmra.mrb[2].mxu0 %vm316_vm0, %v309_v18  ;;  %530 = vmatprep.mubr.f32.mxu1 %v16859_v0 }
  0x21   : > { %417 = vmatprep.mubr.f32.mxu0 %v16859_v0 }
  0x22   : > { %11880 = vrot.lane.b32.xlu1 %v13180_v12, %s13098_s8 }
  0x23   : > { %11875 = vrot.lane.b32.xlu0 %v11854_v4, %s13098_s8  ;;  %9814 = vmatmul.mubr.msk.f32.gmra.mrb[4].mxu1 %vm316_vm0, %v310_v21  ;;  %v9821_v4 = vld [vmem:[%s16843_s2 + $0x48] sm:$0xff] }
  0x24   : > { %9806 = vmatmul.mubr.msk.f32.gmra.mrb[4].mxu0 %vm316_vm0, %v310_v21  ;;  %536 = vmatprep.mubr.f32.mxu1 %v16859_v0 }
  0x25   : > { %423 = vmatprep.mubr.f32.mxu0 %v16859_v0 }
  0x26   : > { %11890 = vrot.lane.b32.xlu1 %v13211_v22, %s13099_s13 }
  0x27   : > { %11885 = vrot.lane.b32.xlu0 %v11884_v23, %s13099_s13  ;;  %9815 = vmatmul.mubr.msk.f32.gmra.mrb[6].mxu1 %vm316_vm0, %v311_v24 }
  0x28   : > { %9807 = vmatmul.mubr.msk.f32.gmra.mrb[6].mxu0 %vm316_vm0, %v311_v24  ;;  %542 = vmatprep.mubr.f32.mxu1 %v16859_v0 }
  0x29   : > { %429 = vmatprep.mubr.f32.mxu0 %v16859_v0 }
  0x2a   : > { %11900 = vrot.lane.b32.xlu1 %v11899_v25, %s13099_s13 }
  0x2b   : > { %11895 = vrot.lane.b32.xlu0 %v13175_v8, %s13099_s13  ;;  %9816 = vmatmul.mubr.msk.f32.gmra.mrb[8].mxu1 %vm316_vm0, %v312_v26 }
  0x2c   : > { %9808 = vmatmul.mubr.msk.f32.gmra.mrb[8].mxu0 %vm316_vm0, %v312_v26  ;;  %548 = vmatprep.mubr.f32.mxu1 %v16859_v0 }
  0x2d   : > { %435 = vmatprep.mubr.f32.mxu0 %v16859_v0 }
  0x2e   : > { %11910 = vrot.lane.b32.xlu1 %v11884_v23, %s13100_s18 }
  0x2f   : > { %11905 = vrot.lane.b32.xlu0 %v13180_v12, %s13099_s13  ;;  %9817 = vmatmul.mubr.msk.f32.gmra.mrb[10].mxu1 %vm316_vm0, %v313_v27 }
  0x30   : > { %9809 = vmatmul.mubr.msk.f32.gmra.mrb[10].mxu0 %vm316_vm0, %v313_v27  ;;  %554 = vmatprep.mubr.f32.mxu1 %v16859_v0 }
  0x31   : > { %441 = vmatprep.mubr.f32.mxu0 %v16859_v0 }
  0x32   : > { %11920 = vrot.lane.b32.xlu1 %v13175_v8, %s13100_s18 }
  0x33   : > { %11915 = vrot.lane.b32.xlu0 %v13211_v22, %s13100_s18  ;;  %9818 = vmatmul.mubr.msk.f32.gmra.mrb[12].mxu1 %vm316_vm0, %v314_v28 }
  0x34   : > { %9810 = vmatmul.mubr.msk.f32.gmra.mrb[12].mxu0 %vm316_vm0, %v314_v28  ;;  %560 = vmatprep.mubr.f32.mxu1 %v16859_v0 }
  0x35   : > { %447 = vmatprep.mubr.f32.mxu0 %v16859_v0 }
  0x36   : > { %11930 = vrot.lane.b32.xlu1 %v13180_v12, %s13100_s18 }
  0x37   : > { %11925 = vrot.lane.b32.xlu0 %v11899_v25, %s13100_s18  ;;  %9819 = vmatmul.mubr.msk.f32.gmra.mrb[14].mxu1 %vm316_vm0, %v315_v29 }
  0x38   : > { %9811 = vmatmul.mubr.msk.f32.gmra.mrb[14].mxu0 %vm316_vm0, %v315_v29  ;;  %848 = vmatprep.mubr.f32.mxu1 %v16859_v0  ;;  %v9823_v29 = vld [vmem:[%s16843_s2 + $0x58] sm:$0xff] }
  0x39   : > { %735 = vmatprep.mubr.f32.mxu0 %v16859_v0 }
  0x3a   : > { %11940 = vrot.lane.b32.xlu1 %v13211_v22, %s13101_s25 }
  0x3b   : > { %11935 = vrot.lane.b32.xlu0 %v11884_v23, %s13101_s25 }
  0x3e   : > { %11950 = vrot.lane.b32.xlu1 %v11899_v25, %s13101_s25 }
  0x3f   : > { %11945 = vrot.lane.b32.xlu0 %v13175_v8, %s13101_s25 }
  0x42   : > { %11960 = vrot.lane.b32.xlu1 %v11884_v23, %s13102_s26 }
  0x43   : > { %11955 = vrot.lane.b32.xlu0 %v13180_v12, %s13101_s25 }
  0x46   : > { %11970 = vrot.lane.b32.xlu1 %v13175_v8, %s13102_s26 }
  0x47   : > { %11965 = vrot.lane.b32.xlu0 %v13211_v22, %s13102_s26 }
  0x4a   : > { %11980 = vrot.lane.b32.xlu1 %v13180_v12, %s13102_s26 }
  0x4b   : > { %11975 = vrot.lane.b32.xlu0 %v11899_v25, %s13102_s26 }
  0x4e   : > { %11990 = vrot.lane.b32.xlu1 %v13211_v22, %s13103_s28 }
  0x4f   : > { %11985 = vrot.lane.b32.xlu0 %v11884_v23, %s13103_s28 }
  0x52   : > { %12000 = vrot.lane.b32.xlu1 %v11899_v25, %s13103_s28 }
  0x53   : > { %11995 = vrot.lane.b32.xlu0 %v13175_v8, %s13103_s28 }
  0x56   : > { %12010 = vrot.lane.b32.xlu1 %v11884_v23, %s13104_s29 }
  0x57   : > { %12005 = vrot.lane.b32.xlu0 %v13180_v12, %s13103_s28 }
  0x5a   : > { %12020 = vrot.lane.b32.xlu1 %v13175_v8, %s13104_s29 }
  0x5b   : > { %12015 = vrot.lane.b32.xlu0 %v13211_v22, %s13104_s29 }
  0x5e   : > { %12030 = vrot.lane.b32.xlu1 %v13180_v12, %s13104_s29 }
  0x5f   : > { %12025 = vrot.lane.b32.xlu0 %v11899_v25, %s13104_s29 }
  0x88   : > { %v11856_v30 = vpop.permute.xlu1 %11855 }
  0x89   : > { %v11846_v31 = vpop.permute.xlu0 %11845  ;;  %v11858_v32 = vunpack.i.h.bf16 %v11856_v30  ;;  %v11857_v33 = vunpack.i.l.bf16 %v11856_v30 }
  0x8a   : > { %v11848_v34 = vunpack.i.h.bf16 %v11846_v31  ;;  %v11847_v35 = vunpack.i.l.bf16 %v11846_v31 }
  0x8b   : > { %v638_v40 = vsel %vm632_vm1, %v11857_v33, %v11858_v32 }
  0x8c   : > { %v11861_v36 = vpop.permute.xlu1 %11860  ;;  %v634_v44 = vsel %vm632_vm1, %v11847_v35, %v11848_v34 }
  0x8d   : > { %v11851_v37 = vpop.permute.xlu0 %11850  ;;  %v11863_v38 = vunpack.i.h.bf16 %v11861_v36  ;;  %v11862_v39 = vunpack.i.l.bf16 %v11861_v36 }
  0x8e   : > { %v11853_v41 = vunpack.i.h.bf16 %v11851_v37  ;;  %v11852_v42 = vunpack.i.l.bf16 %v11851_v37 }
  0x8f   : > { %v633_v43 = vsel %vm632_vm1, %v11862_v39, %v11847_v35  ;;  %v9825_v35 = vld [vmem:[%s16843_s2 + $0x68] sm:$0xff] }
  0x90   : > { %v635_v45 = vsel %vm632_vm1, %v11848_v34, %v11852_v42  ;;  %v636_v46 = vsel %vm632_vm1, %v11863_v38, %v11853_v41  ;;  %v10603_v47 = vpack.c.bf16 %v11858_v32, %v11852_v42  ;;  %v637_v48 = vsel %vm632_vm1, %v11853_v41, %v11857_v33  ;;  %v11871_v49 = vpop.permute.xlu1 %11870  ;;  %v9824_v33 = vld [vmem:[%s16843_s2 + $0x60] sm:$0xff]  ;;  %v9826_v38 = vld [vmem:[%s16843_s2 + $0x70] sm:$0xff] }
  0x91   : > { %v10599_v50 = vpack.c.bf16 %v637_v48, %v634_v44  ;;  %v10605_v51 = vpack.c.bf16 %v638_v40, %v635_v45  ;;  %v10601_v52 = vpack.c.bf16 %v636_v46, %v633_v43  ;;  %v11866_v53 = vpop.permute.xlu0 %11865  ;;  %v11872_v56 = vunpack.i.l.bf16 %v11871_v49 }
  0x92   : > { %10604 = vmatprep.subr.bf16.mxu1 %v10603_v47  ;;  %v11868_v54 = vunpack.i.h.bf16 %v11866_v53  ;;  %v11867_v55 = vunpack.i.l.bf16 %v11866_v53  ;;  %v11873_v58 = vunpack.i.h.bf16 %v11871_v49  ;;  %v9827_v47 = vld [vmem:[%s16843_s2 + $0x78] sm:$0xff] }
  0x93   : > { %10600 = vmatprep.subr.bf16.mxu0 %v10599_v50  ;;  %10606 = vmatpush1.bf16.msra.mxu1 %v10605_v51 }
  0x94   : > { %10602 = vmatpush1.bf16.msra.mxu0 %v10601_v52  ;;  %v11881_v59 = vpop.permute.xlu1 %11880  ;;  %v957_v63 = vsel %vm954_vm2, %v11868_v54, %v11872_v56  ;;  %v956_v3 = vsel %vm954_vm2, %v11867_v55, %v11868_v54 }
  0x95   : > { %v11876_v60 = vpop.permute.xlu0 %11875  ;;  %v11883_v61 = vunpack.i.h.bf16 %v11881_v59  ;;  %v11882_v62 = vunpack.i.l.bf16 %v11881_v59 }
  0x96   : > { %9836 = vmatmul.mubr.msk.f32.vlgmr.msra.gmra.mrb[0].mxu1 %vm316_vm0, %v9820_v57  ;;  %v11878_v1 = vunpack.i.h.bf16 %v11876_v60  ;;  %v11877_v2 = vunpack.i.l.bf16 %v11876_v60 }
  0x97   : > { %9828 = vmatmul.mubr.msk.f32.vlgmr.msra.gmra.mrb[0].mxu0 %vm316_vm0, %v9820_v57  ;;  %854 = vmatprep.mubr.f32.mxu1 %v16859_v0  ;;  %v955_v5 = vsel %vm954_vm2, %v11882_v62, %v11867_v55  ;;  %v958_v6 = vsel %vm954_vm2, %v11883_v61, %v11873_v58 }
  0x98   : > { %741 = vmatprep.mubr.f32.mxu0 %v16859_v0  ;;  %v960_v7 = vsel %vm954_vm2, %v11877_v2, %v11878_v1  ;;  %v959_v8 = vsel %vm954_vm2, %v11873_v58, %v11877_v2  ;;  %v10611_v9 = vpack.c.bf16 %v11878_v1, %v11872_v56  ;;  %v10609_v10 = vpack.c.bf16 %v958_v6, %v955_v5  ;;  %v13323_v11 = vpop.permute.xlu1 %11890  ;;  %v9844_v58 = vld [vmem:[%s16843_s2 + $0x80] sm:$0xff]  ;;  %v9845_v2 = vld [vmem:[%s16843_s2 + $0x88] sm:$0xff] }
  0x99   : > { %v10607_v12 = vpack.c.bf16 %v959_v8, %v956_v3  ;;  %v10613_v13 = vpack.c.bf16 %v960_v7, %v957_v63  ;;  %v13325_v14 = vpop.permute.xlu0 %11885  ;;  %v11893_v15 = vunpack.i.h.bf16 %v13323_v11  ;;  %v11892_v16 = vunpack.i.l.bf16 %v13323_v11  ;;  %v9846_v3 = vld [vmem:[%s16843_s2 + $0x90] sm:$0xff]  ;;  %v9848_v5 = vld [vmem:[%s16843_s2 + $0xa0] sm:$0xff]  ;;  %v9849_v7 = vld [vmem:[%s16843_s2 + $0xa8] sm:$0xff] }
  0x9a   : > { %9837 = vmatmul.mubr.msk.f32.gmra.mrb[2].mxu1 %vm316_vm0, %v9821_v4  ;;  %10612 = vmatprep.subr.bf16.mxu1 %v10611_v9  ;;  %v11888_v17 = vunpack.i.h.bf16 %v13325_v14  ;;  %v11887_v18 = vunpack.i.l.bf16 %v13325_v14 }
  0x9b   : > { %9829 = vmatmul.mubr.msk.f32.gmra.mrb[2].mxu0 %vm316_vm0, %v9821_v4  ;;  %860 = vmatprep.mubr.f32.mxu1 %v16859_v0  ;;  %v1308_v20 = vsel %vm1300_vm3, %v11892_v16, %v11893_v15  ;;  %v9847_v4 = vld [vmem:[%s16843_s2 + $0x98] sm:$0xff] }
  0x9c   : > { %747 = vmatprep.mubr.f32.mxu0 %v16859_v0  ;;  %10608 = vmatprep.subr.bf16.mxu0 %v10607_v12  ;;  %v11901_v21 = vpop.permute.xlu1 %11900  ;;  %v1304_v22 = vsel %vm1300_vm3, %v11887_v18, %v11888_v17 }
  0x9d   : > { %10610 = vmatpush1.bf16.msra.mxu0 %v10609_v10  ;;  %10614 = vmatpush1.bf16.msra.mxu1 %v10613_v13  ;;  %v11896_v23 = vpop.permute.xlu0 %11895  ;;  %v11903_v24 = vunpack.i.h.bf16 %v11901_v21  ;;  %v11902_v25 = vunpack.i.l.bf16 %v11901_v21  ;;  %v10619_v26 = vpack.c.bf16 %v1308_v20, %v1304_v22  ;;  %v9850_v10 = vld [vmem:[%s16843_s2 + $0xb0] sm:$0xff] }
  0x9e   : > { %9838 = vmatmul.mubr.msk.f32.gmra.mrb[4].mxu1 %vm316_vm0, %v9822_v19  ;;  %v11898_v27 = vunpack.i.h.bf16 %v11896_v23  ;;  %v11897_v28 = vunpack.i.l.bf16 %v11896_v23 }
  0x9f   : > { %9830 = vmatmul.mubr.msk.f32.gmra.mrb[4].mxu0 %vm316_vm0, %v9822_v19  ;;  %866 = vmatprep.mubr.f32.mxu1 %v16859_v0  ;;  %v1306_v30 = vsel %vm1300_vm3, %v11902_v25, %v11903_v24  ;;  %v1307_v51 = vsel %vm1300_vm3, %v11903_v24, %v11892_v16  ;;  %v9851_v19 = vld [vmem:[%s16843_s2 + $0xb8] sm:$0xff] }
  0xa0   : > { %753 = vmatprep.mubr.f32.mxu0 %v16859_v0  ;;  %10620 = vmatprep.subr.bf16.mxu1 %v10619_v26  ;;  %v1302_v31 = vsel %vm1300_vm3, %v11897_v28, %v11898_v27  ;;  %v13367_v37 = vpop.permute.xlu1 %11910  ;;  %v1303_v50 = vsel %vm1300_vm3, %v11898_v27, %v11887_v18 }
  0xa1   : > { %v10615_v32 = vpack.c.bf16 %v1306_v30, %v1302_v31  ;;  %v11906_v34 = vpop.permute.xlu0 %11905  ;;  %v11913_v39 = vunpack.i.h.bf16 %v13367_v37  ;;  %v11912_v40 = vunpack.i.l.bf16 %v13367_v37  ;;  %v10621_v61 = vpack.c.bf16 %v1307_v51, %v1303_v50  ;;  %v9868_v30 = vld [vmem:[%s16843_s2 + $0xc0] sm:$0xff]  ;;  %v9869_v37 = vld [vmem:[%s16843_s2 + $0xc8] sm:$0xff] }
  0xa2   : > { %9839 = vmatmul.mubr.msk.f32.gmra.mrb[6].mxu1 %vm316_vm0, %v9823_v29  ;;  %v11908_v41 = vunpack.i.h.bf16 %v11906_v34  ;;  %v11907_v42 = vunpack.i.l.bf16 %v11906_v34 }
  0xa3   : > { %9831 = vmatmul.mubr.msk.f32.gmra.mrb[6].mxu0 %vm316_vm0, %v9823_v29  ;;  %872 = vmatprep.mubr.f32.mxu1 %v16859_v0  ;;  %v1632_v56 = vsel %vm1628_vm4, %v11912_v40, %v11913_v39  ;;  %v9871_v39 = vld [vmem:[%s16843_s2 + $0xd8] sm:$0xff] }
  0xa4   : > { %759 = vmatprep.mubr.f32.mxu0 %v16859_v0  ;;  %10616 = vmatprep.subr.bf16.mxu0 %v10615_v32  ;;  %v13383_v46 = vpop.permute.xlu1 %11920  ;;  %v1301_v54 = vsel %vm1300_vm3, %v11907_v42, %v11897_v28  ;;  %v1305_v55 = vsel %vm1300_vm3, %v11908_v41, %v11902_v25  ;;  %v9873_v42 = vld [vmem:[%s16843_s2 + $0xe8] sm:$0xff] }
  0xa5   : > { %v13365_v36 = vpop.permute.xlu0 %11915  ;;  %v11922_v49 = vunpack.i.l.bf16 %v13383_v46  ;;  %v11923_v53 = vunpack.i.h.bf16 %v13383_v46  ;;  %v10617_v62 = vpack.c.bf16 %v1305_v55, %v1301_v54  ;;  %v9875_v54 = vld [vmem:[%s16843_s2 + $0xf8] sm:$0xff] }
  0xa6   : > { %9840 = vmatmul.mubr.msk.f32.gmra.mrb[8].mxu1 %vm316_vm0, %v9824_v33  ;;  %v11918_v43 = vunpack.i.h.bf16 %v13365_v36  ;;  %v11917_v44 = vunpack.i.l.bf16 %v13365_v36 }
  0xa7   : > { %9832 = vmatmul.mubr.msk.f32.gmra.mrb[8].mxu0 %vm316_vm0, %v9824_v33  ;;  %878 = vmatprep.mubr.f32.mxu1 %v16859_v0  ;;  %v1630_v59 = vsel %vm1628_vm4, %v11922_v49, %v11923_v53  ;;  %v1631_v23 = vsel %vm1628_vm4, %v11923_v53, %v11912_v40  ;;  %v9872_v40 = vld [vmem:[%s16843_s2 + $0xe0] sm:$0xff] }
  0xa8   : > { %765 = vmatprep.mubr.f32.mxu0 %v16859_v0  ;;  %v1636_v57 = vsel %vm1628_vm4, %v11917_v44, %v11918_v43  ;;  %v11931_v6 = vpop.permute.xlu1 %11930 }
  0xa9   : > { %v13381_v45 = vpop.permute.xlu0 %11925  ;;  %v10627_v63 = vpack.c.bf16 %v1636_v57, %v1632_v56  ;;  %v11933_v11 = vunpack.i.h.bf16 %v11931_v6  ;;  %v11932_v12 = vunpack.i.l.bf16 %v11931_v6 }
  0xaa   : > { %9841 = vmatmul.mubr.msk.f32.gmra.mrb[10].mxu1 %vm316_vm0, %v9825_v35  ;;  %v11927_v48 = vunpack.i.l.bf16 %v13381_v45  ;;  %v11928_v52 = vunpack.i.h.bf16 %v13381_v45  ;;  %v9874_v45 = vld [vmem:[%s16843_s2 + $0xf0] sm:$0xff] }
  0xab   : > { %9833 = vmatmul.mubr.msk.f32.gmra.mrb[10].mxu0 %vm316_vm0, %v9825_v35  ;;  %884 = vmatprep.mubr.f32.mxu1 %v16859_v0  ;;  %v1629_v27 = vsel %vm1628_vm4, %v11932_v12, %v11922_v49  ;;  %v9896_v12 = vld [vmem:[%s16843_s2 + $0x120] sm:$0xff] }
  0xac   : > { %771 = vmatprep.mubr.f32.mxu0 %v16859_v0  ;;  %v1634_v60 = vsel %vm1628_vm4, %v11927_v48, %v11928_v52  ;;  %v13461_v9 = vpop.permute.xlu1 %11940  ;;  %v1635_v22 = vsel %vm1628_vm4, %v11928_v52, %v11917_v44  ;;  %v1633_v26 = vsel %vm1628_vm4, %v11933_v11, %v11927_v48  ;;  %v9895_v11 = vld [vmem:[%s16843_s2 + $0x118] sm:$0xff] }
  0xad   : > { %v10623_v1 = vpack.c.bf16 %v1634_v60, %v1630_v59  ;;  %v13459_v8 = vpop.permute.xlu0 %11935  ;;  %v11943_v15 = vunpack.i.h.bf16 %v13461_v9  ;;  %v11942_v16 = vunpack.i.l.bf16 %v13461_v9  ;;  %v10629_v33 = vpack.c.bf16 %v1635_v22, %v1631_v23  ;;  %v9893_v9 = vld [vmem:[%s16843_s2 + $0x108] sm:$0xff] }
  0xae   : > { %9842 = vmatmul.mubr.msk.f32.gmra.mrb[12].mxu1 %vm316_vm0, %v9826_v38  ;;  %v11938_v13 = vunpack.i.h.bf16 %v13459_v8  ;;  %v11937_v14 = vunpack.i.l.bf16 %v13459_v8  ;;  %v10625_v34 = vpack.c.bf16 %v1633_v26, %v1629_v27  ;;  %v9899_v26 = vld [vmem:[%s16843_s2 + $0x138] sm:$0xff] }
  0xaf   : > { %9834 = vmatmul.mubr.msk.f32.gmra.mrb[12].mxu0 %vm316_vm0, %v9826_v38  ;;  %890 = vmatprep.mubr.f32.mxu1 %v16859_v0  ;;  %v1964_v29 = vsel %vm1956_vm5, %v11942_v16, %v11943_v15  ;;  %v9870_v38 = vld [vmem:[%s16843_s2 + $0xd0] sm:$0xff] }
  0xb0   : > { %777 = vmatprep.mubr.f32.mxu0 %v16859_v0  ;;  %v13477_v18 = vpop.permute.xlu1 %11950  ;;  %v1960_v28 = vsel %vm1956_vm5, %v11937_v14, %v11938_v13 }
  0xb1   : > { %v13475_v17 = vpop.permute.xlu0 %11945  ;;  %v11952_v21 = vunpack.i.l.bf16 %v13477_v18  ;;  %v11953_v25 = vunpack.i.h.bf16 %v13477_v18  ;;  %v10635_v35 = vpack.c.bf16 %v1964_v29, %v1960_v28 }
  0xb2   : > { %9843 = vmatmul.mubr.msk.f32.gmra.mrb[14].mxu1 %vm316_vm0, %v9827_v47  ;;  %v11947_v20 = vunpack.i.l.bf16 %v13475_v17  ;;  %v11948_v24 = vunpack.i.h.bf16 %v13475_v17  ;;  %v9898_v17 = vld [vmem:[%s16843_s2 + $0x130] sm:$0xff] }
  0xb3   : > { %9835 = vmatmul.mubr.msk.f32.gmra.mrb[14].mxu0 %vm316_vm0, %v9827_v47  ;;  %1170 = vmatprep.mubr.f32.mxu1 %v16859_v0  ;;  %v1962_v32 = vsel %vm1956_vm5, %v11952_v21, %v11953_v25 }
  0xb4   : > { %1057 = vmatprep.mubr.f32.mxu0 %v16859_v0  ;;  %v1958_v31 = vsel %vm1956_vm5, %v11947_v20, %v11948_v24  ;;  %v13565_v44 = vpop.permute.xlu1 %11960  ;;  %v1959_v57 = vsel %vm1956_vm5, %v11948_v24, %v11937_v14  ;;  %v9897_v14 = vld [vmem:[%s16843_s2 + $0x128] sm:$0xff] }
  0xb5   : > { %v10631_v36 = vpack.c.bf16 %v1962_v32, %v1958_v31  ;;  %v11956_v41 = vpop.permute.xlu0 %11955  ;;  %v11963_v46 = vunpack.i.h.bf16 %v13565_v44  ;;  %v11962_v47 = vunpack.i.l.bf16 %v13565_v44 }
  0xb6   : > { %9860 = vmatmul.mubr.msk.f32.vlgmr.msra.gmra.mrb[0].mxu1 %vm316_vm0, %v9844_v58  ;;  %v11958_v48 = vunpack.i.h.bf16 %v11956_v41  ;;  %v11957_v49 = vunpack.i.l.bf16 %v11956_v41  ;;  %v253_v41 = vld [vmem:[%s16844_s3 + $0x8] sm:$0xff] }
  0xb7   : > { %9852 = vmatmul.mubr.msk.f32.vlgmr.msra.gmra.mrb[0].mxu0 %vm316_vm0, %v9844_v58  ;;  %1176 = vmatprep.mubr.f32.mxu1 %v16859_v0  ;;  %v1963_v58 = vsel %vm1956_vm5, %v11953_v25, %v11942_v16 }
  0xb8   : > { %1063 = vmatprep.mubr.f32.mxu0 %v16859_v0  ;;  %10622 = vmatpush1.bf16.msra.mxu1 %v10621_v61  ;;  %v13581_v53 = vpop.permute.xlu1 %11970  ;;  %v1957_v61 = vsel %vm1956_vm5, %v11957_v49, %v11947_v20  ;;  %v255_v49 = vld [vmem:[%s16844_s3 + $0x18] sm:$0xff] }
  0xb9   : > { %10618 = vmatpush1.bf16.msra.mxu0 %v10617_v62  ;;  %10628 = vmatprep.subr.bf16.mxu1 %v10627_v63  ;;  %v13563_v43 = vpop.permute.xlu0 %11965  ;;  %v11972_v56 = vunpack.i.l.bf16 %v13581_v53  ;;  %v11973_v60 = vunpack.i.h.bf16 %v13581_v53  ;;  %v1961_v62 = vsel %vm1956_vm5, %v11958_v48, %v11952_v21  ;;  %v2288_v63 = vsel %vm2284_vm6, %v11962_v47, %v11963_v46  ;;  %v254_v48 = vld [vmem:[%s16844_s3 + $0x10] sm:$0xff]  ;;  %v9919_v53 = vld [vmem:[%s16843_s2 + $0x158] sm:$0xff] }
  0xba   : > { %9861 = vmatmul.mubr.msk.f32.gmra.mrb[2].mxu1 %vm316_vm0, %v9845_v2  ;;  %10624 = vmatprep.subr.bf16.mxu0 %v10623_v1  ;;  %v11968_v50 = vunpack.i.h.bf16 %v13563_v43  ;;  %v11967_v51 = vunpack.i.l.bf16 %v13563_v43  ;;  %v10633_v6 = vpack.c.bf16 %v1961_v62, %v1957_v61  ;;  %v13105_v43 = vmov 0   ;;  %v9922_v61 = vld [vmem:[%s16843_s2 + $0x170] sm:$0xff] }
  0xbb   : > { %9853 = vmatmul.mubr.msk.f32.gmra.mrb[2].mxu0 %vm316_vm0, %v9845_v2  ;;  %1182 = vmatprep.mubr.f32.mxu1 %v16859_v0  ;;  %v9892_v2 = vld [vmem:[%s16843_s2 + $0x100] sm:$0xff] }
  0xbc   : > { %1069 = vmatprep.mubr.f32.mxu0 %v16859_v0  ;;  %v2292_v1 = vsel %vm2284_vm6, %v11967_v51, %v11968_v50  ;;  %v11981_v13 = vpop.permute.xlu1 %11980  ;;  %12034 = vset.pattern.permute.xlu0 %v13105_v43  ;;  %v9918_v50 = vld [vmem:[%s16843_s2 + $0x150] sm:$0xff] }
  0xbd   : > { %v13579_v52 = vpop.permute.xlu0 %11975  ;;  %v11983_v18 = vunpack.i.h.bf16 %v11981_v13  ;;  %12035 = vset.pattern.permute.xlu1 %v13105_v43  ;;  %v9966_v43 = vld [vmem:[%s16843_s2 + $0x1d0] sm:$0xff] }
  0xbe   : > { %9862 = vmatmul.mubr.msk.f32.gmra.mrb[4].mxu1 %vm316_vm0, %v9846_v3  ;;  %v11977_v55 = vunpack.i.l.bf16 %v13579_v52  ;;  %v11978_v59 = vunpack.i.h.bf16 %v13579_v52  ;;  %267 = vperm.xlu1 %12035, %v253_v41   ;;  %v257_v52 = vld [vmem:[%s16844_s3 + $0x28] sm:$0xff] }
  0xbf   : > { %9854 = vmatmul.mubr.msk.f32.gmra.mrb[4].mxu0 %vm316_vm0, %v9846_v3  ;;  %1188 = vmatprep.mubr.f32.mxu1 %v16859_v0  ;;  %v2286_v3 = vsel %vm2284_vm6, %v11972_v56, %v11973_v60 }
  0xc0   : > { %1075 = vmatprep.mubr.f32.mxu0 %v16859_v0  ;;  %v13669_v16 = vpop.permute.xlu1 %11990  ;;  %v2291_v29 = vsel %vm2284_vm6, %v11978_v59, %v11967_v51  ;;  %v256_v51 = vld [vmem:[%s16844_s3 + $0x20] sm:$0xff] }
  0xc1   : > { %v13667_v15 = vpop.permute.xlu0 %11985  ;;  %v11993_v22 = vunpack.i.h.bf16 %v13669_v16  ;;  %v11992_v23 = vunpack.i.l.bf16 %v13669_v16 }
  0xc2   : > { %9863 = vmatmul.mubr.msk.f32.gmra.mrb[6].mxu1 %vm316_vm0, %v9847_v4  ;;  %v11988_v20 = vunpack.i.h.bf16 %v13667_v15  ;;  %v11987_v21 = vunpack.i.l.bf16 %v13667_v15  ;;  %272 = vperm.xlu1 %12035, %v254_v48   ;;  %v9971_v48 = vld [vmem:[%s16843_s2 + $0x1f8] sm:$0xff] }
  0xc3   : > { %9855 = vmatmul.mubr.msk.f32.gmra.mrb[6].mxu0 %vm316_vm0, %v9847_v4  ;;  %1194 = vmatprep.mubr.f32.mxu1 %v16859_v0  ;;  %v2290_v4 = vsel %vm2284_vm6, %v11977_v55, %v11978_v59 }
  0xc4   : > { %1081 = vmatprep.mubr.f32.mxu0 %v16859_v0  ;;  %v10639_v8 = vpack.c.bf16 %v2290_v4, %v2286_v3  ;;  %v13685_v25 = vpop.permute.xlu1 %12000 }
  0xc5   : > { %v13683_v24 = vpop.permute.xlu0 %11995  ;;  %v12002_v28 = vunpack.i.l.bf16 %v13685_v25  ;;  %v12003_v32 = vunpack.i.h.bf16 %v13685_v25  ;;  %v9941_v25 = vld [vmem:[%s16843_s2 + $0x188] sm:$0xff] }
  0xc6   : > { %9864 = vmatmul.mubr.msk.f32.gmra.mrb[8].mxu1 %vm316_vm0, %v9848_v5  ;;  %v11997_v27 = vunpack.i.l.bf16 %v13683_v24  ;;  %v11998_v31 = vunpack.i.h.bf16 %v13683_v24  ;;  %282 = vperm.xlu1 %12035, %v256_v51   ;;  %v9990_v51 = vld [vmem:[%s16843_s2 + $0x210] sm:$0xff] }
  0xc7   : > { %9856 = vmatmul.mubr.msk.f32.gmra.mrb[8].mxu0 %vm316_vm0, %v9848_v5  ;;  %1200 = vmatprep.mubr.f32.mxu1 %v16859_v0  ;;  %v10637_v5 = vpack.c.bf16 %v1963_v58, %v1959_v57  ;;  %v9921_v58 = vld [vmem:[%s16843_s2 + $0x168] sm:$0xff] }
  0xc8   : > { %1087 = vmatprep.mubr.f32.mxu0 %v16859_v0 }
  0xc9   : > { %v12006_v57 = vpop.permute.xlu0 %12005 }
  0xca   : > { %9865 = vmatmul.mubr.msk.f32.gmra.mrb[10].mxu1 %vm316_vm0, %v9849_v7  ;;  %v12008_v62 = vunpack.i.h.bf16 %v12006_v57 }
  0xcb   : > { %9857 = vmatmul.mubr.msk.f32.gmra.mrb[10].mxu0 %vm316_vm0, %v9849_v7  ;;  %1206 = vmatprep.mubr.f32.mxu1 %v16859_v0  ;;  %v10643_v7 = vpack.c.bf16 %v2292_v1, %v2288_v63  ;;  %v12007_v63 = vunpack.i.l.bf16 %v12006_v57  ;;  %v3241_v57 = vlaneseq }
  0xcc   : > { %1093 = vmatprep.mubr.f32.mxu0 %v16859_v0  ;;  %v2617_v15 = vsel %vm2612_vm7, %v12008_v62, %v12002_v28 }
  0xcd   : > { %v13795_v59 = vpop.permute.xlu0 %12015 }
  0xce   : > { %9866 = vmatmul.mubr.msk.f32.gmra.mrb[12].mxu1 %vm316_vm0, %v9850_v10  ;;  %v12018_v1 = vunpack.i.h.bf16 %v13795_v59 }
  0xcf   : > { %9858 = vmatmul.mubr.msk.f32.gmra.mrb[12].mxu0 %vm316_vm0, %v9850_v10  ;;  %1212 = vmatprep.mubr.f32.mxu1 %v16859_v0  ;;  %v9894_v10 = vld [vmem:[%s16843_s2 + $0x110] sm:$0xff] }
  0xd0   : > { %1099 = vmatprep.mubr.f32.mxu0 %v16859_v0 }
  0xd2   : > { %9867 = vmatmul.mubr.msk.f32.gmra.mrb[14].mxu1 %vm316_vm0, %v9851_v19 }
  0xd3   : > { %9859 = vmatmul.mubr.msk.f32.gmra.mrb[14].mxu0 %vm316_vm0, %v9851_v19  ;;  %1518 = vmatprep.mubr.f32.mxu1 %v16859_v0  ;;  %v11982_v19 = vunpack.i.l.bf16 %v11981_v13 }
  0xd4   : > { %1405 = vmatprep.mubr.f32.mxu0 %v16859_v0 }
  0xd6   : > { %9884 = vmatmul.mubr.msk.f32.vlgmr.msra.gmra.mrb[0].mxu1 %vm316_vm0, %v9868_v30 }
  0xd7   : > { %9876 = vmatmul.mubr.msk.f32.vlgmr.msra.gmra.mrb[0].mxu0 %vm316_vm0, %v9868_v30  ;;  %1524 = vmatprep.mubr.f32.mxu1 %v16859_v0  ;;  %v2287_v30 = vsel %vm2284_vm6, %v11973_v60, %v11962_v47  ;;  %v9917_v47 = vld [vmem:[%s16843_s2 + $0x148] sm:$0xff]  ;;  %v13797_v60 = vpop.permute.xlu1 %12010 }
  0xd8   : > { %1411 = vmatprep.mubr.f32.mxu0 %v16859_v0  ;;  %10630 = vmatpush1.bf16.msra.mxu1 %v10629_v33  ;;  %v2289_v33 = vsel %vm2284_vm6, %v11983_v18, %v11977_v55  ;;  %v259_v55 = vld [vmem:[%s16844_s3 + $0x38] sm:$0xff]  ;;  %v12013_v3 = vunpack.i.h.bf16 %v13797_v60  ;;  %v12012_v4 = vunpack.i.l.bf16 %v13797_v60  ;;  %v9940_v18 = vld [vmem:[%s16843_s2 + $0x180] sm:$0xff] }
  0xd9   : > { %10626 = vmatpush1.bf16.msra.mxu0 %v10625_v34  ;;  %10636 = vmatprep.subr.bf16.mxu1 %v10635_v35  ;;  %v2285_v34 = vsel %vm2284_vm6, %v11982_v19, %v11972_v56  ;;  %v2616_v35 = vsel %vm2612_vm7, %v11987_v21, %v11988_v20  ;;  %v9920_v56 = vld [vmem:[%s16843_s2 + $0x160] sm:$0xff] }
  0xda   : > { %9885 = vmatmul.mubr.msk.f32.gmra.mrb[2].mxu1 %vm316_vm0, %v9869_v37  ;;  %10632 = vmatprep.subr.bf16.mxu0 %v10631_v36  ;;  %v2620_v36 = vsel %vm2612_vm7, %v11992_v23, %v11993_v22  ;;  %v10641_v44 = vpack.c.bf16 %v2289_v33, %v2285_v34  ;;  %v2944_v16 = vsel %vm2940_vm8, %v12012_v4, %v12013_v3  ;;  %v9947_v34 = vld [vmem:[%s16843_s2 + $0x1b8] sm:$0xff]  ;;  %v3239_v60 = vld [vmem:[%s16842_s1] sm:$0xf] }
  0xdb   : > { %9877 = vmatmul.mubr.msk.f32.gmra.mrb[2].mxu0 %vm316_vm0, %v9869_v37  ;;  %1530 = vmatprep.mubr.f32.mxu1 %v16859_v0  ;;  %v9916_v37 = vld [vmem:[%s16843_s2 + $0x140] sm:$0xff] }
  0xdc   : > { %1417 = vmatprep.mubr.f32.mxu0 %v16859_v0 }
  0xde   : > { %9886 = vmatmul.mubr.msk.f32.gmra.mrb[4].mxu1 %vm316_vm0, %v9870_v38 }
  0xdf   : > { %9878 = vmatmul.mubr.msk.f32.gmra.mrb[4].mxu0 %vm316_vm0, %v9870_v38  ;;  %1536 = vmatprep.mubr.f32.mxu1 %v16859_v0  ;;  %v2614_v38 = vsel %vm2612_vm7, %v11997_v27, %v11998_v31 }
  0xe0   : > { %1423 = vmatprep.mubr.f32.mxu0 %v16859_v0 }
  0xe2   : > { %9887 = vmatmul.mubr.msk.f32.gmra.mrb[6].mxu1 %vm316_vm0, %v9871_v39 }
  0xe3   : > { %9879 = vmatmul.mubr.msk.f32.gmra.mrb[6].mxu0 %vm316_vm0, %v9871_v39  ;;  %1542 = vmatprep.mubr.f32.mxu1 %v16859_v0  ;;  %v2618_v39 = vsel %vm2612_vm7, %v12002_v28, %v12003_v32  ;;  %v9944_v28 = vld [vmem:[%s16843_s2 + $0x1a0] sm:$0xff] }
  0xe4   : > { %1429 = vmatprep.mubr.f32.mxu0 %v16859_v0  ;;  %v10647_v46 = vpack.c.bf16 %v2618_v39, %v2614_v38  ;;  %v9964_v39 = vld [vmem:[%s16843_s2 + $0x1c0] sm:$0xff] }
  0xe6   : > { %9888 = vmatmul.mubr.msk.f32.gmra.mrb[8].mxu1 %vm316_vm0, %v9872_v40 }
  0xe7   : > { %9880 = vmatmul.mubr.msk.f32.gmra.mrb[8].mxu0 %vm316_vm0, %v9872_v40  ;;  %1548 = vmatprep.mubr.f32.mxu1 %v16859_v0  ;;  %v252_v40 = vld [vmem:[%s16844_s3] sm:$0xff] }
  0xe8   : > { %1435 = vmatprep.mubr.f32.mxu0 %v16859_v0  ;;  %262 = vperm.xlu0 %12034, %v252_v40  }
  0xea   : > { %9889 = vmatmul.mubr.msk.f32.gmra.mrb[10].mxu1 %vm316_vm0, %v9873_v42 }
  0xeb   : > { %9881 = vmatmul.mubr.msk.f32.gmra.mrb[10].mxu0 %vm316_vm0, %v9873_v42  ;;  %1554 = vmatprep.mubr.f32.mxu1 %v16859_v0  ;;  %v10645_v42 = vpack.c.bf16 %v2291_v29, %v2287_v30  ;;  %v9945_v29 = vld [vmem:[%s16843_s2 + $0x1a8] sm:$0xff]  ;;  %v9946_v30 = vld [vmem:[%s16843_s2 + $0x1b0] sm:$0xff] }
  0xec   : > { %1441 = vmatprep.mubr.f32.mxu0 %v16859_v0  ;;  %277 = vperm.xlu0 %12034, %v255_v49   ;;  %v9988_v49 = vld [vmem:[%s16843_s2 + $0x200] sm:$0xff] }
  0xee   : > { %9890 = vmatmul.mubr.msk.f32.gmra.mrb[12].mxu1 %vm316_vm0, %v9874_v45 }
  0xef   : > { %9882 = vmatmul.mubr.msk.f32.gmra.mrb[12].mxu0 %vm316_vm0, %v9874_v45  ;;  %1560 = vmatprep.mubr.f32.mxu1 %v16859_v0  ;;  %v10651_v45 = vpack.c.bf16 %v2620_v36, %v2616_v35 }
  0xf0   : > { %1447 = vmatprep.mubr.f32.mxu0 %v16859_v0  ;;  %287 = vperm.xlu0 %12034, %v257_v52   ;;  %v9991_v52 = vld [vmem:[%s16843_s2 + $0x218] sm:$0xff] }
  0xf2   : > { %9891 = vmatmul.mubr.msk.f32.gmra.mrb[14].mxu1 %vm316_vm0, %v9875_v54 }
  0xf3   : > { %9883 = vmatmul.mubr.msk.f32.gmra.mrb[14].mxu0 %vm316_vm0, %v9875_v54  ;;  %1846 = vmatprep.mubr.f32.mxu1 %v16859_v0  ;;  %v258_v54 = vld [vmem:[%s16844_s3 + $0x30] sm:$0xff] }
  0xf4   : > { %1733 = vmatprep.mubr.f32.mxu0 %v16859_v0  ;;  %292 = vperm.xlu1 %12035, %v258_v54   ;;  %v9993_v54 = vld [vmem:[%s16843_s2 + $0x228] sm:$0xff] }
  0xf5   : > { %297 = vperm.xlu0 %12034, %v259_v55   ;;  %v9994_v55 = vld [vmem:[%s16843_s2 + $0x230] sm:$0xff] }
  0xf6   : > { %9908 = vmatmul.mubr.msk.f32.vlgmr.msra.gmra.mrb[0].mxu1 %vm316_vm0, %v9892_v2 }
  0xf7   : > { %9900 = vmatmul.mubr.msk.f32.vlgmr.msra.gmra.mrb[0].mxu0 %vm316_vm0, %v9892_v2  ;;  %1852 = vmatprep.mubr.f32.mxu1 %v16859_v0  ;;  %v12017_v2 = vunpack.i.l.bf16 %v13795_v59 }
  0xf8   : > { %1739 = vmatprep.mubr.f32.mxu0 %v16859_v0  ;;  %10638 = vmatpush1.bf16.msra.mxu1 %v10637_v5  ;;  %v13811_v5 = vpop.permute.xlu0 %12025 }
  0xf9   : > { %10634 = vmatpush1.bf16.msra.mxu0 %v10633_v6  ;;  %10644 = vmatprep.subr.bf16.mxu1 %v10643_v7  ;;  %v13813_v6 = vpop.permute.xlu1 %12020  ;;  %v9923_v7 = vld [vmem:[%s16843_s2 + $0x178] sm:$0xff] }
  0xfa   : > { %9909 = vmatmul.mubr.msk.f32.gmra.mrb[2].mxu1 %vm316_vm0, %v9893_v9  ;;  %10640 = vmatprep.subr.bf16.mxu0 %v10639_v8  ;;  %v12027_v8 = vunpack.i.l.bf16 %v13811_v5  ;;  %v12023_v13 = vunpack.i.h.bf16 %v13813_v6 }
  0xfb   : > { %9901 = vmatmul.mubr.msk.f32.gmra.mrb[2].mxu0 %vm316_vm0, %v9893_v9  ;;  %1858 = vmatprep.mubr.f32.mxu1 %v16859_v0  ;;  %v12022_v9 = vunpack.i.l.bf16 %v13813_v6 }
  0xfc   : > { %1745 = vmatprep.mubr.f32.mxu0 %v16859_v0  ;;  %v2943_v36 = vsel %vm2940_vm8, %v12023_v13, %v12012_v4 }
  0xfd   : > { %v2942_v19 = vsel %vm2940_vm8, %v12022_v9, %v12023_v13 }
  0xfe   : > { %9910 = vmatmul.mubr.msk.f32.gmra.mrb[4].mxu1 %vm316_vm0, %v9894_v10 }
  0xff   : > { %9902 = vmatmul.mubr.msk.f32.gmra.mrb[4].mxu0 %vm316_vm0, %v9894_v10  ;;  %1864 = vmatprep.mubr.f32.mxu1 %v16859_v0  ;;  %v2615_v10 = vsel %vm2612_vm7, %v11998_v31, %v11987_v21  ;;  %v12031_v31 = vpop.permute.xlu1 %12030 }
 0x100   : > { %1751 = vmatprep.mubr.f32.mxu0 %v16859_v0  ;;  %v12032_v33 = vunpack.i.l.bf16 %v12031_v31 }
 0x102   : > { %9911 = vmatmul.mubr.msk.f32.gmra.mrb[6].mxu1 %vm316_vm0, %v9895_v11  ;;  %v2941_v38 = vsel %vm2940_vm8, %v12032_v33, %v12022_v9 }
 0x103   : > { %9903 = vmatmul.mubr.msk.f32.gmra.mrb[6].mxu0 %vm316_vm0, %v9895_v11  ;;  %1870 = vmatprep.mubr.f32.mxu1 %v16859_v0  ;;  %v2619_v11 = vsel %vm2612_vm7, %v12003_v32, %v11992_v23  ;;  %v12033_v32 = vunpack.i.h.bf16 %v12031_v31 }
 0x104   : > { %1757 = vmatprep.mubr.f32.mxu0 %v16859_v0  ;;  %v10653_v21 = vpack.c.bf16 %v2619_v11, %v2615_v10 }
 0x106   : > { %9912 = vmatmul.mubr.msk.f32.gmra.mrb[8].mxu1 %vm316_vm0, %v9896_v12 }
 0x107   : > { %9904 = vmatmul.mubr.msk.f32.gmra.mrb[8].mxu0 %vm316_vm0, %v9896_v12  ;;  %1876 = vmatprep.mubr.f32.mxu1 %v16859_v0  ;;  %v12028_v12 = vunpack.i.h.bf16 %v13811_v5 }
 0x108   : > { %1763 = vmatprep.mubr.f32.mxu0 %v16859_v0 }
 0x109   : > { %v2946_v20 = vsel %vm2940_vm8, %v12027_v8, %v12028_v12  ;;  %v2947_v35 = vsel %vm2940_vm8, %v12028_v12, %v12017_v2 }
 0x10a   : > { %9913 = vmatmul.mubr.msk.f32.gmra.mrb[10].mxu1 %vm316_vm0, %v9897_v14  ;;  %v10655_v24 = vpack.c.bf16 %v2946_v20, %v2942_v19  ;;  %v10661_v40 = vpack.c.bf16 %v2947_v35, %v2943_v36 }
 0x10b   : > { %9905 = vmatmul.mubr.msk.f32.gmra.mrb[10].mxu0 %vm316_vm0, %v9897_v14  ;;  %1882 = vmatprep.mubr.f32.mxu1 %v16859_v0  ;;  %v2613_v14 = vsel %vm2612_vm7, %v12007_v63, %v11997_v27  ;;  %v9943_v27 = vld [vmem:[%s16843_s2 + $0x198] sm:$0xff] }
 0x10c   : > { %1769 = vmatprep.mubr.f32.mxu0 %v16859_v0  ;;  %v10649_v22 = vpack.c.bf16 %v2617_v15, %v2613_v14 }
 0x10e   : > { %9914 = vmatmul.mubr.msk.f32.gmra.mrb[12].mxu1 %vm316_vm0, %v9898_v17 }
 0x10f   : > { %9906 = vmatmul.mubr.msk.f32.gmra.mrb[12].mxu0 %vm316_vm0, %v9898_v17  ;;  %1888 = vmatprep.mubr.f32.mxu1 %v16859_v0  ;;  %v2948_v17 = vsel %vm2940_vm8, %v12017_v2, %v12018_v1 }
 0x110   : > { %1775 = vmatprep.mubr.f32.mxu0 %v16859_v0  ;;  %v10659_v23 = vpack.c.bf16 %v2948_v17, %v2944_v16 }
 0x112   : > { %9915 = vmatmul.mubr.msk.f32.gmra.mrb[14].mxu1 %vm316_vm0, %v9899_v26 }
 0x113   : > { %9907 = vmatmul.mubr.msk.f32.gmra.mrb[14].mxu0 %vm316_vm0, %v9899_v26  ;;  %2174 = vmatprep.mubr.f32.mxu1 %v16859_v0  ;;  %v9942_v26 = vld [vmem:[%s16843_s2 + $0x190] sm:$0xff] }
 0x114   : > { %2061 = vmatprep.mubr.f32.mxu0 %v16859_v0 }
 0x116   : > { %9932 = vmatmul.mubr.msk.f32.vlgmr.msra.gmra.mrb[0].mxu1 %vm316_vm0, %v9916_v37 }
 0x117   : > { %9924 = vmatmul.mubr.msk.f32.vlgmr.msra.gmra.mrb[0].mxu0 %vm316_vm0, %v9916_v37  ;;  %2180 = vmatprep.mubr.f32.mxu1 %v16859_v0  ;;  %v2945_v37 = vsel %vm2940_vm8, %v12033_v32, %v12027_v8 }
 0x118   : > { %2067 = vmatprep.mubr.f32.mxu0 %v16859_v0  ;;  %10646 = vmatpush1.bf16.msra.mxu1 %v10645_v42  ;;  %v10657_v41 = vpack.c.bf16 %v2945_v37, %v2941_v38  ;;  %v9965_v42 = vld [vmem:[%s16843_s2 + $0x1c8] sm:$0xff] }
 0x119   : > { %10642 = vmatpush1.bf16.msra.mxu0 %v10641_v44  ;;  %10652 = vmatprep.subr.bf16.mxu1 %v10651_v45  ;;  %v9967_v44 = vld [vmem:[%s16843_s2 + $0x1d8] sm:$0xff]  ;;  %v9968_v45 = vld [vmem:[%s16843_s2 + $0x1e0] sm:$0xff] }
 0x11a   : > { %9933 = vmatmul.mubr.msk.f32.gmra.mrb[2].mxu1 %vm316_vm0, %v9917_v47  ;;  %10648 = vmatprep.subr.bf16.mxu0 %v10647_v46  ;;  %v9969_v46 = vld [vmem:[%s16843_s2 + $0x1e8] sm:$0xff] }
 0x11b   : > { %9925 = vmatmul.mubr.msk.f32.gmra.mrb[2].mxu0 %vm316_vm0, %v9917_v47  ;;  %2186 = vmatprep.mubr.f32.mxu1 %v16859_v0  ;;  %v9970_v47 = vld [vmem:[%s16843_s2 + $0x1f0] sm:$0xff] }
 0x11c   : > { %2073 = vmatprep.mubr.f32.mxu0 %v16859_v0 }
 0x11e   : > { %9934 = vmatmul.mubr.msk.f32.gmra.mrb[4].mxu1 %vm316_vm0, %v9918_v50 }
 0x11f   : > { %9926 = vmatmul.mubr.msk.f32.gmra.mrb[4].mxu0 %vm316_vm0, %v9918_v50  ;;  %2192 = vmatprep.mubr.f32.mxu1 %v16859_v0  ;;  %v9989_v50 = vld [vmem:[%s16843_s2 + $0x208] sm:$0xff] }
 0x120   : > { %2079 = vmatprep.mubr.f32.mxu0 %v16859_v0 }
 0x122   : > { %9935 = vmatmul.mubr.msk.f32.gmra.mrb[6].mxu1 %vm316_vm0, %v9919_v53 }
 0x123   : > { %9927 = vmatmul.mubr.msk.f32.gmra.mrb[6].mxu0 %vm316_vm0, %v9919_v53  ;;  %2198 = vmatprep.mubr.f32.mxu1 %v16859_v0  ;;  %v9992_v53 = vld [vmem:[%s16843_s2 + $0x220] sm:$0xff] }
 0x124   : > { %2085 = vmatprep.mubr.f32.mxu0 %v16859_v0 }
 0x126   : > { %9936 = vmatmul.mubr.msk.f32.gmra.mrb[8].mxu1 %vm316_vm0, %v9920_v56 }
 0x127   : > { %9928 = vmatmul.mubr.msk.f32.gmra.mrb[8].mxu0 %vm316_vm0, %v9920_v56  ;;  %2204 = vmatprep.mubr.f32.mxu1 %v16859_v0  ;;  %v9995_v56 = vld [vmem:[%s16843_s2 + $0x238] sm:$0xff] }
 0x128   : > { %2091 = vmatprep.mubr.f32.mxu0 %v16859_v0 }
 0x12a   : > { %9937 = vmatmul.mubr.msk.f32.gmra.mrb[10].mxu1 %vm316_vm0, %v9921_v58 }
 0x12b   : > { %9929 = vmatmul.mubr.msk.f32.gmra.mrb[10].mxu0 %vm316_vm0, %v9921_v58  ;;  %2210 = vmatprep.mubr.f32.mxu1 %v16859_v0  ;;  %v3242_v58 = vshrl.u32 %v3241_v57, 7 }
 0x12c   : > { %2097 = vmatprep.mubr.f32.mxu0 %v16859_v0 }
 0x12d   : > { %v3251_v59 = vsub.s32 2, %v3242_v58  ;;  %v3255_v62 = vsub.s32 3, %v3242_v58  ;;  %v3247_v63 = vsub.s32 1, %v3242_v58 }
 0x12e   : > { %9938 = vmatmul.mubr.msk.f32.gmra.mrb[12].mxu1 %vm316_vm0, %v9922_v61 }
 0x12f   : > { %9930 = vmatmul.mubr.msk.f32.gmra.mrb[12].mxu0 %vm316_vm0, %v9922_v61  ;;  %2216 = vmatprep.mubr.f32.mxu1 %v16859_v0  ;;  %v3243_v61 = vsub.s32 0, %v3242_v58  ;;  %v14040_v1 = vrot.slane %v3239_v60, %v3251_v59  ;;  %v14044_v5 = vrot.slane %v3239_v60, %v3255_v62  ;;  %v14046_v9 = vrot.slane %v3239_v60, %v3247_v63 }
 0x130   : > { %2103 = vmatprep.mubr.f32.mxu0 %v16859_v0 }
 0x131   : > { %v14042_v4 = vrot.slane %v3239_v60, %v3243_v61 }
 0x132   : > { %9939 = vmatmul.mubr.msk.f32.gmra.mrb[14].mxu1 %vm316_vm0, %v9923_v7 }
 0x133   : > { %9931 = vmatmul.mubr.msk.f32.gmra.mrb[14].mxu0 %vm316_vm0, %v9923_v7  ;;  %2502 = vmatprep.mubr.f32.mxu1 %v16859_v0 }
 0x134   : > { %2389 = vmatprep.mubr.f32.mxu0 %v16859_v0 }
 0x136   : > { %9956 = vmatmul.mubr.msk.f32.vlgmr.msra.gmra.mrb[0].mxu1 %vm316_vm0, %v9940_v18 }
 0x137   : > { %9948 = vmatmul.mubr.msk.f32.vlgmr.msra.gmra.mrb[0].mxu0 %vm316_vm0, %v9940_v18  ;;  %2508 = vmatprep.mubr.f32.mxu1 %v16859_v0 }
 0x138   : > { %2395 = vmatprep.mubr.f32.mxu0 %v16859_v0  ;;  %10654 = vmatpush1.bf16.msra.mxu1 %v10653_v21 }
 0x139   : > { %10650 = vmatpush1.bf16.msra.mxu0 %v10649_v22  ;;  %10660 = vmatprep.subr.bf16.mxu1 %v10659_v23 }
 0x13a   : > { %9957 = vmatmul.mubr.msk.f32.gmra.mrb[2].mxu1 %vm316_vm0, %v9941_v25  ;;  %10656 = vmatprep.subr.bf16.mxu0 %v10655_v24 }
 0x13b   : > { %9949 = vmatmul.mubr.msk.f32.gmra.mrb[2].mxu0 %vm316_vm0, %v9941_v25  ;;  %2514 = vmatprep.mubr.f32.mxu1 %v16859_v0 }
 0x13c   : > { %2401 = vmatprep.mubr.f32.mxu0 %v16859_v0 }
 0x13d   : > { %v268_v13 = vpop.permute.xlu1 %267 }
 0x13e   : > { %9958 = vmatmul.mubr.msk.f32.gmra.mrb[4].mxu1 %vm316_vm0, %v9942_v26 }
 0x13f   : > { %9950 = vmatmul.mubr.msk.f32.gmra.mrb[4].mxu0 %vm316_vm0, %v9942_v26  ;;  %2520 = vmatprep.mubr.f32.mxu1 %v16859_v0 }
 0x140   : > { %2407 = vmatprep.mubr.f32.mxu0 %v16859_v0 }
 0x141   : > { %v273_v32 = vpop.permute.xlu1 %272 }
 0x142   : > { %9959 = vmatmul.mubr.msk.f32.gmra.mrb[6].mxu1 %vm316_vm0, %v9943_v27 }
 0x143   : > { %9951 = vmatmul.mubr.msk.f32.gmra.mrb[6].mxu0 %vm316_vm0, %v9943_v27  ;;  %2526 = vmatprep.mubr.f32.mxu1 %v16859_v0 }
 0x144   : > { %2413 = vmatprep.mubr.f32.mxu0 %v16859_v0 }
 0x146   : > { %9960 = vmatmul.mubr.msk.f32.gmra.mrb[8].mxu1 %vm316_vm0, %v9944_v28 }
 0x147   : > { %9952 = vmatmul.mubr.msk.f32.gmra.mrb[8].mxu0 %vm316_vm0, %v9944_v28  ;;  %2532 = vmatprep.mubr.f32.mxu1 %v16859_v0 }
 0x148   : > { %2419 = vmatprep.mubr.f32.mxu0 %v16859_v0 }
 0x14a   : > { %9961 = vmatmul.mubr.msk.f32.gmra.mrb[10].mxu1 %vm316_vm0, %v9945_v29 }
 0x14b   : > { %9953 = vmatmul.mubr.msk.f32.gmra.mrb[10].mxu0 %vm316_vm0, %v9945_v29  ;;  %2538 = vmatprep.mubr.f32.mxu1 %v16859_v0 }
 0x14c   : > { %2425 = vmatprep.mubr.f32.mxu0 %v16859_v0 }
 0x14e   : > { %9962 = vmatmul.mubr.msk.f32.gmra.mrb[12].mxu1 %vm316_vm0, %v9946_v30 }
 0x14f   : > { %9954 = vmatmul.mubr.msk.f32.gmra.mrb[12].mxu0 %vm316_vm0, %v9946_v30  ;;  %2544 = vmatprep.mubr.f32.mxu1 %v16859_v0 }
 0x150   : > { %2431 = vmatprep.mubr.f32.mxu0 %v16859_v0 }
 0x152   : > { %9963 = vmatmul.mubr.msk.f32.gmra.mrb[14].mxu1 %vm316_vm0, %v9947_v34 }
 0x153   : > { %9955 = vmatmul.mubr.msk.f32.gmra.mrb[14].mxu0 %vm316_vm0, %v9947_v34  ;;  %2830 = vmatprep.mubr.f32.mxu1 %v16859_v0 }
 0x154   : > { %2717 = vmatprep.mubr.f32.mxu0 %v16859_v0 }
 0x156   : > { %9980 = vmatmul.mubr.msk.f32.vlgmr.msra.gmra.mrb[0].mxu1 %vm316_vm0, %v9964_v39 }
 0x157   : > { %9972 = vmatmul.mubr.msk.f32.vlgmr.msra.gmra.mrb[0].mxu0 %vm316_vm0, %v9964_v39  ;;  %2836 = vmatprep.mubr.f32.mxu1 %v16859_v0 }
 0x158   : > { %2723 = vmatprep.mubr.f32.mxu0 %v16859_v0  ;;  %10662 = vmatpush1.bf16.msra.mxu1 %v10661_v40 }
 0x159   : > { %10658 = vmatpush1.bf16.msra.mxu0 %v10657_v41 }
 0x15a   : > { %9981 = vmatmul.mubr.msk.f32.gmra.mrb[2].mxu1 %vm316_vm0, %v9965_v42 }
 0x15b   : > { %9973 = vmatmul.mubr.msk.f32.gmra.mrb[2].mxu0 %vm316_vm0, %v9965_v42  ;;  %2842 = vmatprep.mubr.f32.mxu1 %v16859_v0 }
 0x15c   : > { %2729 = vmatprep.mubr.f32.mxu0 %v16859_v0 }
 0x15e   : > { %9982 = vmatmul.mubr.msk.f32.gmra.mrb[4].mxu1 %vm316_vm0, %v9966_v43 }
 0x15f   : > { %9974 = vmatmul.mubr.msk.f32.gmra.mrb[4].mxu0 %vm316_vm0, %v9966_v43  ;;  %2848 = vmatprep.mubr.f32.mxu1 %v16859_v0 }
 0x160   : > { %2735 = vmatprep.mubr.f32.mxu0 %v16859_v0 }
 0x162   : > { %9983 = vmatmul.mubr.msk.f32.gmra.mrb[6].mxu1 %vm316_vm0, %v9967_v44 }
 0x163   : > { %9975 = vmatmul.mubr.msk.f32.gmra.mrb[6].mxu0 %vm316_vm0, %v9967_v44  ;;  %2854 = vmatprep.mubr.f32.mxu1 %v16859_v0 }
 0x164   : > { %2741 = vmatprep.mubr.f32.mxu0 %v16859_v0 }
 0x166   : > { %9984 = vmatmul.mubr.msk.f32.gmra.mrb[8].mxu1 %vm316_vm0, %v9968_v45 }
 0x167   : > { %9976 = vmatmul.mubr.msk.f32.gmra.mrb[8].mxu0 %vm316_vm0, %v9968_v45  ;;  %2860 = vmatprep.mubr.f32.mxu1 %v16859_v0  ;;  %v263_v2 = vpop.permute.xlu0 %262 }
 0x168   : > { %2747 = vmatprep.mubr.f32.mxu0 %v16859_v0 }
 0x16a   : > { %9985 = vmatmul.mubr.msk.f32.gmra.mrb[10].mxu1 %vm316_vm0, %v9969_v46 }
 0x16b   : > { %9977 = vmatmul.mubr.msk.f32.gmra.mrb[10].mxu0 %vm316_vm0, %v9969_v46  ;;  %2866 = vmatprep.mubr.f32.mxu1 %v16859_v0 }
 0x16c   : > { %2753 = vmatprep.mubr.f32.mxu0 %v16859_v0 }
 0x16e   : > { %9986 = vmatmul.mubr.msk.f32.gmra.mrb[12].mxu1 %vm316_vm0, %v9970_v47 }
 0x16f   : > { %9978 = vmatmul.mubr.msk.f32.gmra.mrb[12].mxu0 %vm316_vm0, %v9970_v47  ;;  %2872 = vmatprep.mubr.f32.mxu1 %v16859_v0 }
 0x170   : > { %2759 = vmatprep.mubr.f32.mxu0 %v16859_v0 }
 0x172   : > { %9987 = vmatmul.mubr.msk.f32.gmra.mrb[14].mxu1 %vm316_vm0, %v9971_v48 }
 0x173   : > { %9979 = vmatmul.mubr.msk.f32.gmra.mrb[14].mxu0 %vm316_vm0, %v9971_v48  ;;  %3158 = vmatprep.mubr.f32.mxu1 %v16859_v0 }
 0x174   : > { %3045 = vmatprep.mubr.f32.mxu0 %v16859_v0 }
 0x176   : > { %10004 = vmatmul.mubr.msk.f32.vlgmr.msra.gmra.mrb[0].mxu1 %vm316_vm0, %v9988_v49 }
 0x177   : > { %9996 = vmatmul.mubr.msk.f32.vlgmr.msra.gmra.mrb[0].mxu0 %vm316_vm0, %v9988_v49  ;;  %3164 = vmatprep.mubr.f32.mxu1 %v16859_v0  ;;  %v278_v49 = vpop.permute.xlu0 %277 }
 0x178   : > { %3051 = vmatprep.mubr.f32.mxu0 %v16859_v0 }
 0x17a   : > { %10005 = vmatmul.mubr.msk.f32.gmra.mrb[2].mxu1 %vm316_vm0, %v9989_v50 }
 0x17b   : > { %9997 = vmatmul.mubr.msk.f32.gmra.mrb[2].mxu0 %vm316_vm0, %v9989_v50  ;;  %3170 = vmatprep.mubr.f32.mxu1 %v16859_v0 }
 0x17c   : > { %3057 = vmatprep.mubr.f32.mxu0 %v16859_v0 }
 0x17e   : > { %10006 = vmatmul.mubr.msk.f32.gmra.mrb[4].mxu1 %vm316_vm0, %v9990_v51 }
 0x17f   : > { %9998 = vmatmul.mubr.msk.f32.gmra.mrb[4].mxu0 %vm316_vm0, %v9990_v51  ;;  %3176 = vmatprep.mubr.f32.mxu1 %v16859_v0 }
 0x180   : > { %3063 = vmatprep.mubr.f32.mxu0 %v16859_v0 }
 0x182   : > { %10007 = vmatmul.mubr.msk.f32.gmra.mrb[6].mxu1 %vm316_vm0, %v9991_v52 }
 0x183   : > { %9999 = vmatmul.mubr.msk.f32.gmra.mrb[6].mxu0 %vm316_vm0, %v9991_v52  ;;  %3182 = vmatprep.mubr.f32.mxu1 %v16859_v0 }
 0x184   : > { %3069 = vmatprep.mubr.f32.mxu0 %v16859_v0 }
 0x186   : > { %10008 = vmatmul.mubr.msk.f32.gmra.mrb[8].mxu1 %vm316_vm0, %v9992_v53 }
 0x187   : > { %10000 = vmatmul.mubr.msk.f32.gmra.mrb[8].mxu0 %vm316_vm0, %v9992_v53  ;;  %3188 = vmatprep.mubr.f32.mxu1 %v16859_v0 }
 0x188   : > { %3075 = vmatprep.mubr.f32.mxu0 %v16859_v0 }
 0x18a   : > { %10009 = vmatmul.mubr.msk.f32.gmra.mrb[10].mxu1 %vm316_vm0, %v9993_v54 }
 0x18b   : > { %10001 = vmatmul.mubr.msk.f32.gmra.mrb[10].mxu0 %vm316_vm0, %v9993_v54  ;;  %3194 = vmatprep.mubr.f32.mxu1 %v16859_v0 }
 0x18c   : > { %3081 = vmatprep.mubr.f32.mxu0 %v16859_v0 }
 0x18e   : > { %10010 = vmatmul.mubr.msk.f32.gmra.mrb[12].mxu1 %vm316_vm0, %v9994_v55 }
 0x18f   : > { %10002 = vmatmul.mubr.msk.f32.gmra.mrb[12].mxu0 %vm316_vm0, %v9994_v55  ;;  %3200 = vmatprep.mubr.f32.mxu1 %v16859_v0 }
 0x190   : > { %3087 = vmatprep.mubr.f32.mxu0 %v16859_v0 }
 0x192   : > { %10011 = vmatmul.mubr.msk.f32.gmra.mrb[14].mxu1 %vm316_vm0, %v9995_v56 }
 0x193   : > { %10003 = vmatmul.mubr.msk.f32.gmra.mrb[14].mxu0 %vm316_vm0, %v9995_v56  ;;  %6818 = vmatprep.mubr.f32.mxu1 %v16859_v0  ;;  %vm8613_vm0 = vcmask 801792  }
 0x194   : > { %3567 = vmatprep.mubr.f32.mxu0 %v16859_v0 }
 0x249   : > { %v3160_v3 = vpop.f32.mrb[0].mxu1 }
 0x24a   : > { %v10967_v6 = vadd.f32 %v3160_v3, %v263_v2  ;;  %v3047_v7 = vpop.f32.mrb[0].mxu0  ;;  %v3162_v8 = vpop.f32.mrb[1].mxu1 }
 0x24b   : > { %v10951_v10 = vadd.f32 %v3047_v7, %v263_v2  ;;  %v10968_v11 = vadd.f32 %v3162_v8, %v263_v2  ;;  %v3049_v12 = vpop.f32.mrb[1].mxu0  ;;  %v283_v8 = vpop.permute.xlu1 %282 }
 0x24c   : > { %v3263_v14 = vmul.f32 %v10967_v6, %v14040_v1  ;;  %v10952_v15 = vadd.f32 %v3049_v12, %v263_v2 }
 0x24d   : > { %v3261_v16 = vmul.f32 %v10951_v10, %v14042_v4  ;;  %v3264_v17 = vmul.f32 %v10968_v11, %v14044_v5  ;;  %v3166_v18 = vpop.f32.mrb[2].mxu1 }
 0x24e   : > { %v3262_v19 = vmul.f32 %v10952_v15, %v14046_v9  ;;  %v10969_v20 = vadd.f32 %v3166_v18, %v268_v13  ;;  %v3053_v21 = vpop.f32.mrb[2].mxu0  ;;  %v3168_v22 = vpop.f32.mrb[3].mxu1 }
 0x24f   : > { %3297 = vst.msk [vmem:[#allocation2 + $0x18] sm:$0xff] %vm3296_vm9, %v3264_v17  ;;  %v10953_v23 = vadd.f32 %v3053_v21, %v268_v13  ;;  %v10970_v24 = vadd.f32 %v3168_v22, %v268_v13  ;;  %v3055_v25 = vpop.f32.mrb[3].mxu0 }
 0x250   : > { %v3267_v26 = vmul.f32 %v10969_v20, %v14040_v1  ;;  %v10954_v27 = vadd.f32 %v3055_v25, %v268_v13  ;;  %v14054_v28 = vpack.i.bf16 %v3262_v19, %v3261_v16  ;;  %v14056_v29 = vpack.i.bf16 %v3263_v14, %v3262_v19 }
 0x251   : > { %v3265_v30 = vmul.f32 %v10953_v23, %v14042_v4  ;;  %v3268_v31 = vmul.f32 %v10970_v24, %v14044_v5  ;;  %v3172_v33 = vpop.f32.mrb[4].mxu1 }
 0x252   : > { %v3266_v34 = vmul.f32 %v10954_v27, %v14046_v9  ;;  %v10971_v35 = vadd.f32 %v3172_v33, %v273_v32  ;;  %v3059_v36 = vpop.f32.mrb[4].mxu0  ;;  %v3174_v37 = vpop.f32.mrb[5].mxu1 }
 0x253   : > { %3301 = vst.msk [vmem:[#allocation2 + $0x38] sm:$0xff] %vm3296_vm9, %v3268_v31  ;;  %v10955_v38 = vadd.f32 %v3059_v36, %v273_v32  ;;  %v10972_v39 = vadd.f32 %v3174_v37, %v273_v32  ;;  %v3061_v40 = vpop.f32.mrb[5].mxu0  ;;  %v10665_v41 = vpack.c.bf16 %v3265_v30, %v3261_v16  ;;  %v14062_v42 = vpack.i.bf16 %v3265_v30, %v3261_v16 }
 0x254   : > { %v14065_v43 = vmul.f32 %v10971_v35, %v14040_v1  ;;  %v10956_v44 = vadd.f32 %v3061_v40, %v273_v32  ;;  %v14067_v45 = vpack.i.bf16 %v3266_v34, %v3262_v19  ;;  %v10663_v46 = vpack.c.bf16 %v3266_v34, %v3262_v19 }
 0x255   : > { %v14070_v47 = vmul.f32 %v10955_v38, %v14042_v4  ;;  %v3272_v48 = vmul.f32 %v10972_v39, %v14044_v5  ;;  %v3178_v50 = vpop.f32.mrb[6].mxu1  ;;  %v14073_v51 = vpack.i.bf16 %v3266_v34, %v3265_v30  ;;  %v14075_v52 = vpack.i.bf16 %v3267_v26, %v3266_v34  ;;  %v288_v30 = vpop.permute.xlu0 %287 }
 0x256   : > { %v3270_v53 = vmul.f32 %v10956_v44, %v14046_v9  ;;  %v10973_v54 = vadd.f32 %v3178_v50, %v278_v49  ;;  %v3065_v55 = vpop.f32.mrb[6].mxu0  ;;  %v3180_v56 = vpop.f32.mrb[7].mxu1  ;;  %v6563_v57 = vld [vmem:[#allocation2 + $0x18] sm:$0xff]  ;;  %10664 = vmatprep.subr.bf16.mxu0 %v10663_v46 }
 0x257   : > { %3305 = vst.msk [vmem:[#allocation2 + $0x58] sm:$0xff] %vm3296_vm9, %v3272_v48  ;;  %v10957_v58 = vadd.f32 %v3065_v55, %v278_v49  ;;  %v10974_v59 = vadd.f32 %v3180_v56, %v278_v49  ;;  %v3067_v60 = vpop.f32.mrb[7].mxu0  ;;  %v14079_v61 = vpack.i.bf16 %v6563_v57, %v3263_v14  ;;  %10666 = vmatpush1.bf16.msra.mxu0 %v10665_v41 }
 0x258   : > { %v14082_v62 = vmul.f32 %v10973_v54, %v14040_v1  ;;  %v10958_v63 = vadd.f32 %v3067_v60, %v278_v49  ;;  %v14085_v2 = vpack.i.bf16 %v3270_v53, %v14070_v47  ;;  %v14088_v3 = vpack.i.bf16 %v14065_v43, %v3270_v53  ;;  %v293_v54 = vpop.permute.xlu1 %292 }
 0x259   : > { %v3273_v6 = vmul.f32 %v10957_v58, %v14042_v4  ;;  %v3276_v7 = vmul.f32 %v10974_v59, %v14044_v5  ;;  %12037 = vrot.lane.b32.xlu1 %v14079_v61, %s13106_s14  ;;  %v3184_v10 = vpop.f32.mrb[8].mxu1 }
 0x25a   : > { %v3274_v11 = vmul.f32 %v10958_v63, %v14046_v9  ;;  %v10975_v12 = vadd.f32 %v3184_v10, %v283_v8  ;;  %v3071_v13 = vpop.f32.mrb[8].mxu0  ;;  %v3186_v14 = vpop.f32.mrb[9].mxu1  ;;  %v6566_v15 = vld [vmem:[#allocation2 + $0x38] sm:$0xff] }
 0x25b   : > { %3309 = vst.msk [vmem:[#allocation2 + $0x78] sm:$0xff] %vm3296_vm9, %v3276_v7  ;;  %v10959_v16 = vadd.f32 %v3071_v13, %v283_v8  ;;  %v10976_v17 = vadd.f32 %v3186_v14, %v283_v8  ;;  %v3073_v18 = vpop.f32.mrb[9].mxu0  ;;  %v14096_v19 = vpack.i.bf16 %v6566_v15, %v3267_v26  ;;  %v10669_v20 = vpack.c.bf16 %v3273_v6, %v14070_v47 }
 0x25c   : > { %v14100_v21 = vmul.f32 %v10975_v12, %v14040_v1  ;;  %v10960_v22 = vadd.f32 %v3073_v18, %v283_v8  ;;  %v14102_v23 = vpack.i.bf16 %v3274_v11, %v3270_v53  ;;  %v10667_v24 = vpack.c.bf16 %v3274_v11, %v3270_v53 }
 0x25d   : > { %v14105_v25 = vmul.f32 %v10959_v16, %v14042_v4  ;;  %v3280_v27 = vmul.f32 %v10976_v17, %v14044_v5  ;;  %12042 = vrot.lane.b32.xlu0 %v14096_v19, %s13106_s14  ;;  %v3190_v26 = vpop.f32.mrb[10].mxu1  ;;  %12047 = vrot.lane.b32.xlu1 %v14067_v45, %s13106_s14  ;;  %v14112_v31 = vpack.i.bf16 %v3274_v11, %v3273_v6  ;;  %v298_v16 = vpop.permute.xlu0 %297 }
 0x25e   : > { %v3278_v32 = vmul.f32 %v10960_v22, %v14046_v9  ;;  %v10977_v33 = vadd.f32 %v3190_v26, %v288_v30  ;;  %v3192_v34 = vpop.f32.mrb[11].mxu1  ;;  %v3077_v35 = vpop.f32.mrb[10].mxu0  ;;  %v6569_v36 = vld [vmem:[#allocation2 + $0x58] sm:$0xff]  ;;  %10668 = vmatprep.subr.bf16.mxu0 %v10667_v24  ;;  %v14116_v37 = vpack.i.bf16 %v14082_v62, %v3274_v11  ;;  %v14119_v38 = vpack.i.bf16 %v3273_v6, %v14070_v47 }
 0x25f   : > { %3313 = vst.msk [vmem:[#allocation2 + $0x98] sm:$0xff] %vm3296_vm9, %v3280_v27  ;;  %v10978_v39 = vadd.f32 %v3192_v34, %v288_v30  ;;  %v10961_v40 = vadd.f32 %v3077_v35, %v288_v30  ;;  %v3079_v41 = vpop.f32.mrb[11].mxu0  ;;  %v14123_v44 = vpack.i.bf16 %v6569_v36, %v14065_v43  ;;  %10670 = vmatpush1.bf16.msra.mxu0 %v10669_v20 }
 0x260   : > { %v3283_v46 = vmul.f32 %v10977_v33, %v14040_v1  ;;  %v10962_v48 = vadd.f32 %v3079_v41, %v288_v30  ;;  %v14127_v49 = vpack.i.bf16 %v3278_v32, %v14105_v25  ;;  %v14130_v50 = vpack.i.bf16 %v14100_v21, %v3278_v32 }
 0x261   : > { %v3284_v47 = vmul.f32 %v10978_v39, %v14044_v5  ;;  %v3281_v53 = vmul.f32 %v10961_v40, %v14042_v4  ;;  %12052 = vrot.lane.b32.xlu0 %v14123_v44, %s13106_s14  ;;  %v3196_v43 = vpop.f32.mrb[12].mxu1 }
 0x262   : > { %v3282_v55 = vmul.f32 %v10962_v48, %v14046_v9  ;;  %v10979_v56 = vadd.f32 %v3196_v43, %v293_v54  ;;  %v3083_v57 = vpop.f32.mrb[12].mxu0  ;;  %v3198_v58 = vpop.f32.mrb[13].mxu1  ;;  %v6572_v59 = vld [vmem:[#allocation2 + $0x78] sm:$0xff] }
 0x263   : > { %3317 = vst.msk [vmem:[#allocation2 + $0xb8] sm:$0xff] %vm3296_vm9, %v3284_v47  ;;  %v10963_v60 = vadd.f32 %v3083_v57, %v293_v54  ;;  %v10980_v63 = vadd.f32 %v3198_v58, %v293_v54  ;;  %v3085_v6 = vpop.f32.mrb[13].mxu0  ;;  %v14139_v7 = vpack.i.bf16 %v6572_v59, %v14082_v62  ;;  %v10673_v8 = vpack.c.bf16 %v3281_v53, %v14105_v25  ;;  %v14205_v59 = vld [vmem:[%s16845_s4 + $0x8] sm:$0xff] }
 0x264   : > { %v3287_v10 = vmul.f32 %v10979_v56, %v14040_v1  ;;  %v10964_v11 = vadd.f32 %v3085_v6, %v293_v54  ;;  %v14143_v12 = vpack.i.bf16 %v3282_v55, %v3278_v32  ;;  %v10671_v13 = vpack.c.bf16 %v3282_v55, %v3278_v32  ;;  %v14237_v6 = vld [vmem:[%s16845_s4 + $0x20] sm:$0xff] }
 0x265   : > { %v3285_v14 = vmul.f32 %v10963_v60, %v14042_v4  ;;  %v3288_v15 = vmul.f32 %v10980_v63, %v14044_v5  ;;  %v3202_v17 = vpop.f32.mrb[14].mxu1  ;;  %12057 = vrot.lane.b32.xlu1 %v14139_v7, %s13106_s14  ;;  %12062 = vrot.lane.b32.xlu0 %v14102_v23, %s13106_s14  ;;  %v14151_v62 = vpack.i.bf16 %v3282_v55, %v3281_v53  ;;  %v14217_v60 = vld [vmem:[%s16845_s4 + $0x10] sm:$0xff]  ;;  %v14227_v63 = vld [vmem:[%s16845_s4 + $0x18] sm:$0xff] }
 0x266   : > { %v3286_v18 = vmul.f32 %v10964_v11, %v14046_v9  ;;  %v10981_v20 = vadd.f32 %v3202_v17, %v298_v16  ;;  %v3204_v22 = vpop.f32.mrb[15].mxu1  ;;  %v3089_v24 = vpop.f32.mrb[14].mxu0  ;;  %v6575_v27 = vld [vmem:[#allocation2 + $0x98] sm:$0xff]  ;;  %10672 = vmatprep.subr.bf16.mxu0 %v10671_v13  ;;  %v14154_v30 = vpack.i.bf16 %v3283_v46, %v3282_v55  ;;  %v14157_v26 = vpack.i.bf16 %v3281_v53, %v14105_v25  ;;  %v14277_v13 = vld [vmem:[%s16845_s4 + $0x40] sm:$0xff] }
 0x267   : > { %3321 = vst.msk [vmem:[#allocation2 + $0xd8] sm:$0xff] %vm3296_vm9, %v3288_v15  ;;  %v10982_v32 = vadd.f32 %v3204_v22, %v298_v16  ;;  %v10965_v33 = vadd.f32 %v3089_v24, %v298_v16  ;;  %v3091_v34 = vpop.f32.mrb[15].mxu0  ;;  %v14161_v35 = vpack.i.bf16 %v6575_v27, %v14100_v21  ;;  %10674 = vmatpush1.bf16.msra.mxu0 %v10673_v8  ;;  %v14247_v8 = vld [vmem:[%s16845_s4 + $0x28] sm:$0xff]  ;;  %v14267_v11 = vld [vmem:[%s16845_s4 + $0x38] sm:$0xff]  ;;  %v14301_v15 = vld [vmem:[%s16845_s4 + $0x50] sm:$0xff] }
 0x268   : > { %v3291_v36 = vmul.f32 %v10981_v20, %v14040_v1  ;;  %v10966_v39 = vadd.f32 %v3091_v34, %v298_v16  ;;  %v14164_v40 = vpack.i.bf16 %v3286_v18, %v3285_v14  ;;  %v14166_v41 = vpack.i.bf16 %v3287_v10, %v3286_v18  ;;  %v14313_v16 = vld [vmem:[%s16845_s4 + $0x58] sm:$0xff]  ;;  %v14325_v17 = vld [vmem:[%s16845_s4 + $0x60] sm:$0xff] }
 0x269   : > { %v3292_v48 = vmul.f32 %v10982_v32, %v14044_v5  ;;  %v3289_v25 = vmul.f32 %v10965_v33, %v14042_v4  ;;  %12067 = vrot.lane.b32.xlu1 %v14161_v35, %s13106_s14 }
 0x26a   : > { %v3290_v47 = vmul.f32 %v10966_v39, %v14046_v9  ;;  %v6578_v53 = vld [vmem:[#allocation2 + $0xb8] sm:$0xff] }
 0x26b   : > { %3325 = vst.msk [vmem:[#allocation2 + $0xf8] sm:$0xff] %vm3296_vm9, %v3292_v48  ;;  %v14174_v21 = vpack.i.bf16 %v6578_v53, %v3283_v46  ;;  %v10677_v1 = vpack.c.bf16 %v3289_v25, %v3285_v14  ;;  %v14176_v54 = vpack.i.bf16 %v3289_v25, %v3285_v14  ;;  %v14193_v46 = vld [vmem:[%s16845_s4] sm:$0xff]  ;;  %v14289_v14 = vld [vmem:[%s16845_s4 + $0x48] sm:$0xff] }
 0x26c   : > { %v14178_v43 = vpack.i.bf16 %v3290_v47, %v3286_v18  ;;  %v10675_v55 = vpack.c.bf16 %v3290_v47, %v3286_v18  ;;  %v14180_v56 = vpack.i.bf16 %v3290_v47, %v3289_v25  ;;  %v14182_v5 = vpack.i.bf16 %v3291_v36, %v3290_v47  ;;  %v14349_v18 = vld [vmem:[%s16845_s4 + $0x70] sm:$0xff] }
 0x26d   : > { %12072 = vrot.lane.b32.xlu0 %v14174_v21, %s13106_s14  ;;  %12077 = vrot.lane.b32.xlu1 %v14143_v12, %s13106_s14 }
 0x26e   : > { %v6581_v4 = vld [vmem:[#allocation2 + $0xd8] sm:$0xff]  ;;  %10676 = vmatprep.subr.bf16.mxu0 %v10675_v55 }
 0x26f   : > { %v14188_v9 = vpack.i.bf16 %v6581_v4, %v3287_v10  ;;  %10678 = vmatpush1.bf16.msra.mxu0 %v10677_v1  ;;  %v14257_v10 = vld [vmem:[%s16845_s4 + $0x30] sm:$0xff] }
 0x271   : > { %12082 = vrot.lane.b32.xlu0 %v14188_v9, %s13106_s14 }
 0x272   : > { %v6584_v57 = vld [vmem:[#allocation2 + $0xf8] sm:$0xff]  ;;  %10012 = vmatmul.mubr.msk.f32.vlgmr.msra.gmra.mrb[16].mxu0 %vm3454_vm10, %v14193_v46 }
 0x273   : > { %v14199_v58 = vpack.i.bf16 %v6584_v57, %v3291_v36  ;;  %3573 = vmatprep.mubr.f32.mxu0 %v16859_v0 }
 0x275   : > { %12087 = vrot.lane.b32.xlu1 %v14199_v58, %s13106_s14  ;;  %12092 = vrot.lane.b32.xlu0 %v14178_v43, %s13106_s14  ;;  %s13112_s14 = smov 98  }
 0x276   : > { %10013 = vmatmul.mubr.msk.f32.gmra.mrb[18].mxu0 %vm3454_vm10, %v14205_v59 }
 0x277   : > { %3579 = vmatprep.mubr.f32.mxu0 %v16859_v0 }
 0x279   : > { %12097 = vrot.lane.b32.xlu1 %v14079_v61, %s13107_s24  ;;  %12102 = vrot.lane.b32.xlu0 %v14096_v19, %s13107_s24 }
 0x27a   : > { %10014 = vmatmul.mubr.msk.f32.gmra.mrb[20].mxu0 %vm3454_vm10, %v14217_v60 }
 0x27b   : > { %3585 = vmatprep.mubr.f32.mxu0 %v16859_v0 }
 0x27d   : > { %12107 = vrot.lane.b32.xlu1 %v14067_v45, %s13107_s24  ;;  %12112 = vrot.lane.b32.xlu0 %v14123_v44, %s13107_s24 }
 0x27e   : > { %10015 = vmatmul.mubr.msk.f32.gmra.mrb[22].mxu0 %vm3454_vm10, %v14227_v63 }
 0x27f   : > { %3591 = vmatprep.mubr.f32.mxu0 %v16859_v0 }
 0x281   : > { %12117 = vrot.lane.b32.xlu1 %v14139_v7, %s13107_s24  ;;  %12122 = vrot.lane.b32.xlu0 %v14102_v23, %s13107_s24 }
 0x282   : > { %10016 = vmatmul.mubr.msk.f32.gmra.mrb[24].mxu0 %vm3454_vm10, %v14237_v6 }
 0x283   : > { %3597 = vmatprep.mubr.f32.mxu0 %v16859_v0 }
 0x285   : > { %12127 = vrot.lane.b32.xlu1 %v14161_v35, %s13107_s24  ;;  %12132 = vrot.lane.b32.xlu0 %v14174_v21, %s13107_s24 }
 0x286   : > { %10017 = vmatmul.mubr.msk.f32.gmra.mrb[26].mxu0 %vm3454_vm10, %v14247_v8 }
 0x287   : > { %3603 = vmatprep.mubr.f32.mxu0 %v16859_v0 }
 0x289   : > { %12137 = vrot.lane.b32.xlu1 %v14143_v12, %s13107_s24  ;;  %12142 = vrot.lane.b32.xlu0 %v14188_v9, %s13107_s24 }
 0x28a   : > { %10018 = vmatmul.mubr.msk.f32.gmra.mrb[28].mxu0 %vm3454_vm10, %v14257_v10 }
 0x28b   : > { %3609 = vmatprep.mubr.f32.mxu0 %v16859_v0 }
 0x28d   : > { %12147 = vrot.lane.b32.xlu1 %v14199_v58, %s13107_s24  ;;  %12152 = vrot.lane.b32.xlu0 %v14178_v43, %s13107_s24 }
 0x28e   : > { %10019 = vmatmul.mubr.msk.f32.gmra.mrb[30].mxu0 %vm3454_vm10, %v14267_v11 }
 0x28f   : > { %3615 = vmatprep.mubr.f32.mxu0 %v16859_v0 }
 0x291   : > { %12157 = vrot.lane.b32.xlu1 %v14054_v28, %s13097_s27  ;;  %12162 = vrot.lane.b32.xlu0 %v14073_v51, %s13097_s27 }
 0x292   : > { %10020 = vmatmul.mubr.msk.f32.gmra.mrb[32].mxu0 %vm3454_vm10, %v14277_v13 }
 0x293   : > { %3621 = vmatprep.mubr.f32.mxu0 %v16859_v0 }
 0x295   : > { %12167 = vrot.lane.b32.xlu1 %v14085_v2, %s13097_s27  ;;  %12172 = vrot.lane.b32.xlu0 %v14112_v31, %s13097_s27 }
 0x296   : > { %10021 = vmatmul.mubr.msk.f32.gmra.mrb[34].mxu0 %vm3454_vm10, %v14289_v14 }
 0x297   : > { %3627 = vmatprep.mubr.f32.mxu0 %v16859_v0 }
 0x299   : > { %12177 = vrot.lane.b32.xlu1 %v14079_v61, %s13108_s9  ;;  %12182 = vrot.lane.b32.xlu0 %v14096_v19, %s13108_s9 }
 0x29a   : > { %10022 = vmatmul.mubr.msk.f32.gmra.mrb[36].mxu0 %vm3454_vm10, %v14301_v15 }
 0x29b   : > { %3633 = vmatprep.mubr.f32.mxu0 %v16859_v0 }
 0x29d   : > { %12187 = vrot.lane.b32.xlu1 %v14067_v45, %s13108_s9  ;;  %12192 = vrot.lane.b32.xlu0 %v14127_v49, %s13097_s27  ;;  %v14337_v45 = vld [vmem:[%s16845_s4 + $0x68] sm:$0xff] }
 0x29e   : > { %10023 = vmatmul.mubr.msk.f32.gmra.mrb[38].mxu0 %vm3454_vm10, %v14313_v16 }
 0x29f   : > { %3639 = vmatprep.mubr.f32.mxu0 %v16859_v0 }
 0x2a1   : > { %12197 = vrot.lane.b32.xlu1 %v14151_v62, %s13097_s27  ;;  %12202 = vrot.lane.b32.xlu0 %v14123_v44, %s13108_s9 }
 0x2a2   : > { %10024 = vmatmul.mubr.msk.f32.gmra.mrb[40].mxu0 %vm3454_vm10, %v14325_v17 }
 0x2a3   : > { %3645 = vmatprep.mubr.f32.mxu0 %v16859_v0 }
 0x2a5   : > { %12207 = vrot.lane.b32.xlu1 %v14139_v7, %s13108_s9  ;;  %12212 = vrot.lane.b32.xlu0 %v14102_v23, %s13108_s9  ;;  %v14361_v23 = vld [vmem:[%s16845_s4 + $0x78] sm:$0xff] }
 0x2a6   : > { %10025 = vmatmul.mubr.msk.f32.gmra.mrb[42].mxu0 %vm3454_vm10, %v14337_v45 }
 0x2a7   : > { %3651 = vmatprep.mubr.f32.mxu0 %v16859_v0 }
 0x2a9   : > { %12217 = vrot.lane.b32.xlu1 %v14164_v40, %s13097_s27  ;;  %12227 = vrot.lane.b32.xlu0 %v14174_v21, %s13108_s9 }
 0x2aa   : > { %10026 = vmatmul.mubr.msk.f32.gmra.mrb[44].mxu0 %vm3454_vm10, %v14349_v18 }
 0x2ab   : > { %3657 = vmatprep.mubr.f32.mxu0 %v16859_v0 }
 0x2ad   : > { %12222 = vrot.lane.b32.xlu1 %v14161_v35, %s13108_s9  ;;  %12237 = vrot.lane.b32.xlu0 %v14180_v56, %s13097_s27  ;;  %s13109_s27 = smov 120  }
 0x2ae   : > { %10027 = vmatmul.mubr.msk.f32.gmra.mrb[46].mxu0 %vm3454_vm10, %v14361_v23 }
 0x2af   : > { %3897 = vmatprep.mubr.f32.mxu0 %v16859_v0 }
 0x2b1   : > { %12232 = vrot.lane.b32.xlu1 %v14143_v12, %s13108_s9  ;;  %12242 = vrot.lane.b32.xlu0 %v14188_v9, %s13108_s9 }
 0x2b5   : > { %12247 = vrot.lane.b32.xlu1 %v14199_v58, %s13108_s9  ;;  %12252 = vrot.lane.b32.xlu0 %v14178_v43, %s13108_s9 }
 0x2b9   : > { %12257 = vrot.lane.b32.xlu1 %v14054_v28, %s13098_s8  ;;  %12262 = vrot.lane.b32.xlu0 %v14073_v51, %s13098_s8 }
 0x2bd   : > { %12267 = vrot.lane.b32.xlu1 %v14085_v2, %s13098_s8  ;;  %12272 = vrot.lane.b32.xlu0 %v14112_v31, %s13098_s8 }
 0x2c1   : > { %12277 = vrot.lane.b32.xlu1 %v14079_v61, %s13109_s27  ;;  %12282 = vrot.lane.b32.xlu0 %v14096_v19, %s13109_s27 }
 0x2c5   : > { %12287 = vrot.lane.b32.xlu1 %v14127_v49, %s13098_s8  ;;  %12292 = vrot.lane.b32.xlu0 %v14151_v62, %s13098_s8 }
 0x2c9   : > { %12297 = vrot.lane.b32.xlu1 %v14123_v44, %s13109_s27  ;;  %12302 = vrot.lane.b32.xlu0 %v14139_v7, %s13109_s27 }
 0x2cb   : > { %v12038_v28 = vpop.permute.xlu1 %12037 }
 0x2cc   : > { %v12040_v51 = vunpack.i.h.bf16 %v12038_v28  ;;  %v12039_v2 = vunpack.i.l.bf16 %v12038_v28 }
 0x2cd   : > { %12307 = vrot.lane.b32.xlu1 %v14164_v40, %s13098_s8  ;;  %12317 = vrot.lane.b32.xlu0 %v14180_v56, %s13098_s8  ;;  %s13110_s8 = smov 119  }
 0x2ce   : > { %v6675_v32 = vsel %vm6673_vm11, %v12039_v2, %v12040_v51 }
 0x2cf   : > { %v12043_v31 = vpop.permute.xlu0 %12042  ;;  %v12048_v49 = vpop.permute.xlu1 %12047 }
 0x2d0   : > { %v12045_v12 = vunpack.i.h.bf16 %v12043_v31  ;;  %v12044_v62 = vunpack.i.l.bf16 %v12043_v31  ;;  %v12050_v20 = vunpack.i.h.bf16 %v12048_v49  ;;  %v12049_v22 = vunpack.i.l.bf16 %v12048_v49 }
 0x2d1   : > { %12312 = vrot.lane.b32.xlu1 %v14161_v35, %s13109_s27  ;;  %12322 = vrot.lane.b32.xlu0 %v14174_v21, %s13109_s27 }
 0x2d2   : > { %v6676_v24 = vsel %vm6673_vm11, %v12050_v20, %v12044_v62  ;;  %v6674_v27 = vsel %vm6673_vm11, %v12049_v22, %v12039_v2  ;;  %v6677_v33 = vsel %vm6673_vm11, %v12044_v62, %v12045_v12 }
 0x2d3   : > { %v12053_v34 = vpop.permute.xlu0 %12052  ;;  %v10807_v36 = vpack.c.bf16 %v6677_v33, %v6675_v32  ;;  %v10809_v39 = vpack.c.bf16 %v6676_v24, %v6674_v27 }
 0x2d4   : > { %v12055_v40 = vunpack.i.h.bf16 %v12053_v34  ;;  %v12054_v48 = vunpack.i.l.bf16 %v12053_v34 }
 0x2d5   : > { %10808 = vmatprep.subr.bf16.mxu1 %v10807_v36  ;;  %12327 = vrot.lane.b32.xlu1 %v14188_v9, %s13109_s27 }
 0x2d6   : > { %10810 = vmatpush1.bf16.msra.mxu1 %v10809_v39  ;;  %12332 = vrot.lane.b32.xlu0 %v14199_v58, %s13109_s27  ;;  %v6679_v57 = vsel %vm6673_vm11, %v12054_v48, %v12055_v40 }
 0x2d7   : > { %v12058_v25 = vpop.permute.xlu1 %12057  ;;  %v12063_v47 = vpop.permute.xlu0 %12062 }
 0x2d8   : > { %v12060_v53 = vunpack.i.h.bf16 %v12058_v25  ;;  %v12059_v1 = vunpack.i.l.bf16 %v12058_v25  ;;  %v12065_v43 = vunpack.i.h.bf16 %v12063_v47  ;;  %v12064_v55 = vunpack.i.l.bf16 %v12063_v47 }
 0x2d9   : > { %12337 = vrot.lane.b32.xlu1 %v14056_v29, %s13099_s13 }
 0x2da   : > { %v6680_v56 = vsel %vm6673_vm11, %v12065_v43, %v12059_v1  ;;  %v6678_v4 = vsel %vm6673_vm11, %v12064_v55, %v12054_v48  ;;  %12342 = vrot.lane.b32.xlu0 %v14075_v52, %s13099_s13  ;;  %v6681_v28 = vsel %vm6673_vm11, %v12059_v1, %v12060_v53 }
 0x2db   : > { %v12068_v51 = vpop.permute.xlu1 %12067  ;;  %v10811_v2 = vpack.c.bf16 %v6681_v28, %v6679_v57  ;;  %v10813_v31 = vpack.c.bf16 %v6680_v56, %v6678_v4 }
 0x2dc   : > { %v12070_v49 = vunpack.i.h.bf16 %v12068_v51  ;;  %v12069_v12 = vunpack.i.l.bf16 %v12068_v51 }
 0x2dd   : > { %10812 = vmatprep.subr.bf16.mxu1 %v10811_v2  ;;  %12347 = vrot.lane.b32.xlu1 %v14062_v42, %s13099_s13 }
 0x2de   : > { %10814 = vmatpush1.bf16.msra.mxu1 %v10813_v31  ;;  %12352 = vrot.lane.b32.xlu0 %v14088_v3, %s13099_s13  ;;  %v6683_v36 = vsel %vm6673_vm11, %v12069_v12, %v12070_v49 }
 0x2df   : > { %v12073_v62 = vpop.permute.xlu0 %12072  ;;  %v12078_v20 = vpop.permute.xlu1 %12077 }
 0x2e0   : > { %v12075_v22 = vunpack.i.h.bf16 %v12073_v62  ;;  %v12074_v24 = vunpack.i.l.bf16 %v12073_v62  ;;  %v12080_v27 = vunpack.i.h.bf16 %v12078_v20  ;;  %v12079_v32 = vunpack.i.l.bf16 %v12078_v20 }
 0x2e1   : > { %12357 = vrot.lane.b32.xlu1 %v14116_v37, %s13099_s13 }
 0x2e2   : > { %v6684_v33 = vsel %vm6673_vm11, %v12080_v27, %v12074_v24  ;;  %v6682_v34 = vsel %vm6673_vm11, %v12079_v32, %v12069_v12  ;;  %12362 = vrot.lane.b32.xlu0 %v14119_v38, %s13099_s13  ;;  %v6685_v39 = vsel %vm6673_vm11, %v12074_v24, %v12075_v22 }
 0x2e3   : > { %v12083_v40 = vpop.permute.xlu0 %12082  ;;  %v10815_v48 = vpack.c.bf16 %v6685_v39, %v6683_v36  ;;  %v10817_v25 = vpack.c.bf16 %v6684_v33, %v6682_v34 }
 0x2e4   : > { %v12085_v47 = vunpack.i.h.bf16 %v12083_v40  ;;  %v12084_v53 = vunpack.i.l.bf16 %v12083_v40 }
 0x2e5   : > { %10816 = vmatprep.subr.bf16.mxu1 %v10815_v48  ;;  %12367 = vrot.lane.b32.xlu1 %v14079_v61, %s13110_s8 }
 0x2e6   : > { %10818 = vmatpush1.bf16.msra.mxu1 %v10817_v25  ;;  %12372 = vrot.lane.b32.xlu0 %v14096_v19, %s13110_s8  ;;  %v6687_v2 = vsel %vm6673_vm11, %v12084_v53, %v12085_v47 }
 0x2e7   : > { %v12088_v1 = vpop.permute.xlu1 %12087  ;;  %v12093_v43 = vpop.permute.xlu0 %12092 }
 0x2e8   : > { %v12090_v55 = vunpack.i.h.bf16 %v12088_v1  ;;  %v12089_v56 = vunpack.i.l.bf16 %v12088_v1  ;;  %v12095_v4 = vunpack.i.h.bf16 %v12093_v43  ;;  %v12094_v57 = vunpack.i.l.bf16 %v12093_v43 }
 0x2e9   : > { %12377 = vrot.lane.b32.xlu1 %v14130_v50, %s13099_s13 }
 0x2ea   : > { %v6688_v28 = vsel %vm6673_vm11, %v12095_v4, %v12089_v56  ;;  %v6686_v51 = vsel %vm6673_vm11, %v12094_v57, %v12084_v53  ;;  %12382 = vrot.lane.b32.xlu0 %v14154_v30, %s13099_s13  ;;  %v6689_v31 = vsel %vm6673_vm11, %v12089_v56, %v12090_v55 }
 0x2eb   : > { %v12098_v49 = vpop.permute.xlu1 %12097  ;;  %v12103_v12 = vpop.permute.xlu0 %12102  ;;  %v10819_v62 = vpack.c.bf16 %v6689_v31, %v6687_v2  ;;  %v10821_v20 = vpack.c.bf16 %v6688_v28, %v6686_v51 }
 0x2ec   : > { %v12100_v22 = vunpack.i.h.bf16 %v12098_v49  ;;  %v12099_v24 = vunpack.i.l.bf16 %v12098_v49  ;;  %v12105_v27 = vunpack.i.h.bf16 %v12103_v12  ;;  %v12104_v32 = vunpack.i.l.bf16 %v12103_v12 }
 0x2ed   : > { %10820 = vmatprep.subr.bf16.mxu1 %v10819_v62  ;;  %12387 = vrot.lane.b32.xlu1 %v14157_v26, %s13099_s13 }
 0x2ee   : > { %10822 = vmatpush1.bf16.msra.mxu1 %v10821_v20  ;;  %12392 = vrot.lane.b32.xlu0 %v14123_v44, %s13110_s8  ;;  %v7013_v33 = vsel %vm7011_vm12, %v12099_v24, %v12100_v22  ;;  %v7015_v34 = vsel %vm7011_vm12, %v12104_v32, %v12105_v27 }
 0x2ef   : > { %v12108_v36 = vpop.permute.xlu1 %12107  ;;  %v12113_v39 = vpop.permute.xlu0 %12112  ;;  %v10823_v40 = vpack.c.bf16 %v7015_v34, %v7013_v33 }
 0x2f0   : > { %v12110_v48 = vunpack.i.h.bf16 %v12108_v36  ;;  %v12109_v25 = vunpack.i.l.bf16 %v12108_v36  ;;  %v12115_v47 = vunpack.i.h.bf16 %v12113_v39  ;;  %v12114_v53 = vunpack.i.l.bf16 %v12113_v39 }
 0x2f1   : > { %12397 = vrot.lane.b32.xlu1 %v14139_v7, %s13110_s8  ;;  %10300 = vmatmul.mubr.msk.f32.vlgmr.msra.gmra.mrb[16].mxu1 %vm3454_vm10, %v14193_v46 }
 0x2f2   : > { %v7012_v1 = vsel %vm7011_vm12, %v12109_v25, %v12099_v24  ;;  %v7014_v43 = vsel %vm7011_vm12, %v12110_v48, %v12104_v32  ;;  %10824 = vmatprep.subr.bf16.mxu1 %v10823_v40  ;;  %12402 = vrot.lane.b32.xlu0 %v14166_v41, %s13099_s13  ;;  %v7017_v46 = vsel %vm7011_vm12, %v12114_v53, %v12115_v47 }
 0x2f3   : > { %v12118_v55 = vpop.permute.xlu1 %12117  ;;  %v12123_v56 = vpop.permute.xlu0 %12122  ;;  %6824 = vmatprep.mubr.f32.mxu1 %v16859_v0  ;;  %v10825_v4 = vpack.c.bf16 %v7014_v43, %v7012_v1 }
 0x2f4   : > { %v12120_v57 = vunpack.i.h.bf16 %v12118_v55  ;;  %v12119_v28 = vunpack.i.l.bf16 %v12118_v55  ;;  %v12125_v51 = vunpack.i.h.bf16 %v12123_v56  ;;  %v12124_v2 = vunpack.i.l.bf16 %v12123_v56 }
 0x2f5   : > { %10301 = vmatmul.mubr.msk.f32.gmra.mrb[18].mxu1 %vm3454_vm10, %v14205_v59  ;;  %12412 = vrot.lane.b32.xlu1 %v14182_v5, %s13099_s13 }
 0x2f6   : > { %v7018_v31 = vsel %vm7011_vm12, %v12125_v51, %v12119_v28  ;;  %v7016_v49 = vsel %vm7011_vm12, %v12124_v2, %v12114_v53  ;;  %10826 = vmatpush1.bf16.msra.mxu1 %v10825_v4  ;;  %12407 = vrot.lane.b32.xlu0 %v14176_v54, %s13099_s13  ;;  %v7019_v12 = vsel %vm7011_vm12, %v12119_v28, %v12120_v57  ;;  %s13111_s13 = smov 118  }
 0x2f7   : > { %v12128_v62 = vpop.permute.xlu1 %12127  ;;  %v12133_v20 = vpop.permute.xlu0 %12132  ;;  %6830 = vmatprep.mubr.f32.mxu1 %v16859_v0  ;;  %v10827_v59 = vpack.c.bf16 %v7019_v12, %v7017_v46  ;;  %v10829_v22 = vpack.c.bf16 %v7018_v31, %v7016_v49 }
 0x2f8   : > { %v12130_v24 = vunpack.i.h.bf16 %v12128_v62  ;;  %v12129_v27 = vunpack.i.l.bf16 %v12128_v62  ;;  %v12135_v32 = vunpack.i.h.bf16 %v12133_v20  ;;  %v12134_v33 = vunpack.i.l.bf16 %v12133_v20 }
 0x2f9   : > { %10302 = vmatmul.mubr.msk.f32.gmra.mrb[20].mxu1 %vm3454_vm10, %v14217_v60  ;;  %10828 = vmatprep.subr.bf16.mxu1 %v10827_v59 }
 0x2fa   : > { %12417 = vrot.lane.b32.xlu1 %v14161_v35, %s13110_s8  ;;  %10830 = vmatpush1.bf16.msra.mxu1 %v10829_v22  ;;  %v7021_v34 = vsel %vm7011_vm12, %v12129_v27, %v12130_v24  ;;  %v7023_v36 = vsel %vm7011_vm12, %v12134_v33, %v12135_v32 }
 0x2fb   : > { %12422 = vrot.lane.b32.xlu0 %v14174_v21, %s13110_s8  ;;  %v12138_v39 = vpop.permute.xlu1 %12137  ;;  %v12143_v40 = vpop.permute.xlu0 %12142  ;;  %6836 = vmatprep.mubr.f32.mxu1 %v16859_v0  ;;  %v10831_v48 = vpack.c.bf16 %v7023_v36, %v7021_v34 }
 0x2fc   : > { %v12140_v25 = vunpack.i.h.bf16 %v12138_v39  ;;  %v12139_v47 = vunpack.i.l.bf16 %v12138_v39  ;;  %v12145_v60 = vunpack.i.h.bf16 %v12143_v40  ;;  %v12144_v53 = vunpack.i.l.bf16 %v12143_v40 }
 0x2fd   : > { %10303 = vmatmul.mubr.msk.f32.gmra.mrb[22].mxu1 %vm3454_vm10, %v14227_v63  ;;  %10832 = vmatprep.subr.bf16.mxu1 %v10831_v48 }
 0x2fe   : > { %v7020_v1 = vsel %vm7011_vm12, %v12139_v47, %v12129_v27  ;;  %v7022_v43 = vsel %vm7011_vm12, %v12140_v25, %v12134_v33  ;;  %12427 = vrot.lane.b32.xlu1 %v14188_v9, %s13110_s8  ;;  %6842 = vmatprep.mubr.f32.mxu1 %v16859_v0  ;;  %v7025_v2 = vsel %vm7011_vm12, %v12144_v53, %v12145_v60 }
 0x2ff   : > { %12432 = vrot.lane.b32.xlu0 %v14199_v58, %s13110_s8  ;;  %v12148_v55 = vpop.permute.xlu1 %12147  ;;  %v12153_v56 = vpop.permute.xlu0 %12152  ;;  %v10833_v4 = vpack.c.bf16 %v7022_v43, %v7020_v1 }
 0x300   : > { %v12150_v57 = vunpack.i.h.bf16 %v12148_v55  ;;  %v12149_v28 = vunpack.i.l.bf16 %v12148_v55  ;;  %v12155_v51 = vunpack.i.h.bf16 %v12153_v56  ;;  %v12154_v63 = vunpack.i.l.bf16 %v12153_v56 }
 0x301   : > { %10304 = vmatmul.mubr.msk.f32.gmra.mrb[24].mxu1 %vm3454_vm10, %v14237_v6 }
 0x302   : > { %v7026_v46 = vsel %vm7011_vm12, %v12155_v51, %v12149_v28  ;;  %v7024_v31 = vsel %vm7011_vm12, %v12154_v63, %v12144_v53  ;;  %10834 = vmatpush1.bf16.msra.mxu1 %v10833_v4  ;;  %12437 = vrot.lane.b32.xlu1 %v14056_v29, %s13100_s18  ;;  %v7027_v49 = vsel %vm7011_vm12, %v12149_v28, %v12150_v57 }
 0x303   : > { %12442 = vrot.lane.b32.xlu0 %v14075_v52, %s13100_s18  ;;  %v12158_v12 = vpop.permute.xlu1 %12157  ;;  %v12163_v62 = vpop.permute.xlu0 %12162  ;;  %6848 = vmatprep.mubr.f32.mxu1 %v16859_v0  ;;  %v10835_v6 = vpack.c.bf16 %v7027_v49, %v7025_v2  ;;  %v10837_v20 = vpack.c.bf16 %v7026_v46, %v7024_v31 }
 0x304   : > { %v12160_v59 = vunpack.i.h.bf16 %v12158_v12  ;;  %v12159_v22 = vunpack.i.l.bf16 %v12158_v12  ;;  %v12165_v24 = vunpack.i.h.bf16 %v12163_v62  ;;  %v12164_v27 = vunpack.i.l.bf16 %v12163_v62 }
 0x305   : > { %10305 = vmatmul.mubr.msk.f32.gmra.mrb[26].mxu1 %vm3454_vm10, %v14247_v8  ;;  %10836 = vmatprep.subr.bf16.mxu1 %v10835_v6 }
 0x306   : > { %v3761_v32 = vsel %vm632_vm1, %v12159_v22, %v12160_v59  ;;  %v3762_v33 = vsel %vm632_vm1, %v12164_v27, %v12165_v24  ;;  %12447 = vrot.lane.b32.xlu1 %v14062_v42, %s13100_s18  ;;  %10838 = vmatpush1.bf16.msra.mxu1 %v10837_v20  ;;  %v10679_v34 = vpack.c.bf16 %v12165_v24, %v12160_v59 }
 0x307   : > { %12452 = vrot.lane.b32.xlu0 %v14088_v3, %s13100_s18  ;;  %v12168_v36 = vpop.permute.xlu1 %12167  ;;  %v12173_v39 = vpop.permute.xlu0 %12172  ;;  %6854 = vmatprep.mubr.f32.mxu1 %v16859_v0  ;;  %v10681_v40 = vpack.c.bf16 %v3762_v33, %v3761_v32 }
 0x308   : > { %v12170_v48 = vunpack.i.h.bf16 %v12168_v36  ;;  %v12169_v8 = vunpack.i.l.bf16 %v12168_v36  ;;  %v12175_v25 = vunpack.i.h.bf16 %v12173_v39  ;;  %v12174_v47 = vunpack.i.l.bf16 %v12173_v39  ;;  %10680 = vmatprep.subr.bf16.mxu0 %v10679_v34 }
 0x309   : > { %10306 = vmatmul.mubr.msk.f32.gmra.mrb[28].mxu1 %vm3454_vm10, %v14257_v10  ;;  %10682 = vmatpush1.bf16.msra.mxu0 %v10681_v40 }
 0x30a   : > { %v3763_v60 = vsel %vm632_vm1, %v12169_v8, %v12170_v48  ;;  %v3764_v53 = vsel %vm632_vm1, %v12174_v47, %v12175_v25  ;;  %12457 = vrot.lane.b32.xlu1 %v14116_v37, %s13100_s18  ;;  %6860 = vmatprep.mubr.f32.mxu1 %v16859_v0  ;;  %v10683_v1 = vpack.c.bf16 %v12175_v25, %v12170_v48 }
 0x30b   : > { %12462 = vrot.lane.b32.xlu0 %v14119_v38, %s13100_s18  ;;  %v14519_v43 = vpop.permute.xlu1 %12177  ;;  %v14521_v55 = vpop.permute.xlu0 %12182  ;;  %v10685_v56 = vpack.c.bf16 %v3764_v53, %v3763_v60 }
 0x30c   : > { %v12180_v10 = vunpack.i.h.bf16 %v14519_v43  ;;  %v12179_v4 = vunpack.i.l.bf16 %v14519_v43  ;;  %v12185_v57 = vunpack.i.h.bf16 %v14521_v55  ;;  %v12184_v28 = vunpack.i.l.bf16 %v14521_v55  ;;  %10684 = vmatprep.subr.bf16.mxu0 %v10683_v1  ;;  %v14628_v43 = vld [vmem:[%s16845_s4 + $0x88] sm:$0xff] }
 0x30d   : > { %10307 = vmatmul.mubr.msk.f32.gmra.mrb[30].mxu1 %vm3454_vm10, %v14267_v11  ;;  %10686 = vmatpush1.bf16.msra.mxu0 %v10685_v56  ;;  %v10028_v56 = vld [vmem:[%s16845_s4 + $0x80] sm:$0xff] }
 0x30e   : > { %12467 = vrot.lane.b32.xlu1 %v14079_v61, %s13111_s13  ;;  %6866 = vmatprep.mubr.f32.mxu1 %v16859_v0  ;;  %v7351_v51 = vsel %vm7349_vm13, %v12179_v4, %v12180_v10  ;;  %v7353_v63 = vsel %vm7349_vm13, %v12184_v28, %v12185_v57 }
 0x30f   : > { %12472 = vrot.lane.b32.xlu0 %v14096_v19, %s13111_s13  ;;  %v14540_v2 = vpop.permute.xlu1 %12187  ;;  %v12193_v11 = vpop.permute.xlu0 %12192  ;;  %v10839_v46 = vpack.c.bf16 %v7353_v63, %v7351_v51 }
 0x310   : > { %v12195_v31 = vunpack.i.h.bf16 %v12193_v11  ;;  %v12194_v49 = vunpack.i.l.bf16 %v12193_v11  ;;  %v12189_v1 = vunpack.i.l.bf16 %v14540_v2 }
 0x311   : > { %10308 = vmatmul.mubr.msk.f32.gmra.mrb[32].mxu1 %vm3454_vm10, %v14277_v13  ;;  %10840 = vmatprep.subr.bf16.mxu1 %v10839_v46 }
 0x312   : > { %12477 = vrot.lane.b32.xlu1 %v14130_v50, %s13100_s18  ;;  %6872 = vmatprep.mubr.f32.mxu1 %v16859_v0  ;;  %v3765_v13 = vsel %vm632_vm1, %v12194_v49, %v12195_v31  ;;  %v7350_v63 = vsel %vm7349_vm13, %v12189_v1, %v12179_v4 }
 0x313   : > { %12482 = vrot.lane.b32.xlu0 %v14154_v30, %s13100_s18  ;;  %v12198_v12 = vpop.permute.xlu1 %12197  ;;  %v14549_v62 = vpop.permute.xlu0 %12202 }
 0x314   : > { %v12200_v6 = vunpack.i.h.bf16 %v12198_v12  ;;  %v12199_v20 = vunpack.i.l.bf16 %v12198_v12  ;;  %v12205_v10 = vunpack.i.h.bf16 %v14549_v62  ;;  %v12204_v57 = vunpack.i.l.bf16 %v14549_v62 }
 0x315   : > { %10309 = vmatmul.mubr.msk.f32.gmra.mrb[34].mxu1 %vm3454_vm10, %v14289_v14 }
 0x316   : > { %v3766_v59 = vsel %vm632_vm1, %v12199_v20, %v12200_v6  ;;  %12487 = vrot.lane.b32.xlu1 %v14157_v26, %s13100_s18  ;;  %v10687_v22 = vpack.c.bf16 %v12200_v6, %v12195_v31  ;;  %6878 = vmatprep.mubr.f32.mxu1 %v16859_v0  ;;  %v7355_v31 = vsel %vm7349_vm13, %v12204_v57, %v12205_v10 }
 0x317   : > { %12492 = vrot.lane.b32.xlu0 %v14123_v44, %s13111_s13  ;;  %v14560_v24 = vpop.permute.xlu1 %12207  ;;  %v14562_v27 = vpop.permute.xlu0 %12212  ;;  %v10689_v32 = vpack.c.bf16 %v3766_v59, %v3765_v13 }
 0x318   : > { %10688 = vmatprep.subr.bf16.mxu0 %v10687_v22  ;;  %v12210_v11 = vunpack.i.h.bf16 %v14560_v24  ;;  %v12209_v46 = vunpack.i.l.bf16 %v14560_v24  ;;  %v12215_v55 = vunpack.i.h.bf16 %v14562_v27  ;;  %v12214_v20 = vunpack.i.l.bf16 %v14562_v27  ;;  %v14648_v22 = vld [vmem:[%s16845_s4 + $0x90] sm:$0xff] }
 0x319   : > { %10310 = vmatmul.mubr.msk.f32.gmra.mrb[36].mxu1 %vm3454_vm10, %v14301_v15  ;;  %10690 = vmatpush1.bf16.msra.mxu0 %v10689_v32 }
 0x31a   : > { %12497 = vrot.lane.b32.xlu1 %v14139_v7, %s13111_s13  ;;  %6884 = vmatprep.mubr.f32.mxu1 %v16859_v0  ;;  %v7357_v24 = vsel %vm7349_vm13, %v12209_v46, %v12210_v11 }
 0x31b   : > { %12502 = vrot.lane.b32.xlu0 %v14166_v41, %s13100_s18  ;;  %v12218_v14 = vpop.permute.xlu1 %12217  ;;  %v14571_v33 = vpop.permute.xlu0 %12227 }
 0x31c   : > { %v12220_v34 = vunpack.i.h.bf16 %v12218_v14  ;;  %v12219_v36 = vunpack.i.l.bf16 %v12218_v14 }
 0x31d   : > { %10311 = vmatmul.mubr.msk.f32.gmra.mrb[38].mxu1 %vm3454_vm10, %v14313_v16 }
 0x31e   : > { %12512 = vrot.lane.b32.xlu1 %v14182_v5, %s13100_s18  ;;  %6890 = vmatprep.mubr.f32.mxu1 %v16859_v0  ;;  %v3767_v16 = vsel %vm632_vm1, %v12219_v36, %v12220_v34  ;;  %v12229_v36 = vunpack.i.l.bf16 %v14571_v33 }
 0x31f   : > { %12507 = vrot.lane.b32.xlu0 %v14176_v54, %s13100_s18  ;;  %v14580_v15 = vpop.permute.xlu1 %12222  ;;  %v12238_v39 = vpop.permute.xlu0 %12237 }
 0x320   : > { %v12240_v40 = vunpack.i.h.bf16 %v12238_v39  ;;  %v12239_v48 = vunpack.i.l.bf16 %v12238_v39  ;;  %v12225_v13 = vunpack.i.h.bf16 %v14580_v15  ;;  %v12224_v59 = vunpack.i.l.bf16 %v14580_v15 }
 0x321   : > { %10312 = vmatmul.mubr.msk.f32.gmra.mrb[40].mxu1 %vm3454_vm10, %v14325_v17  ;;  %v12190_v17 = vunpack.i.h.bf16 %v14540_v2 }
 0x322   : > { %v3768_v8 = vsel %vm632_vm1, %v12239_v48, %v12240_v40  ;;  %12517 = vrot.lane.b32.xlu1 %v14161_v35, %s13111_s13  ;;  %6896 = vmatprep.mubr.f32.mxu1 %v16859_v0  ;;  %v10691_v25 = vpack.c.bf16 %v12240_v40, %v12220_v34  ;;  %v12230_v34 = vunpack.i.h.bf16 %v14571_v33  ;;  %v7359_v33 = vsel %vm7349_vm13, %v12224_v59, %v12225_v13 }
 0x323   : > { %12522 = vrot.lane.b32.xlu0 %v14174_v21, %s13111_s13  ;;  %v14591_v47 = vpop.permute.xlu1 %12232  ;;  %v14593_v60 = vpop.permute.xlu0 %12242  ;;  %v10693_v53 = vpack.c.bf16 %v3768_v8, %v3767_v16  ;;  %v7352_v2 = vsel %vm7349_vm13, %v12190_v17, %v12184_v28  ;;  %v10843_v17 = vpack.c.bf16 %v7357_v24, %v7355_v31  ;;  %vm8927_vm1 = vcmask 793600  }
 0x324   : > { %10692 = vmatprep.subr.bf16.mxu0 %v10691_v25  ;;  %v12235_v1 = vunpack.i.h.bf16 %v14591_v47  ;;  %v12234_v10 = vunpack.i.l.bf16 %v14591_v47  ;;  %v12245_v31 = vunpack.i.h.bf16 %v14593_v60 }
 0x325   : > { %10313 = vmatmul.mubr.msk.f32.gmra.mrb[42].mxu1 %vm3454_vm10, %v14337_v45  ;;  %10694 = vmatpush1.bf16.msra.mxu0 %v10693_v53  ;;  %v7354_v53 = vsel %vm7349_vm13, %v12214_v20, %v12204_v57 }
 0x326   : > { %12527 = vrot.lane.b32.xlu1 %v14188_v9, %s13111_s13  ;;  %6902 = vmatprep.mubr.f32.mxu1 %v16859_v0 }
 0x327   : > { %12532 = vrot.lane.b32.xlu0 %v14199_v58, %s13111_s13  ;;  %v14609_v51 = vpop.permute.xlu1 %12247  ;;  %v14611_v45 = vpop.permute.xlu0 %12252 }
 0x328   : > { %10044 = vmatmul.mubr.msk.f32.vlgmr.msra.gmra.mrb[16].mxu0 %vm3454_vm10, %v10028_v56  ;;  %v12250_v57 = vunpack.i.h.bf16 %v14609_v51  ;;  %v12249_v11 = vunpack.i.l.bf16 %v14609_v51  ;;  %v12244_v51 = vunpack.i.l.bf16 %v14593_v60  ;;  %v12254_v20 = vunpack.i.l.bf16 %v14611_v45 }
 0x329   : > { %10314 = vmatmul.mubr.msk.f32.gmra.mrb[44].mxu1 %vm3454_vm10, %v14349_v18  ;;  %3903 = vmatprep.mubr.f32.mxu0 %v16859_v0  ;;  %v10841_v18 = vpack.c.bf16 %v7352_v2, %v7350_v63 }
 0x32a   : > { %12537 = vrot.lane.b32.xlu1 %v14056_v29, %s13101_s25  ;;  %6908 = vmatprep.mubr.f32.mxu1 %v16859_v0 }
 0x32b   : > { %12542 = vrot.lane.b32.xlu0 %v14075_v52, %s13101_s25  ;;  %v12258_v4 = vpop.permute.xlu1 %12257  ;;  %v12263_v28 = vpop.permute.xlu0 %12262 }
 0x32c   : > { %v12260_v49 = vunpack.i.h.bf16 %v12258_v4  ;;  %v12259_v12 = vunpack.i.l.bf16 %v12258_v4  ;;  %v12265_v62 = vunpack.i.h.bf16 %v12263_v28  ;;  %v12264_v6 = vunpack.i.l.bf16 %v12263_v28  ;;  %10045 = vmatmul.mubr.msk.f32.gmra.mrb[18].mxu0 %vm3454_vm10, %v14628_v43 }
 0x32d   : > { %10315 = vmatmul.mubr.msk.f32.gmra.mrb[46].mxu1 %vm3454_vm10, %v14361_v23  ;;  %3909 = vmatprep.mubr.f32.mxu0 %v16859_v0  ;;  %v7356_v23 = vsel %vm7349_vm13, %v12215_v55, %v12209_v46  ;;  %v7361_v28 = vsel %vm7349_vm13, %v12229_v36, %v12230_v34  ;;  %v7363_v34 = vsel %vm7349_vm13, %v12244_v51, %v12245_v31 }
 0x32e   : > { %v4075_v32 = vsel %vm954_vm2, %v12259_v12, %v12260_v49  ;;  %v4076_v27 = vsel %vm954_vm2, %v12264_v6, %v12265_v62  ;;  %12547 = vrot.lane.b32.xlu1 %v14062_v42, %s13101_s25  ;;  %7156 = vmatprep.mubr.f32.mxu1 %v16859_v0  ;;  %v10695_v14 = vpack.c.bf16 %v12265_v62, %v12260_v49  ;;  %v12255_v49 = vunpack.i.h.bf16 %v14611_v45 }
 0x32f   : > { %12552 = vrot.lane.b32.xlu0 %v14088_v3, %s13101_s25  ;;  %v12268_v15 = vpop.permute.xlu1 %12267  ;;  %v12273_v39 = vpop.permute.xlu0 %12272  ;;  %v10697_v40 = vpack.c.bf16 %v4076_v27, %v4075_v32  ;;  %v10845_v4 = vpack.c.bf16 %v7356_v23, %v7354_v53  ;;  %v10847_v12 = vpack.c.bf16 %v7361_v28, %v7359_v33  ;;  %v7358_v62 = vsel %vm7349_vm13, %v12234_v10, %v12224_v59 }
 0x330   : > { %v12270_v48 = vunpack.i.h.bf16 %v12268_v15  ;;  %v12269_v16 = vunpack.i.l.bf16 %v12268_v15  ;;  %v12275_v8 = vunpack.i.h.bf16 %v12273_v39  ;;  %v12274_v25 = vunpack.i.l.bf16 %v12273_v39  ;;  %10046 = vmatmul.mubr.msk.f32.gmra.mrb[20].mxu0 %vm3454_vm10, %v14648_v22  ;;  %10696 = vmatprep.subr.bf16.mxu0 %v10695_v14  ;;  %v10032_v14 = vld [vmem:[%s16845_s4 + $0xa0] sm:$0xff] }
 0x331   : > { %10332 = vmatmul.mubr.msk.f32.vlgmr.msra.gmra.mrb[16].mxu1 %vm3454_vm10, %v10028_v56  ;;  %10698 = vmatpush1.bf16.msra.mxu0 %v10697_v40  ;;  %v10031_v56 = vld [vmem:[%s16845_s4 + $0x98] sm:$0xff]  ;;  %v7360_v6 = vsel %vm7349_vm13, %v12235_v1, %v12229_v36  ;;  %v7364_v45 = vsel %vm7349_vm13, %v12255_v49, %v12249_v11  ;;  %v7362_v40 = vsel %vm7349_vm13, %v12254_v20, %v12244_v51  ;;  %v10036_v20 = vld [vmem:[%s16845_s4 + $0xc0] sm:$0xff] }
 0x332   : > { %v4077_v63 = vsel %vm954_vm2, %v12269_v16, %v12270_v48  ;;  %v4078_v2 = vsel %vm954_vm2, %v12274_v25, %v12275_v8  ;;  %10842 = vmatpush1.bf16.msra.mxu1 %v10841_v18  ;;  %12557 = vrot.lane.b32.xlu1 %v14116_v37, %s13101_s25  ;;  %v10699_v55 = vpack.c.bf16 %v12275_v8, %v12270_v48  ;;  %v10035_v49 = vld [vmem:[%s16845_s4 + $0xb8] sm:$0xff] }
 0x333   : > { %10844 = vmatprep.subr.bf16.mxu1 %v10843_v17  ;;  %12562 = vrot.lane.b32.xlu0 %v14119_v38, %s13101_s25  ;;  %v14679_v47 = vpop.permute.xlu1 %12277  ;;  %v14681_v46 = vpop.permute.xlu0 %12282  ;;  %v10701_v18 = vpack.c.bf16 %v4078_v2, %v4077_v63  ;;  %v10849_v23 = vpack.c.bf16 %v7360_v6, %v7358_v62  ;;  %v10853_v33 = vpack.c.bf16 %v7364_v45, %v7362_v40 }
 0x334   : > { %7162 = vmatprep.mubr.f32.mxu1 %v16859_v0  ;;  %3915 = vmatprep.mubr.f32.mxu0 %v16859_v0  ;;  %v12280_v48 = vunpack.i.h.bf16 %v14679_v47  ;;  %v12285_v16 = vunpack.i.h.bf16 %v14681_v46 }
 0x335   : > { %10333 = vmatmul.mubr.msk.f32.gmra.mrb[18].mxu1 %vm3454_vm10, %v14628_v43  ;;  %10047 = vmatmul.mubr.msk.f32.gmra.mrb[22].mxu0 %vm3454_vm10, %v10031_v56  ;;  %v7365_v43 = vsel %vm7349_vm13, %v12249_v11, %v12250_v57 }
 0x336   : > { %10846 = vmatpush1.bf16.msra.mxu1 %v10845_v4  ;;  %12567 = vrot.lane.b32.xlu1 %v14079_v61, %s13112_s14  ;;  %v10851_v39 = vpack.c.bf16 %v7365_v43, %v7363_v34  ;;  %v10855_v1 = vpack.c.bf16 %v12285_v16, %v12280_v48 }
 0x337   : > { %10700 = vmatprep.subr.bf16.mxu0 %v10699_v55  ;;  %10848 = vmatprep.subr.bf16.mxu1 %v10847_v12  ;;  %v12288_v60 = vpop.permute.xlu1 %12287  ;;  %v12293_v13 = vpop.permute.xlu0 %12292  ;;  %v10034_v55 = vld [vmem:[%s16845_s4 + $0xb0] sm:$0xff] }
 0x338   : > { %12572 = vrot.lane.b32.xlu0 %v14096_v19, %s13112_s14  ;;  %10702 = vmatpush1.bf16.msra.mxu0 %v10701_v18  ;;  %v12290_v59 = vunpack.i.h.bf16 %v12288_v60  ;;  %v12289_v24 = vunpack.i.l.bf16 %v12288_v60  ;;  %v12295_v32 = vunpack.i.h.bf16 %v12293_v13  ;;  %v12294_v27 = vunpack.i.l.bf16 %v12293_v13 }
 0x339   : > { %7168 = vmatprep.mubr.f32.mxu1 %v16859_v0  ;;  %3921 = vmatprep.mubr.f32.mxu0 %v16859_v0 }
 0x33a   : > { %v4079_v36 = vsel %vm954_vm2, %v12289_v24, %v12290_v59  ;;  %v4080_v15 = vsel %vm954_vm2, %v12294_v27, %v12295_v32  ;;  %10334 = vmatmul.mubr.msk.f32.gmra.mrb[20].mxu1 %vm3454_vm10, %v14648_v22  ;;  %12577 = vrot.lane.b32.xlu1 %v14130_v50, %s13101_s25  ;;  %v10703_v53 = vpack.c.bf16 %v12295_v32, %v12290_v59  ;;  %v10033_v22 = vld [vmem:[%s16845_s4 + $0xa8] sm:$0xff] }
 0x33b   : > { %10850 = vmatpush1.bf16.msra.mxu1 %v10849_v23  ;;  %10048 = vmatmul.mubr.msk.f32.gmra.mrb[24].mxu0 %vm3454_vm10, %v10032_v14  ;;  %v14717_v8 = vpop.permute.xlu1 %12297  ;;  %v14719_v25 = vpop.permute.xlu0 %12302  ;;  %v10705_v17 = vpack.c.bf16 %v4080_v15, %v4079_v36  ;;  %v10037_v27 = vld [vmem:[%s16845_s4 + $0xc8] sm:$0xff]  ;;  %v10038_v15 = vld [vmem:[%s16845_s4 + $0xd0] sm:$0xff] }
 0x33c   : > { %12582 = vrot.lane.b32.xlu0 %v14154_v30, %s13101_s25  ;;  %10852 = vmatprep.subr.bf16.mxu1 %v10851_v39 }
 0x33d   : > { %7174 = vmatprep.mubr.f32.mxu1 %v16859_v0  ;;  %3927 = vmatprep.mubr.f32.mxu0 %v16859_v0 }
 0x33e   : > { %10335 = vmatmul.mubr.msk.f32.gmra.mrb[22].mxu1 %vm3454_vm10, %v10031_v56  ;;  %12587 = vrot.lane.b32.xlu1 %v14157_v26, %s13101_s25 }
 0x33f   : > { %10049 = vmatmul.mubr.msk.f32.gmra.mrb[26].mxu0 %vm3454_vm10, %v10033_v22  ;;  %10704 = vmatprep.subr.bf16.mxu0 %v10703_v53  ;;  %v12308_v10 = vpop.permute.xlu1 %12307  ;;  %v12318_v63 = vpop.permute.xlu0 %12317  ;;  %v10039_v53 = vld [vmem:[%s16845_s4 + $0xd8] sm:$0xff] }
 0x340   : > { %10854 = vmatpush1.bf16.msra.mxu1 %v10853_v33  ;;  %12592 = vrot.lane.b32.xlu0 %v14123_v44, %s13112_s14  ;;  %v12310_v2 = vunpack.i.h.bf16 %v12308_v10  ;;  %v12309_v56 = vunpack.i.l.bf16 %v12308_v10  ;;  %v12320_v57 = vunpack.i.h.bf16 %v12318_v63  ;;  %v12319_v11 = vunpack.i.l.bf16 %v12318_v63  ;;  %v10040_v33 = vld [vmem:[%s16845_s4 + $0xe0] sm:$0xff]  ;;  %v10041_v63 = vld [vmem:[%s16845_s4 + $0xe8] sm:$0xff] }
 0x341   : > { %10706 = vmatpush1.bf16.msra.mxu0 %v10705_v17  ;;  %10856 = vmatprep.subr.bf16.mxu1 %v10855_v1 }
 0x342   : > { %v4081_v4 = vsel %vm954_vm2, %v12309_v56, %v12310_v2  ;;  %7180 = vmatprep.mubr.f32.mxu1 %v16859_v0  ;;  %v4082_v28 = vsel %vm954_vm2, %v12319_v11, %v12320_v57  ;;  %3933 = vmatprep.mubr.f32.mxu0 %v16859_v0  ;;  %v10707_v18 = vpack.c.bf16 %v12320_v57, %v12310_v2  ;;  %v10042_v57 = vld [vmem:[%s16845_s4 + $0xf0] sm:$0xff]  ;;  %vm8299_vm2 = vcmask 965632  }
 0x343   : > { %10336 = vmatmul.mubr.msk.f32.gmra.mrb[24].mxu1 %vm3454_vm10, %v10032_v14  ;;  %12597 = vrot.lane.b32.xlu1 %v14139_v7, %s13112_s14  ;;  %v14748_v31 = vpop.permute.xlu1 %12312  ;;  %v14750_v51 = vpop.permute.xlu0 %12322  ;;  %v10709_v12 = vpack.c.bf16 %v4082_v28, %v4081_v4 }
 0x344   : > { %10050 = vmatmul.mubr.msk.f32.gmra.mrb[28].mxu0 %vm3454_vm10, %v10034_v55  ;;  %12602 = vrot.lane.b32.xlu0 %v14166_v41, %s13101_s25 }
 0x345   : > { %7186 = vmatprep.mubr.f32.mxu1 %v16859_v0  ;;  %3939 = vmatprep.mubr.f32.mxu0 %v16859_v0 }
 0x346   : > { %10708 = vmatprep.subr.bf16.mxu0 %v10707_v18 }
 0x347   : > { %10337 = vmatmul.mubr.msk.f32.gmra.mrb[26].mxu1 %vm3454_vm10, %v10033_v22  ;;  %12612 = vrot.lane.b32.xlu1 %v14182_v5, %s13101_s25  ;;  %v14763_v62 = vpop.permute.xlu1 %12327 }
 0x348   : > { %10051 = vmatmul.mubr.msk.f32.gmra.mrb[30].mxu0 %vm3454_vm10, %v10035_v49  ;;  %12607 = vrot.lane.b32.xlu0 %v14176_v54, %s13101_s25  ;;  %v14768_v6 = vpop.permute.xlu0 %12332 }
 0x349   : > { %10710 = vmatpush1.bf16.msra.mxu0 %v10709_v12  ;;  %7192 = vmatprep.mubr.f32.mxu1 %v16859_v0  ;;  %v10043_v12 = vld [vmem:[%s16845_s4 + $0xf8] sm:$0xff] }
 0x34a   : > { %3945 = vmatprep.mubr.f32.mxu0 %v16859_v0 }
 0x34b   : > { %10338 = vmatmul.mubr.msk.f32.gmra.mrb[28].mxu1 %vm3454_vm10, %v10034_v55  ;;  %12617 = vrot.lane.b32.xlu1 %v14161_v35, %s13112_s14  ;;  %v14778_v60 = vpop.permute.xlu1 %12337 }
 0x34c   : > { %10052 = vmatmul.mubr.msk.f32.gmra.mrb[32].mxu0 %vm3454_vm10, %v10036_v20  ;;  %12622 = vrot.lane.b32.xlu0 %v14174_v21, %s13112_s14  ;;  %v12340_v13 = vunpack.i.h.bf16 %v14778_v60  ;;  %v12339_v43 = vunpack.i.l.bf16 %v14778_v60  ;;  %v14785_v59 = vpop.permute.xlu0 %12342 }
 0x34d   : > { %7198 = vmatprep.mubr.f32.mxu1 %v16859_v0  ;;  %v12345_v24 = vunpack.i.h.bf16 %v14785_v59  ;;  %v12344_v32 = vunpack.i.l.bf16 %v14785_v59  ;;  %3951 = vmatprep.mubr.f32.mxu0 %v16859_v0 }
 0x34e   : > { %v4454_v14 = vsel %vm1300_vm3, %v12339_v43, %v12340_v13 }
 0x34f   : > { %10339 = vmatmul.mubr.msk.f32.gmra.mrb[30].mxu1 %vm3454_vm10, %v10035_v49  ;;  %12627 = vrot.lane.b32.xlu1 %v14188_v9, %s13112_s14  ;;  %v14800_v45 = vpop.permute.xlu1 %12347  ;;  %v4456_v23 = vsel %vm1300_vm3, %v12344_v32, %v12345_v24 }
 0x350   : > { %10053 = vmatmul.mubr.msk.f32.gmra.mrb[34].mxu0 %vm3454_vm10, %v10037_v27  ;;  %12632 = vrot.lane.b32.xlu0 %v14199_v58, %s13112_s14  ;;  %v14808_v34 = vpop.permute.xlu0 %12352  ;;  %v10711_v36 = vpack.c.bf16 %v4456_v23, %v4454_v14  ;;  %v12349_v11 = vunpack.i.l.bf16 %v14800_v45  ;;  %v12350_v55 = vunpack.i.h.bf16 %v14800_v45 }
 0x351   : > { %7204 = vmatprep.mubr.f32.mxu1 %v16859_v0  ;;  %3957 = vmatprep.mubr.f32.mxu0 %v16859_v0  ;;  %v12355_v13 = vunpack.i.h.bf16 %v14808_v34  ;;  %v12354_v24 = vunpack.i.l.bf16 %v14808_v34 }
 0x352   : > { %10712 = vmatprep.subr.bf16.mxu0 %v10711_v36 }
 0x353   : > { %10340 = vmatmul.mubr.msk.f32.gmra.mrb[32].mxu1 %vm3454_vm10, %v10036_v20  ;;  %12637 = vrot.lane.b32.xlu1 %v14056_v29, %s13102_s26  ;;  %v14818_v39 = vpop.permute.xlu1 %12357  ;;  %v4453_v20 = vsel %vm1300_vm3, %v12349_v11, %v12339_v43 }
 0x354   : > { %10054 = vmatmul.mubr.msk.f32.gmra.mrb[36].mxu0 %vm3454_vm10, %v10038_v15  ;;  %12642 = vrot.lane.b32.xlu0 %v14075_v52, %s13102_s26  ;;  %v14823_v40 = vpop.permute.xlu0 %12362  ;;  %v12360_v4 = vunpack.i.h.bf16 %v14818_v39  ;;  %v12359_v28 = vunpack.i.l.bf16 %v14818_v39  ;;  %v12284_v39 = vunpack.i.l.bf16 %v14681_v46  ;;  %v12299_v46 = vunpack.i.l.bf16 %v14717_v8 }
 0x355   : > { %7210 = vmatprep.mubr.f32.mxu1 %v16859_v0  ;;  %3963 = vmatprep.mubr.f32.mxu0 %v16859_v0  ;;  %v12365_v14 = vunpack.i.h.bf16 %v14823_v40  ;;  %v12364_v45 = vunpack.i.l.bf16 %v14823_v40  ;;  %v10060_v40 = vld [vmem:[%s16845_s4 + $0x100] sm:$0xff] }
 0x356   : > { %v4460_v43 = vsel %vm1300_vm3, %v12359_v28, %v12360_v4 }
 0x357   : > { %10341 = vmatmul.mubr.msk.f32.gmra.mrb[34].mxu1 %vm3454_vm10, %v10037_v27  ;;  %12647 = vrot.lane.b32.xlu1 %v14062_v42, %s13102_s26  ;;  %v14833_v22 = vpop.permute.xlu1 %12367  ;;  %v4455_v27 = vsel %vm1300_vm3, %v12350_v55, %v12344_v32 }
 0x358   : > { %10055 = vmatmul.mubr.msk.f32.gmra.mrb[38].mxu0 %vm3454_vm10, %v10039_v53  ;;  %12652 = vrot.lane.b32.xlu0 %v14088_v3, %s13102_s26  ;;  %v14838_v17 = vpop.permute.xlu0 %12372 }
 0x359   : > { %7216 = vmatprep.mubr.f32.mxu1 %v16859_v0  ;;  %3969 = vmatprep.mubr.f32.mxu0 %v16859_v0 }
 0x35b   : > { %10342 = vmatmul.mubr.msk.f32.gmra.mrb[36].mxu1 %vm3454_vm10, %v10038_v15  ;;  %12657 = vrot.lane.b32.xlu1 %v14116_v37, %s13102_s26  ;;  %v14848_v1 = vpop.permute.xlu1 %12377  ;;  %v12279_v15 = vunpack.i.l.bf16 %v14679_v47  ;;  %v12300_v47 = vunpack.i.h.bf16 %v14717_v8 }
 0x35c   : > { %10056 = vmatmul.mubr.msk.f32.gmra.mrb[40].mxu0 %vm3454_vm10, %v10040_v33  ;;  %12662 = vrot.lane.b32.xlu0 %v14119_v38, %s13102_s26  ;;  %v14853_v10 = vpop.permute.xlu0 %12382  ;;  %v12380_v23 = vunpack.i.h.bf16 %v14848_v1  ;;  %v12379_v34 = vunpack.i.l.bf16 %v14848_v1  ;;  %v4459_v1 = vsel %vm1300_vm3, %v12365_v14, %v12359_v28  ;;  %v14955_v14 = vld [vmem:[%s16845_s4 + $0x108] sm:$0xff] }
 0x35d   : > { %7222 = vmatprep.mubr.f32.mxu1 %v16859_v0  ;;  %3975 = vmatprep.mubr.f32.mxu0 %v16859_v0  ;;  %v12385_v59 = vunpack.i.h.bf16 %v14853_v10  ;;  %v12384_v32 = vunpack.i.l.bf16 %v14853_v10  ;;  %v4457_v10 = vsel %vm1300_vm3, %v12364_v45, %v12354_v24 }
 0x35e   : > { %v4462_v28 = vsel %vm1300_vm3, %v12379_v34, %v12380_v23 }
 0x35f   : > { %10343 = vmatmul.mubr.msk.f32.gmra.mrb[38].mxu1 %vm3454_vm10, %v10039_v53  ;;  %12667 = vrot.lane.b32.xlu1 %v14079_v61, %s13113_s16  ;;  %v14863_v2 = vpop.permute.xlu1 %12387  ;;  %v10713_v53 = vpack.c.bf16 %v4455_v27, %v4453_v20  ;;  %v4464_v20 = vsel %vm1300_vm3, %v12384_v32, %v12385_v59 }
 0x360   : > { %10057 = vmatmul.mubr.msk.f32.gmra.mrb[42].mxu0 %vm3454_vm10, %v10041_v63  ;;  %12672 = vrot.lane.b32.xlu0 %v14096_v19, %s13113_s16  ;;  %v14868_v56 = vpop.permute.xlu0 %12392  ;;  %v12390_v11 = vunpack.i.h.bf16 %v14863_v2  ;;  %v12389_v55 = vunpack.i.l.bf16 %v14863_v2  ;;  %v10719_v23 = vpack.c.bf16 %v4464_v20, %v4462_v28 }
 0x361   : > { %7228 = vmatprep.mubr.f32.mxu1 %v16859_v0  ;;  %3981 = vmatprep.mubr.f32.mxu0 %v16859_v0 }
 0x362   : > { %v4461_v8 = vsel %vm1300_vm3, %v12389_v55, %v12379_v34  ;;  %v4463_v59 = vsel %vm1300_vm3, %v12390_v11, %v12384_v32  ;;  %v10062_v34 = vld [vmem:[%s16845_s4 + $0x110] sm:$0xff]  ;;  %v12314_v11 = vunpack.i.l.bf16 %v14748_v31 }
 0x363   : > { %10344 = vmatmul.mubr.msk.f32.gmra.mrb[40].mxu1 %vm3454_vm10, %v10040_v33  ;;  %12677 = vrot.lane.b32.xlu1 %v14130_v50, %s13102_s26  ;;  %v14882_v18 = vpop.permute.xlu1 %12397  ;;  %v4458_v33 = vsel %vm1300_vm3, %v12354_v24, %v12355_v13  ;;  %v7673_v13 = vsel %vm7671_vm14, %v12284_v39, %v12285_v16  ;;  %v12304_v16 = vunpack.i.l.bf16 %v14719_v25 }
 0x364   : > { %10058 = vmatmul.mubr.msk.f32.gmra.mrb[44].mxu0 %vm3454_vm10, %v10042_v57  ;;  %12682 = vrot.lane.b32.xlu0 %v14154_v30, %s13102_s26  ;;  %v14887_v49 = vpop.permute.xlu0 %12402 }
 0x365   : > { %7234 = vmatprep.mubr.f32.mxu1 %v16859_v0  ;;  %3987 = vmatprep.mubr.f32.mxu0 %v16859_v0  ;;  %v12405_v45 = vunpack.i.h.bf16 %v14887_v49 }
 0x367   : > { %10345 = vmatmul.mubr.msk.f32.gmra.mrb[42].mxu1 %vm3454_vm10, %v10041_v63  ;;  %12687 = vrot.lane.b32.xlu1 %v14157_v26, %s13102_s26  ;;  %v14907_v60 = vpop.permute.xlu1 %12412  ;;  %v10715_v63 = vpack.c.bf16 %v4460_v43, %v4458_v33  ;;  %v10717_v43 = vpack.c.bf16 %v4459_v1, %v4457_v10  ;;  %v12315_v33 = vunpack.i.h.bf16 %v14748_v31  ;;  %v10721_v1 = vpack.c.bf16 %v4463_v59, %v4461_v8 }
 0x368   : > { %10059 = vmatmul.mubr.msk.f32.gmra.mrb[46].mxu0 %vm3454_vm10, %v10043_v12  ;;  %12692 = vrot.lane.b32.xlu0 %v14123_v44, %s13113_s16  ;;  %v14917_v36 = vpop.permute.xlu0 %12407  ;;  %v12415_v2 = vunpack.i.h.bf16 %v14907_v60  ;;  %v12414_v24 = vunpack.i.l.bf16 %v14907_v60  ;;  %v12404_v60 = vunpack.i.l.bf16 %v14887_v49  ;;  %v12330_v59 = vunpack.i.h.bf16 %v14763_v62 }
 0x369   : > { %7240 = vmatprep.mubr.f32.mxu1 %v16859_v0  ;;  %4211 = vmatprep.mubr.f32.mxu0 %v16859_v0 }
 0x36a   : > { %v4468_v32 = vsel %vm1300_vm3, %v12414_v24, %v12415_v2  ;;  %v4466_v10 = vsel %vm1300_vm3, %v12404_v60, %v12405_v45  ;;  %v12324_v2 = vunpack.i.l.bf16 %v14750_v51  ;;  %v7676_v45 = vsel %vm7671_vm14, %v12314_v11, %v12315_v33 }
 0x36b   : > { %10346 = vmatmul.mubr.msk.f32.gmra.mrb[44].mxu1 %vm3454_vm10, %v10042_v57  ;;  %12697 = vrot.lane.b32.xlu1 %v14139_v7, %s13113_s16  ;;  %v7672_v57 = vsel %vm7671_vm14, %v12279_v15, %v12280_v48  ;;  %v12305_v48 = vunpack.i.h.bf16 %v14719_v25  ;;  %v12410_v25 = vunpack.i.h.bf16 %v14917_v36  ;;  %v12409_v15 = vunpack.i.l.bf16 %v14917_v36 }
 0x36c   : > { %10076 = vmatmul.mubr.msk.f32.vlgmr.msra.gmra.mrb[16].mxu0 %vm3454_vm10, %v10060_v40  ;;  %12702 = vrot.lane.b32.xlu0 %v14166_v41, %s13102_s26  ;;  %v14937_v4 = vpop.permute.xlu1 %12417  ;;  %v7674_v36 = vsel %vm7671_vm14, %v12299_v46, %v12300_v47  ;;  %v10723_v20 = vpack.c.bf16 %v4468_v32, %v4466_v10  ;;  %v12370_v11 = vunpack.i.h.bf16 %v14833_v22 }
 0x36d   : > { %10714 = vmatpush1.bf16.msra.mxu0 %v10713_v53  ;;  %7246 = vmatprep.mubr.f32.mxu1 %v16859_v0  ;;  %v14950_v27 = vpop.permute.xlu0 %12422  ;;  %v7675_v39 = vsel %vm7671_vm14, %v12304_v16, %v12305_v48  ;;  %v10857_v53 = vpack.c.bf16 %v7673_v13, %v7672_v57  ;;  %v4467_v55 = vsel %vm1300_vm3, %v12410_v25, %v12414_v24  ;;  %v12325_v13 = vunpack.i.h.bf16 %v14750_v51 }
 0x36e   : > { %10716 = vmatprep.subr.bf16.mxu0 %v10715_v63  ;;  %4217 = vmatprep.mubr.f32.mxu0 %v16859_v0  ;;  %v10859_v63 = vpack.c.bf16 %v12305_v48, %v12300_v47  ;;  %v4465_v28 = vsel %vm1300_vm3, %v12409_v15, %v12404_v60  ;;  %v10063_v47 = vld [vmem:[%s16845_s4 + $0x118] sm:$0xff]  ;;  %v10861_v16 = vpack.c.bf16 %v7675_v39, %v7674_v36  ;;  %v12335_v25 = vunpack.i.h.bf16 %v14768_v6 }
 0x36f   : > { %10347 = vmatmul.mubr.msk.f32.gmra.mrb[46].mxu1 %vm3454_vm10, %v10043_v12  ;;  %12712 = vrot.lane.b32.xlu1 %v14182_v5, %s13102_s26  ;;  %v10725_v48 = vpack.c.bf16 %v4467_v55, %v4465_v28  ;;  %v7677_v8 = vsel %vm7671_vm14, %v12324_v2, %v12325_v13  ;;  %v10863_v15 = vpack.c.bf16 %v12325_v13, %v12315_v33  ;;  %v12329_v36 = vunpack.i.l.bf16 %v14763_v62  ;;  %v10065_v28 = vld [vmem:[%s16845_s4 + $0x128] sm:$0xff] }
 0x370   : > { %10077 = vmatmul.mubr.msk.f32.gmra.mrb[18].mxu0 %vm3454_vm10, %v14955_v14  ;;  %12707 = vrot.lane.b32.xlu0 %v14176_v54, %s13102_s26  ;;  %v14975_v49 = vpop.permute.xlu1 %12427  ;;  %v12334_v39 = vunpack.i.l.bf16 %v14768_v6  ;;  %v10865_v62 = vpack.c.bf16 %v7677_v8, %v7676_v45  ;;  %v10867_v6 = vpack.c.bf16 %v12335_v25, %v12330_v59  ;;  %v12375_v55 = vunpack.i.h.bf16 %v14838_v17 }
 0x371   : > { %10718 = vmatpush1.bf16.msra.mxu0 %v10717_v43  ;;  %7494 = vmatprep.mubr.f32.mxu1 %v16859_v0  ;;  %v14978_v12 = vpop.permute.xlu0 %12432  ;;  %v7678_v10 = vsel %vm7671_vm14, %v12329_v36, %v12330_v59  ;;  %vm9241_vm3 = vcmask 785408  }
 0x372   : > { %10720 = vmatprep.subr.bf16.mxu0 %v10719_v23  ;;  %4223 = vmatprep.mubr.f32.mxu0 %v16859_v0  ;;  %v10871_v2 = vpack.c.bf16 %v12375_v55, %v12370_v11 }
 0x373   : > { %12717 = vrot.lane.b32.xlu1 %v14161_v35, %s13113_s16  ;;  %10364 = vmatmul.mubr.msk.f32.vlgmr.msra.gmra.mrb[16].mxu1 %vm3454_vm10, %v10060_v40 }
 0x374   : > { %10078 = vmatmul.mubr.msk.f32.gmra.mrb[20].mxu0 %vm3454_vm10, %v10062_v34  ;;  %10858 = vmatpush1.bf16.msra.mxu1 %v10857_v53  ;;  %v14996_v57 = vpop.permute.xlu1 %12437  ;;  %v10064_v53 = vld [vmem:[%s16845_s4 + $0x120] sm:$0xff] }
 0x375   : > { %10722 = vmatpush1.bf16.msra.mxu0 %v10721_v1  ;;  %12722 = vrot.lane.b32.xlu0 %v14174_v21, %s13113_s16  ;;  %v12440_v31 = vunpack.i.h.bf16 %v14996_v57  ;;  %v12439_v40 = vunpack.i.l.bf16 %v14996_v57  ;;  %v15004_v24 = vpop.permute.xlu0 %12442 }
 0x376   : > { %10724 = vmatprep.subr.bf16.mxu0 %v10723_v20  ;;  %10860 = vmatprep.subr.bf16.mxu1 %v10859_v63  ;;  %v12445_v46 = vunpack.i.h.bf16 %v15004_v24  ;;  %v12444_v51 = vunpack.i.l.bf16 %v15004_v24  ;;  %v7679_v63 = vsel %vm7671_vm14, %v12334_v39, %v12335_v25  ;;  %v10070_v25 = vld [vmem:[%s16845_s4 + $0x150] sm:$0xff] }
 0x377   : > { %4229 = vmatprep.mubr.f32.mxu0 %v16859_v0  ;;  %7500 = vmatprep.mubr.f32.mxu1 %v16859_v0  ;;  %v4792_v43 = vsel %vm1628_vm4, %v12439_v40, %v12440_v31  ;;  %v10869_v20 = vpack.c.bf16 %v7679_v63, %v7678_v10  ;;  %v10066_v31 = vld [vmem:[%s16845_s4 + $0x130] sm:$0xff]  ;;  %v12369_v63 = vunpack.i.l.bf16 %v14833_v22 }
 0x378   : > { %12727 = vrot.lane.b32.xlu1 %v14188_v9, %s13113_s16  ;;  %10079 = vmatmul.mubr.msk.f32.gmra.mrb[22].mxu0 %vm3454_vm10, %v10063_v47  ;;  %v15017_v60 = vpop.permute.xlu1 %12447  ;;  %v4794_v23 = vsel %vm1628_vm4, %v12444_v51, %v12445_v46 }
 0x379   : > { %10726 = vmatpush1.bf16.msra.mxu0 %v10725_v48  ;;  %10365 = vmatmul.mubr.msk.f32.gmra.mrb[18].mxu1 %vm3454_vm10, %v14955_v14  ;;  %v15030_v32 = vpop.permute.xlu0 %12452  ;;  %v10727_v1 = vpack.c.bf16 %v4794_v23, %v4792_v43  ;;  %v10067_v48 = vld [vmem:[%s16845_s4 + $0x138] sm:$0xff]  ;;  %v10068_v43 = vld [vmem:[%s16845_s4 + $0x140] sm:$0xff] }
 0x37a   : > { %10862 = vmatpush1.bf16.msra.mxu1 %v10861_v16  ;;  %12732 = vrot.lane.b32.xlu0 %v14199_v58, %s13113_s16 }
 0x37b   : > { %10864 = vmatprep.subr.bf16.mxu1 %v10863_v15  ;;  %4235 = vmatprep.mubr.f32.mxu0 %v16859_v0 }
 0x37c   : > { %7506 = vmatprep.mubr.f32.mxu1 %v16859_v0  ;;  %12737 = vrot.lane.b32.xlu1 %v14056_v29, %s13103_s28  ;;  %v15043_v14 = vpop.permute.xlu1 %12457 }
 0x37d   : > { %10080 = vmatmul.mubr.msk.f32.gmra.mrb[24].mxu0 %vm3454_vm10, %v10064_v53  ;;  %10366 = vmatmul.mubr.msk.f32.gmra.mrb[20].mxu1 %vm3454_vm10, %v10062_v34  ;;  %v15047_v33 = vpop.permute.xlu0 %12462 }
 0x37e   : > { %10866 = vmatpush1.bf16.msra.mxu1 %v10865_v62  ;;  %12742 = vrot.lane.b32.xlu0 %v14075_v52, %s13103_s28 }
 0x37f   : > { %10728 = vmatprep.subr.bf16.mxu0 %v10727_v1  ;;  %10868 = vmatprep.subr.bf16.mxu1 %v10867_v6  ;;  %v10073_v6 = vld [vmem:[%s16845_s4 + $0x168] sm:$0xff] }
 0x380   : > { %4241 = vmatprep.mubr.f32.mxu0 %v16859_v0  ;;  %7512 = vmatprep.mubr.f32.mxu1 %v16859_v0  ;;  %v15060_v34 = vpop.permute.xlu1 %12467 }
 0x381   : > { %12747 = vrot.lane.b32.xlu1 %v14062_v42, %s13103_s28  ;;  %10081 = vmatmul.mubr.msk.f32.gmra.mrb[26].mxu0 %vm3454_vm10, %v10065_v28  ;;  %v15065_v13 = vpop.permute.xlu0 %12472 }
 0x382   : > { %10367 = vmatmul.mubr.msk.f32.gmra.mrb[22].mxu1 %vm3454_vm10, %v10063_v47  ;;  %12752 = vrot.lane.b32.xlu0 %v14088_v3, %s13103_s28 }
 0x383   : > { %10870 = vmatpush1.bf16.msra.mxu1 %v10869_v20  ;;  %4247 = vmatprep.mubr.f32.mxu0 %v16859_v0  ;;  %v12460_v20 = vunpack.i.h.bf16 %v15043_v14 }
 0x384   : > { %10872 = vmatprep.subr.bf16.mxu1 %v10871_v2  ;;  %7518 = vmatprep.mubr.f32.mxu1 %v16859_v0  ;;  %v15079_v46 = vpop.permute.xlu1 %12477  ;;  %v12459_v2 = vunpack.i.l.bf16 %v15043_v14 }
 0x385   : > { %12757 = vrot.lane.b32.xlu1 %v14116_v37, %s13103_s28  ;;  %10082 = vmatmul.mubr.msk.f32.gmra.mrb[28].mxu0 %vm3454_vm10, %v10066_v31  ;;  %v15084_v47 = vpop.permute.xlu0 %12482  ;;  %v12479_v57 = vunpack.i.l.bf16 %v15079_v46 }
 0x386   : > { %10368 = vmatmul.mubr.msk.f32.gmra.mrb[24].mxu1 %vm3454_vm10, %v10064_v53  ;;  %12762 = vrot.lane.b32.xlu0 %v14119_v38, %s13103_s28  ;;  %v10072_v53 = vld [vmem:[%s16845_s4 + $0x160] sm:$0xff]  ;;  %v12485_v24 = vunpack.i.h.bf16 %v15084_v47 }
 0x387   : > { %4253 = vmatprep.mubr.f32.mxu0 %v16859_v0  ;;  %7524 = vmatprep.mubr.f32.mxu1 %v16859_v0 }
 0x388   : > { %v15094_v16 = vpop.permute.xlu1 %12487 }
 0x389   : > { %12767 = vrot.lane.b32.xlu1 %v14079_v61, %s13114_s17  ;;  %10083 = vmatmul.mubr.msk.f32.gmra.mrb[30].mxu0 %vm3454_vm10, %v10067_v48  ;;  %v15099_v45 = vpop.permute.xlu0 %12492 }
 0x38a   : > { %10369 = vmatmul.mubr.msk.f32.gmra.mrb[26].mxu1 %vm3454_vm10, %v10065_v28  ;;  %12772 = vrot.lane.b32.xlu0 %v14096_v19, %s13114_s17  ;;  %v10069_v19 = vld [vmem:[%s16845_s4 + $0x148] sm:$0xff]  ;;  %v12450_v28 = vunpack.i.h.bf16 %v15017_v60 }
 0x38b   : > { %4259 = vmatprep.mubr.f32.mxu0 %v16859_v0  ;;  %7530 = vmatprep.mubr.f32.mxu1 %v16859_v0 }
 0x38c   : > { %v15109_v23 = vpop.permute.xlu1 %12497  ;;  %v4793_v14 = vsel %vm1628_vm4, %v12450_v28, %v12444_v51  ;;  %v12484_v51 = vunpack.i.l.bf16 %v15084_v47  ;;  %v15268_v47 = vld [vmem:[%s16845_s4 + $0x180] sm:$0xff] }
 0x38d   : > { %12777 = vrot.lane.b32.xlu1 %v14130_v50, %s13103_s28  ;;  %10084 = vmatmul.mubr.msk.f32.gmra.mrb[32].mxu0 %vm3454_vm10, %v10068_v43  ;;  %v15114_v61 = vpop.permute.xlu0 %12502 }
 0x38e   : > { %10370 = vmatmul.mubr.msk.f32.gmra.mrb[28].mxu1 %vm3454_vm10, %v10066_v31  ;;  %12782 = vrot.lane.b32.xlu0 %v14154_v30, %s13103_s28 }
 0x38f   : > { %4265 = vmatprep.mubr.f32.mxu0 %v16859_v0  ;;  %7536 = vmatprep.mubr.f32.mxu1 %v16859_v0 }
 0x390   : > { %v15124_v8 = vpop.permute.xlu1 %12512 }
 0x391   : > { %12787 = vrot.lane.b32.xlu1 %v14157_v26, %s13103_s28  ;;  %10085 = vmatmul.mubr.msk.f32.gmra.mrb[34].mxu0 %vm3454_vm10, %v10069_v19  ;;  %v15129_v59 = vpop.permute.xlu0 %12507 }
 0x392   : > { %10371 = vmatmul.mubr.msk.f32.gmra.mrb[30].mxu1 %vm3454_vm10, %v10067_v48  ;;  %12792 = vrot.lane.b32.xlu0 %v14123_v44, %s13114_s17  ;;  %v10071_v44 = vld [vmem:[%s16845_s4 + $0x158] sm:$0xff]  ;;  %v12374_v48 = vunpack.i.l.bf16 %v14838_v17 }
 0x393   : > { %4271 = vmatprep.mubr.f32.mxu0 %v16859_v0  ;;  %7542 = vmatprep.mubr.f32.mxu1 %v16859_v0 }
 0x394   : > { %v15139_v15 = vpop.permute.xlu1 %12517 }
 0x395   : > { %12797 = vrot.lane.b32.xlu1 %v14139_v7, %s13114_s17  ;;  %10086 = vmatmul.mubr.msk.f32.gmra.mrb[36].mxu0 %vm3454_vm10, %v10070_v25  ;;  %v15144_v36 = vpop.permute.xlu0 %12522 }
 0x396   : > { %10372 = vmatmul.mubr.msk.f32.gmra.mrb[32].mxu1 %vm3454_vm10, %v10068_v43  ;;  %12802 = vrot.lane.b32.xlu0 %v14166_v41, %s13103_s28  ;;  %v12455_v43 = vunpack.i.h.bf16 %v15030_v32 }
 0x397   : > { %4277 = vmatprep.mubr.f32.mxu0 %v16859_v0  ;;  %7548 = vmatprep.mubr.f32.mxu1 %v16859_v0 }
 0x398   : > { %v15154_v39 = vpop.permute.xlu1 %12527 }
 0x399   : > { %12812 = vrot.lane.b32.xlu1 %v14182_v5, %s13103_s28  ;;  %10087 = vmatmul.mubr.msk.f32.gmra.mrb[38].mxu0 %vm3454_vm10, %v10071_v44  ;;  %v15159_v7 = vpop.permute.xlu0 %12532 }
 0x39a   : > { %10373 = vmatmul.mubr.msk.f32.gmra.mrb[34].mxu1 %vm3454_vm10, %v10069_v19  ;;  %12807 = vrot.lane.b32.xlu0 %v14176_v54, %s13103_s28  ;;  %v12465_v19 = vunpack.i.h.bf16 %v15047_v33 }
 0x39b   : > { %4283 = vmatprep.mubr.f32.mxu0 %v16859_v0  ;;  %7554 = vmatprep.mubr.f32.mxu1 %v16859_v0 }
 0x39c   : > { %v15169_v1 = vpop.permute.xlu1 %12537  ;;  %v4797_v28 = vsel %vm1628_vm4, %v12465_v19, %v12459_v2  ;;  %v12514_v19 = vunpack.i.l.bf16 %v15124_v8 }
 0x39d   : > { %12817 = vrot.lane.b32.xlu1 %v14161_v35, %s13114_s17  ;;  %10088 = vmatmul.mubr.msk.f32.gmra.mrb[40].mxu0 %vm3454_vm10, %v10072_v53  ;;  %v15174_v62 = vpop.permute.xlu0 %12542 }
 0x39e   : > { %10374 = vmatmul.mubr.msk.f32.gmra.mrb[36].mxu1 %vm3454_vm10, %v10070_v25  ;;  %12822 = vrot.lane.b32.xlu0 %v14174_v21, %s13114_s17  ;;  %v15198_v21 = vld [vmem:[%s16845_s4 + $0x170] sm:$0xff]  ;;  %v12480_v25 = vunpack.i.h.bf16 %v15079_v46  ;;  %v15256_v46 = vsel %vm7985_vm15, %v12374_v48, %v12375_v55 }
 0x39f   : > { %4289 = vmatprep.mubr.f32.mxu0 %v16859_v0  ;;  %7560 = vmatprep.mubr.f32.mxu1 %v16859_v0 }
 0x3a0   : > { %v15184_v10 = vpop.permute.xlu1 %12547 }
 0x3a1   : > { %12827 = vrot.lane.b32.xlu1 %v14188_v9, %s13114_s17  ;;  %10089 = vmatmul.mubr.msk.f32.gmra.mrb[42].mxu0 %vm3454_vm10, %v10073_v6  ;;  %v15189_v35 = vpop.permute.xlu0 %12552  ;;  %v12449_v9 = vunpack.i.l.bf16 %v15017_v60  ;;  %v15217_v60 = vsel %vm7985_vm15, %v12369_v63, %v12370_v11  ;;  %v12454_v11 = vunpack.i.l.bf16 %v15030_v32  ;;  %v12399_v63 = vunpack.i.l.bf16 %v14882_v18 }
 0x3a2   : > { %10375 = vmatmul.mubr.msk.f32.gmra.mrb[38].mxu1 %vm3454_vm10, %v10071_v44  ;;  %12832 = vrot.lane.b32.xlu0 %v14199_v58, %s13114_s17  ;;  %s10590_s17 = sshll.u32 %s16939_s22, 8 }
 0x3a3   : > { %4295 = vmatprep.mubr.f32.mxu0 %v16859_v0  ;;  %7566 = vmatprep.mubr.f32.mxu1 %v16859_v0  ;;  %v4791_v22 = vsel %vm1628_vm4, %v12449_v9, %v12439_v40  ;;  %v4798_v40 = vsel %vm1628_vm4, %v12459_v2, %v12460_v20  ;;  %v12489_v20 = vunpack.i.l.bf16 %v15094_v16  ;;  %v4800_v2 = vsel %vm1628_vm4, %v12479_v57, %v12480_v25  ;;  %s16668_s22 = scalar_lea.vmem %s16847_s6, %s10590_s17 }
 0x3a4   : > { %v15206_v31 = vpop.permute.xlu1 %12557  ;;  %v10729_v17 = vpack.c.bf16 %v4793_v14, %v4791_v22  ;;  %v12490_v14 = vunpack.i.h.bf16 %v15094_v16  ;;  %v12395_v25 = vunpack.i.h.bf16 %v14868_v56 }
 0x3a5   : > { %12837 = vrot.lane.b32.xlu1 %v14056_v29, %s13104_s29  ;;  %10090 = vmatmul.mubr.msk.f32.gmra.mrb[44].mxu0 %vm3454_vm10, %v15198_v21  ;;  %v15212_v58 = vpop.permute.xlu0 %12562  ;;  %v15227_v29 = vld [vmem:[%s16845_s4 + $0x178] sm:$0xff] }
 0x3a6   : > { %10376 = vmatmul.mubr.msk.f32.gmra.mrb[40].mxu1 %vm3454_vm10, %v10072_v53  ;;  %12842 = vrot.lane.b32.xlu0 %v14075_v52, %s13104_s29  ;;  %v12464_v52 = vunpack.i.l.bf16 %v15047_v33  ;;  %v12400_v53 = vunpack.i.h.bf16 %v14882_v18 }
 0x3a7   : > { %4301 = vmatprep.mubr.f32.mxu0 %v16859_v0  ;;  %7572 = vmatprep.mubr.f32.mxu1 %v16859_v0 }
 0x3a8   : > { %v15242_v44 = vpop.permute.xlu1 %12567  ;;  %v4795_v9 = vsel %vm1628_vm4, %v12464_v52, %v12454_v11 }
 0x3a9   : > { %12847 = vrot.lane.b32.xlu1 %v14062_v42, %s13104_s29  ;;  %10091 = vmatmul.mubr.msk.f32.gmra.mrb[46].mxu0 %vm3454_vm10, %v15227_v29  ;;  %v16851_v32 = vunpack.i.h.bf16 %v15242_v44  ;;  %v12569_v33 = vunpack.i.l.bf16 %v15242_v44 }
 0x3aa   : > { %10377 = vmatmul.mubr.msk.f32.gmra.mrb[42].mxu1 %vm3454_vm10, %v10073_v6  ;;  %12852 = vrot.lane.b32.xlu0 %v14088_v3, %s13104_s29  ;;  %v15263_v42 = vpop.permute.xlu0 %12572  ;;  %v4796_v3 = vsel %vm1628_vm4, %v12454_v11, %v12455_v43  ;;  %v4802_v43 = vsel %vm1628_vm4, %v12484_v51, %v12485_v24  ;;  %v12515_v11 = vunpack.i.h.bf16 %v15124_v8  ;;  %v10873_v8 = vpack.c.bf16 %v15256_v46, %v15217_v60 }
 0x3ab   : > { %v15273_v55 = vsel %vm8613_vm0, %v12569_v33, %v16851_v32  ;;  %v16850_v18 = vunpack.i.h.bf16 %v15263_v42  ;;  %v12574_v6 = vunpack.i.l.bf16 %v15263_v42  ;;  %4597 = vmatprep.mubr.f32.mxu0 %v16859_v0  ;;  %7578 = vmatprep.mubr.f32.mxu1 %v16859_v0  ;;  %v10731_v48 = vpack.c.bf16 %v4798_v40, %v4796_v3 }
 0x3ac   : > { %v15283_v22 = vpop.permute.xlu1 %12577  ;;  %v15312_v40 = vsel %vm7985_vm15, %v12399_v63, %v12400_v53  ;;  %v4799_v24 = vsel %vm1628_vm4, %v12489_v20, %v12479_v57  ;;  %v4801_v63 = vsel %vm1628_vm4, %v12490_v14, %v12484_v51  ;;  %v12510_v60 = vunpack.i.h.bf16 %v15129_v59 }
 0x3ad   : > { %v15289_v33 = vsel %vm8613_vm0, %v12574_v6, %v16850_v18  ;;  %12857 = vrot.lane.b32.xlu1 %v14116_v37, %s13104_s29  ;;  %10108 = vmatmul.mubr.msk.f32.vlgmr.msra.gmra.mrb[16].mxu0 %vm3454_vm10, %v15268_v47  ;;  %v15308_v37 = vld [vmem:[%s16845_s4 + $0x188] sm:$0xff]  ;;  %v10735_v6 = vpack.c.bf16 %v4802_v43, %v4800_v2  ;;  %v12509_v57 = vunpack.i.l.bf16 %v15129_v59  ;;  %v4806_v46 = vsel %vm1628_vm4, %v12514_v19, %v12515_v11 }
 0x3ae   : > { %10730 = vmatpush1.bf16.msra.mxu0 %v10729_v17  ;;  %10378 = vmatmul.mubr.msk.f32.gmra.mrb[44].mxu1 %vm3454_vm10, %v15198_v21  ;;  %v15303_v52 = vpop.permute.xlu0 %12582  ;;  %v12394_v21 = vunpack.i.l.bf16 %v14868_v56  ;;  %v10733_v17 = vpack.c.bf16 %v4797_v28, %v4795_v9  ;;  %v12420_v56 = vunpack.i.h.bf16 %v14937_v4  ;;  %v12540_v28 = vunpack.i.h.bf16 %v15169_v1 }
 0x3af   : > { %12862 = vrot.lane.b32.xlu0 %v14119_v38, %s13104_s29  ;;  %10732 = vmatprep.subr.bf16.mxu0 %v10731_v48  ;;  %v12505_v38 = vunpack.i.h.bf16 %v15114_v61  ;;  %v12504_v48 = vunpack.i.l.bf16 %v15114_v61  ;;  %v15339_v61 = vld [vmem:[%s16845_s4 + $0x190] sm:$0xff]  ;;  %v16855_v9 = vunpack.i.l.bf16 %v15169_v1  ;;  %v12545_v20 = vunpack.i.h.bf16 %v15174_v62 }
 0x3b0   : > { %4603 = vmatprep.mubr.f32.mxu0 %v16859_v0  ;;  %7584 = vmatprep.mubr.f32.mxu1 %v16859_v0  ;;  %v15322_v3 = vpop.permute.xlu1 %12587  ;;  %v16854_v59 = vunpack.i.l.bf16 %v15174_v62  ;;  %v12425_v43 = vunpack.i.h.bf16 %v14950_v27  ;;  %v12424_v11 = vunpack.i.l.bf16 %v14950_v27 }
 0x3b1   : > { %12867 = vrot.lane.b32.xlu1 %v14130_v50, %s13104_s29  ;;  %10109 = vmatmul.mubr.msk.f32.gmra.mrb[18].mxu0 %vm3454_vm10, %v15308_v37  ;;  %v10875_v50 = vpack.c.bf16 %v12400_v53, %v12395_v25  ;;  %v10737_v53 = vpack.c.bf16 %v4801_v63, %v4799_v24 }
 0x3b2   : > { %10734 = vmatpush1.bf16.msra.mxu0 %v10733_v17  ;;  %10379 = vmatmul.mubr.msk.f32.gmra.mrb[46].mxu1 %vm3454_vm10, %v15227_v29  ;;  %v12593_v51 = vpop.permute.xlu0 %12592  ;;  %v12419_v29 = vunpack.i.l.bf16 %v14937_v4  ;;  %v4805_v17 = vsel %vm1628_vm4, %v12510_v60, %v12514_v19  ;;  %v7988_v19 = vsel %vm7985_vm15, %v12394_v21, %v12395_v25 }
 0x3b3   : > { %12872 = vrot.lane.b32.xlu0 %v14154_v30, %s13104_s29  ;;  %10736 = vmatprep.subr.bf16.mxu0 %v10735_v6  ;;  %v12595_v14 = vunpack.i.h.bf16 %v12593_v51  ;;  %v12594_v2 = vunpack.i.l.bf16 %v12593_v51  ;;  %v4804_v30 = vsel %vm1628_vm4, %v12504_v48, %v12505_v38  ;;  %v4803_v6 = vsel %vm1628_vm4, %v12509_v57, %v12504_v48 }
 0x3b4   : > { %4609 = vmatprep.mubr.f32.mxu0 %v16859_v0  ;;  %7808 = vmatprep.mubr.f32.mxu1 %v16859_v0  ;;  %v10739_v24 = vpack.c.bf16 %v4806_v46, %v4804_v30  ;;  %v5132_v38 = vsel %vm1956_vm5, %v16854_v59, %v12545_v20  ;;  %v10741_v21 = vpack.c.bf16 %v4805_v17, %v4803_v6  ;;  %vm6545_vm4 = vcmask 932864  }
 0x3b5   : > { %12877 = vrot.lane.b32.xlu1 %v14157_v26, %s13104_s29  ;;  %10110 = vmatmul.mubr.msk.f32.gmra.mrb[20].mxu0 %vm3454_vm10, %v15339_v61  ;;  %v12598_v4 = vpop.permute.xlu1 %12597  ;;  %v15370_v26 = vld [vmem:[%s16845_s4 + $0x198] sm:$0xff]  ;;  %v15379_v48 = vsel %vm8613_vm0, %v12594_v2, %v12595_v14  ;;  %v10877_v60 = vpack.c.bf16 %v15312_v40, %v7988_v19  ;;  %v7990_v46 = vsel %vm7985_vm15, %v12419_v29, %v12420_v56  ;;  %v12429_v2 = vunpack.i.l.bf16 %v14975_v49 }
 0x3b6   : > { %10738 = vmatpush1.bf16.msra.mxu0 %v10737_v53  ;;  %10396 = vmatmul.mubr.msk.f32.vlgmr.msra.gmra.mrb[16].mxu1 %vm3454_vm10, %v15268_v47  ;;  %v12600_v63 = vunpack.i.h.bf16 %v12598_v4  ;;  %v12599_v27 = vunpack.i.l.bf16 %v12598_v4  ;;  %v15362_v51 = vpop.permute.xlu0 %12602  ;;  %v5130_v47 = vsel %vm1956_vm5, %v16855_v9, %v12540_v28  ;;  %v12430_v28 = vunpack.i.h.bf16 %v14975_v49  ;;  %v10096_v49 = vld [vmem:[%s16845_s4 + $0x1a0] sm:$0xff] }
 0x3b7   : > { %10874 = vmatpush1.bf16.msra.mxu1 %v10873_v8  ;;  %12882 = vrot.lane.b32.xlu0 %v14166_v41, %s13104_s29  ;;  %v10879_v20 = vpack.c.bf16 %v12425_v43, %v12420_v56  ;;  %v12435_v40 = vunpack.i.h.bf16 %v14978_v12  ;;  %v12434_v53 = vunpack.i.l.bf16 %v14978_v12  ;;  %v10743_v29 = vpack.c.bf16 %v5132_v38, %v5130_v47  ;;  %v3335_v12 = vld [vmem:[%s16846_s5 + $0x48] sm:$0xff]  ;;  %v3336_v47 = vld [vmem:[%s16846_s5 + $0x50] sm:$0xff] }
 0x3b8   : > { %10740 = vmatprep.subr.bf16.mxu0 %v10739_v24  ;;  %10876 = vmatprep.subr.bf16.mxu1 %v10875_v50  ;;  %v15382_v41 = vsel %vm8613_vm0, %v12599_v27, %v12600_v63  ;;  %v15384_v25 = vpack.c.bf16 %v12600_v63, %v12595_v14  ;;  %v7991_v50 = vsel %vm7985_vm15, %v12424_v11, %v12425_v43  ;;  %v16853_v24 = vunpack.i.h.bf16 %v15060_v34  ;;  %v10097_v38 = vld [vmem:[%s16845_s4 + $0x1a8] sm:$0xff] }
 0x3b9   : > { %4615 = vmatprep.mubr.f32.mxu0 %v16859_v0  ;;  %7814 = vmatprep.mubr.f32.mxu1 %v16859_v0  ;;  %v15391_v57 = vpop.permute.xlu1 %12612  ;;  %v7992_v17 = vsel %vm7985_vm15, %v12429_v2, %v12430_v28  ;;  %v7993_v30 = vsel %vm7985_vm15, %v12434_v53, %v12435_v40  ;;  %v16852_v63 = vunpack.i.h.bf16 %v15065_v13  ;;  %v10883_v27 = vpack.c.bf16 %v12435_v40, %v12430_v28 }
 0x3ba   : > { %12887 = vrot.lane.b32.xlu1 %v14182_v5, %s13104_s29  ;;  %10111 = vmatmul.mubr.msk.f32.gmra.mrb[22].mxu0 %vm3454_vm10, %v15370_v26  ;;  %v15400_v14 = vpop.permute.xlu0 %12607  ;;  %v3334_v5 = vld [vmem:[%s16846_s5 + $0x40] sm:$0xff]  ;;  %v10885_v40 = vpack.c.bf16 %v7993_v30, %v7992_v17 }
 0x3bb   : > { %10742 = vmatpush1.bf16.msra.mxu0 %v10741_v21  ;;  %10397 = vmatmul.mubr.msk.f32.gmra.mrb[18].mxu1 %vm3454_vm10, %v15308_v37 }
 0x3bc   : > { %10878 = vmatpush1.bf16.msra.mxu1 %v10877_v60  ;;  %12892 = vrot.lane.b32.xlu0 %v14176_v54, %s13104_s29  ;;  %v10881_v54 = vpack.c.bf16 %v7991_v50, %v7990_v46  ;;  %v10104_v50 = vld [vmem:[%s16845_s4 + $0x1e0] sm:$0xff] }
 0x3bd   : > { %10744 = vmatprep.subr.bf16.mxu0 %v10743_v29  ;;  %10880 = vmatprep.subr.bf16.mxu1 %v10879_v20  ;;  %v12618_v37 = vpop.permute.xlu1 %12617 }
 0x3be   : > { %4621 = vmatprep.mubr.f32.mxu0 %v16859_v0  ;;  %7820 = vmatprep.mubr.f32.mxu1 %v16859_v0  ;;  %v12620_v56 = vunpack.i.h.bf16 %v12618_v37  ;;  %v12619_v43 = vunpack.i.l.bf16 %v12618_v37  ;;  %v12623_v11 = vpop.permute.xlu0 %12622  ;;  %v3338_v37 = vld [vmem:[%s16846_s5 + $0x60] sm:$0xff] }
 0x3bf   : > { %3384 = vperm.xlu1 %12035, %v3334_v5   ;;  %10112 = vmatmul.mubr.msk.f32.gmra.mrb[24].mxu0 %vm3454_vm10, %v10096_v49  ;;  %v12625_v4 = vunpack.i.h.bf16 %v12623_v11  ;;  %v12624_v6 = vunpack.i.l.bf16 %v12623_v11  ;;  %v10887_v5 = vpack.c.bf16 %v16852_v63, %v16853_v24 }
 0x3c0   : > { %10398 = vmatmul.mubr.msk.f32.gmra.mrb[20].mxu1 %vm3454_vm10, %v15339_v61  ;;  %3389 = vperm.xlu0 %12034, %v3335_v12   ;;  %v15428_v19 = vsel %vm8613_vm0, %v12619_v43, %v12620_v56  ;;  %v3337_v61 = vld [vmem:[%s16846_s5 + $0x58] sm:$0xff]  ;;  %v3339_v43 = vld [vmem:[%s16846_s5 + $0x68] sm:$0xff] }
 0x3c1   : > { %16873 = vst [vmem:[#allocation3_spill] sm:$0xff] %v15428_v19  ;;  %10882 = vmatpush1.bf16.msra.mxu1 %v10881_v54  ;;  %v15436_v21 = vpack.c.bf16 %v12625_v4, %v12620_v56  ;;  %v15439_v60 = vsel %vm8613_vm0, %v12624_v6, %v12625_v4  ;;  %4627 = vmatprep.mubr.f32.mxu0 %v16859_v0  ;;  %v12628_v46 = vpop.permute.xlu1 %12627  ;;  %v10098_v54 = vld [vmem:[%s16845_s4 + $0x1b0] sm:$0xff]  ;;  %v10099_v6 = vld [vmem:[%s16845_s4 + $0x1b8] sm:$0xff] }
 0x3c2   : > { %10884 = vmatprep.subr.bf16.mxu1 %v10883_v27  ;;  %7826 = vmatprep.mubr.f32.mxu1 %v16859_v0  ;;  %v12630_v28 = vunpack.i.h.bf16 %v12628_v46  ;;  %v12629_v20 = vunpack.i.l.bf16 %v12628_v46  ;;  %v12633_v2 = vpop.permute.xlu0 %12632  ;;  %v3340_v4 = vld [vmem:[%s16846_s5 + $0x70] sm:$0xff]  ;;  %v3341_v27 = vld [vmem:[%s16846_s5 + $0x78] sm:$0xff]  ;;  %v10100_v46 = vld [vmem:[%s16845_s4 + $0x1c0] sm:$0xff] }
 0x3c3   : > { %3394 = vperm.xlu1 %12035, %v3336_v47   ;;  %10113 = vmatmul.mubr.msk.f32.gmra.mrb[26].mxu0 %vm3454_vm10, %v10097_v38  ;;  %v12635_v53 = vunpack.i.h.bf16 %v12633_v2  ;;  %v12634_v29 = vunpack.i.l.bf16 %v12633_v2  ;;  %v3328_v2 = vld [vmem:[%s16846_s5 + $0x10] sm:$0xff] }
 0x3c4   : > { %10399 = vmatmul.mubr.msk.f32.gmra.mrb[22].mxu1 %vm3454_vm10, %v15370_v26  ;;  %3399 = vperm.xlu0 %12034, %v3337_v61   ;;  %v15456_v12 = vsel %vm8613_vm0, %v12629_v20, %v12630_v28  ;;  %v3326_v61 = vld [vmem:[%s16846_s5] sm:$0xff] }
 0x3c5   : > { %16874 = vst [vmem:[#allocation4_spill] sm:$0xff] %v15456_v12  ;;  %10886 = vmatpush1.bf16.msra.mxu1 %v10885_v40  ;;  %v15464_v56 = vpack.c.bf16 %v12635_v53, %v12630_v28  ;;  %v15467_v26 = vsel %vm8613_vm0, %v12634_v29, %v12635_v53  ;;  %4633 = vmatprep.mubr.f32.mxu0 %v16859_v0  ;;  %v15473_v11 = vpop.permute.xlu1 %12637  ;;  %v3327_v28 = vld [vmem:[%s16846_s5 + $0x8] sm:$0xff]  ;;  %v3329_v53 = vld [vmem:[%s16846_s5 + $0x18] sm:$0xff] }
 0x3c6   : > { %16876 = vst [vmem:[#allocation6_spill] sm:$0xff] %v15467_v26  ;;  %10888 = vmatprep.subr.bf16.mxu1 %v10887_v5  ;;  %7832 = vmatprep.mubr.f32.mxu1 %v16859_v0  ;;  %v15478_v30 = vpop.permute.xlu0 %12642  ;;  %v10101_v40 = vld [vmem:[%s16845_s4 + $0x1c8] sm:$0xff] }
 0x3c7   : > { %16875 = vst [vmem:[#allocation5_spill] sm:$0xff] %v15464_v56  ;;  %3404 = vperm.xlu1 %12035, %v3338_v37   ;;  %10114 = vmatmul.mubr.msk.f32.gmra.mrb[28].mxu0 %vm3454_vm10, %v10098_v54 }
 0x3c8   : > { %10400 = vmatmul.mubr.msk.f32.gmra.mrb[24].mxu1 %vm3454_vm10, %v10096_v49  ;;  %3409 = vperm.xlu0 %12034, %v3339_v43  }
 0x3c9   : > { %4639 = vmatprep.mubr.f32.mxu0 %v16859_v0  ;;  %7838 = vmatprep.mubr.f32.mxu1 %v16859_v0  ;;  %v15493_v47 = vpop.permute.xlu1 %12647 }
 0x3ca   : > { %v15495_v49 = vpop.permute.xlu0 %12652 }
 0x3cb   : > { %3414 = vperm.xlu1 %12035, %v3340_v4   ;;  %10115 = vmatmul.mubr.msk.f32.gmra.mrb[30].mxu0 %vm3454_vm10, %v10099_v6 }
 0x3cc   : > { %10401 = vmatmul.mubr.msk.f32.gmra.mrb[26].mxu1 %vm3454_vm10, %v10097_v38  ;;  %3419 = vperm.xlu0 %12034, %v3341_v27  }
 0x3cd   : > { %4645 = vmatprep.mubr.f32.mxu0 %v16859_v0  ;;  %7844 = vmatprep.mubr.f32.mxu1 %v16859_v0  ;;  %v15510_v20 = vpop.permute.xlu1 %12657 }
 0x3ce   : > { %v15512_v38 = vpop.permute.xlu0 %12662 }
 0x3cf   : > { %3344 = vperm.xlu1 %12035, %v3326_v61   ;;  %10116 = vmatmul.mubr.msk.f32.gmra.mrb[32].mxu0 %vm3454_vm10, %v10100_v46  ;;  %v3330_v61 = vld [vmem:[%s16846_s5 + $0x20] sm:$0xff] }
 0x3d0   : > { %10402 = vmatmul.mubr.msk.f32.gmra.mrb[28].mxu1 %vm3454_vm10, %v10098_v54  ;;  %3349 = vperm.xlu0 %12034, %v3327_v28   ;;  %v10102_v28 = vld [vmem:[%s16845_s4 + $0x1d0] sm:$0xff] }
 0x3d1   : > { %4651 = vmatprep.mubr.f32.mxu0 %v16859_v0  ;;  %7850 = vmatprep.mubr.f32.mxu1 %v16859_v0  ;;  %v15527_v29 = vpop.permute.xlu1 %12667 }
 0x3d2   : > { %16877 = vst [vmem:[#allocation7_spill] sm:$0xff] %v15527_v29  ;;  %v16849_v5 = vunpack.i.h.bf16 %v15527_v29  ;;  %v12669_v37 = vunpack.i.l.bf16 %v15527_v29  ;;  %v15531_v54 = vpop.permute.xlu0 %12672 }
 0x3d3   : > { %16878 = vst [vmem:[#allocation8_spill] sm:$0xff] %v15531_v54  ;;  %3354 = vperm.xlu1 %12035, %v3328_v2   ;;  %10117 = vmatmul.mubr.msk.f32.gmra.mrb[34].mxu0 %vm3454_vm10, %v10101_v40  ;;  %v16848_v43 = vunpack.i.h.bf16 %v15531_v54  ;;  %v12674_v4 = vunpack.i.l.bf16 %v15531_v54 }
 0x3d4   : > { %10403 = vmatmul.mubr.msk.f32.gmra.mrb[30].mxu1 %vm3454_vm10, %v10099_v6  ;;  %3359 = vperm.xlu0 %12034, %v3329_v53   ;;  %v15540_v27 = vsel %vm8927_vm1, %v12669_v37, %v16849_v5  ;;  %v3331_v6 = vld [vmem:[%s16846_s5 + $0x28] sm:$0xff] }
 0x3d5   : > { %16879 = vst [vmem:[#allocation9_spill] sm:$0xff] %v15540_v27  ;;  %v15551_v2 = vsel %vm8927_vm1, %v12674_v4, %v16848_v43  ;;  %4657 = vmatprep.mubr.f32.mxu0 %v16859_v0  ;;  %7856 = vmatprep.mubr.f32.mxu1 %v16859_v0  ;;  %v15558_v53 = vpop.permute.xlu1 %12677  ;;  %v3332_v4 = vld [vmem:[%s16846_s5 + $0x30] sm:$0xff]  ;;  %v10103_v43 = vld [vmem:[%s16845_s4 + $0x1d8] sm:$0xff]  ;;  %v12554_v27 = vunpack.i.l.bf16 %v15189_v35 }
 0x3d6   : > { %16880 = vst [vmem:[#allocation10_spill] sm:$0xff] %v15551_v2  ;;  %v15562_v17 = vpop.permute.xlu0 %12682  ;;  %v12564_v2 = vunpack.i.l.bf16 %v15212_v58 }
 0x3d7   : > { %3364 = vperm.xlu1 %12035, %v3330_v61   ;;  %10118 = vmatmul.mubr.msk.f32.gmra.mrb[36].mxu0 %vm3454_vm10, %v10102_v28  ;;  %v3333_v61 = vld [vmem:[%s16846_s5 + $0x38] sm:$0xff] }
 0x3d8   : > { %10404 = vmatmul.mubr.msk.f32.gmra.mrb[32].mxu1 %vm3454_vm10, %v10100_v46  ;;  %3369 = vperm.xlu0 %12034, %v3331_v6  }
 0x3d9   : > { %4663 = vmatprep.mubr.f32.mxu0 %v16859_v0  ;;  %7862 = vmatprep.mubr.f32.mxu1 %v16859_v0  ;;  %v15577_v37 = vpop.permute.xlu1 %12687 }
 0x3da   : > { %v12693_v46 = vpop.permute.xlu0 %12692 }
 0x3db   : > { %3374 = vperm.xlu1 %12035, %v3332_v4   ;;  %10119 = vmatmul.mubr.msk.f32.gmra.mrb[38].mxu0 %vm3454_vm10, %v10103_v43  ;;  %v12695_v6 = vunpack.i.h.bf16 %v12693_v46  ;;  %v12694_v5 = vunpack.i.l.bf16 %v12693_v46  ;;  %v12559_v46 = vunpack.i.l.bf16 %v15206_v31 }
 0x3dc   : > { %10405 = vmatmul.mubr.msk.f32.gmra.mrb[34].mxu1 %vm3454_vm10, %v10101_v40  ;;  %3379 = vperm.xlu0 %12034, %v3333_v61  }
 0x3dd   : > { %4669 = vmatprep.mubr.f32.mxu0 %v16859_v0  ;;  %7868 = vmatprep.mubr.f32.mxu1 %v16859_v0  ;;  %v12698_v8 = vpop.permute.xlu1 %12697  ;;  %v15590_v40 = vsel %vm8927_vm1, %v12694_v5, %v12695_v6 }
 0x3de   : > { %v12700_v16 = vunpack.i.h.bf16 %v12698_v8  ;;  %v12699_v18 = vunpack.i.l.bf16 %v12698_v8  ;;  %v15586_v32 = vpop.permute.xlu0 %12702  ;;  %16881 = vst [vmem:[#allocation11_spill] sm:$0xff] %v15590_v40  ;;  %v10105_v8 = vld [vmem:[%s16845_s4 + $0x1e8] sm:$0xff] }
 0x3df   : > { %10120 = vmatmul.mubr.msk.f32.gmra.mrb[40].mxu0 %vm3454_vm10, %v10104_v50 }
 0x3e0   : > { %10406 = vmatmul.mubr.msk.f32.gmra.mrb[36].mxu1 %vm3454_vm10, %v10102_v28  ;;  %v15594_v4 = vsel %vm8927_vm1, %v12699_v18, %v12700_v16  ;;  %v15596_v61 = vpack.c.bf16 %v12700_v16, %v12695_v6  ;;  %4675 = vmatprep.mubr.f32.mxu0 %v16859_v0  ;;  %v12550_v18 = vunpack.i.h.bf16 %v15184_v10  ;;  %v12549_v16 = vunpack.i.l.bf16 %v15184_v10  ;;  %v15617_v28 = vld [vmem:[%s16845_s4 + $0x1f0] sm:$0xff] }
 0x3e1   : > { %16882 = vst [vmem:[#allocation12_spill] sm:$0xff] %v15594_v4  ;;  %7874 = vmatprep.mubr.f32.mxu1 %v16859_v0  ;;  %v15605_v5 = vpop.permute.xlu1 %12712  ;;  %v12560_v6 = vunpack.i.h.bf16 %v15206_v31  ;;  %v12555_v10 = vunpack.i.h.bf16 %v15189_v35  ;;  %v16885_v4 = vunpack.i.l.bf16 %v15174_v62  ;;  %v12565_v31 = vunpack.i.h.bf16 %v15212_v58  ;;  %v15642_v35 = vld [vmem:[%s16845_s4 + $0x1f8] sm:$0xff] }
 0x3e2   : > { %16883 = vst [vmem:[#allocation13_spill] sm:$0xff] %v15596_v61  ;;  %v15607_v63 = vpop.permute.xlu0 %12707  ;;  %v16887_v62 = vmov 0.0   ;;  %v12579_v58 = vunpack.i.l.bf16 %v15283_v22 }
 0x3e3   : > { %10121 = vmatmul.mubr.msk.f32.gmra.mrb[42].mxu0 %vm3454_vm10, %v10105_v8  ;;  %v5131_v61 = vsel %vm1956_vm5, %v12550_v18, %v16885_v4  ;;  %v12469_v4 = vunpack.i.l.bf16 %v15060_v34  ;;  %v12580_v18 = vunpack.i.h.bf16 %v15283_v22  ;;  %v5135_v19 = vsel %vm1956_vm5, %v12565_v31, %v12559_v46 }
 0x3e4   : > { %10407 = vmatmul.mubr.msk.f32.gmra.mrb[38].mxu1 %vm3454_vm10, %v10103_v43  ;;  %4681 = vmatprep.mubr.f32.mxu0 %v16859_v0  ;;  %v16884_v43 = vunpack.i.l.bf16 %v15169_v1 }
 0x3e5   : > { %7880 = vmatprep.mubr.f32.mxu1 %v16859_v0  ;;  %v12718_v24 = vpop.permute.xlu1 %12717  ;;  %v5138_v54 = vsel %vm1956_vm5, %v12579_v58, %v12580_v18  ;;  %v16890_v18 = vunpack.i.h.bf16 %v15065_v13 }
 0x3e6   : > { %v12720_v59 = vunpack.i.h.bf16 %v12718_v24  ;;  %v12719_v9 = vunpack.i.l.bf16 %v12718_v24  ;;  %v5129_v40 = vsel %vm1956_vm5, %v12549_v16, %v16884_v43 }
 0x3e7   : > { %10122 = vmatmul.mubr.msk.f32.gmra.mrb[44].mxu0 %vm3454_vm10, %v15617_v28  ;;  %v12723_v0 = vpop.permute.xlu0 %12722  ;;  %v10745_v56 = vpack.c.bf16 %v5131_v61, %v5129_v40 }
 0x3e8   : > { %10408 = vmatmul.mubr.msk.f32.gmra.mrb[40].mxu1 %vm3454_vm10, %v10104_v50  ;;  %v15636_v1 = vsel %vm8927_vm1, %v12719_v9, %v12720_v59  ;;  %v12725_v24 = vunpack.i.h.bf16 %v12723_v0  ;;  %v12724_v16 = vunpack.i.l.bf16 %v12723_v0  ;;  %4687 = vmatprep.mubr.f32.mxu0 %v16887_v62  ;;  %v5136_v9 = vsel %vm1956_vm5, %v12559_v46, %v12560_v6 }
 0x3e9   : > { %16886 = vst [vmem:[#allocation14_spill] sm:$0xff] %v15636_v1  ;;  %7886 = vmatprep.mubr.f32.mxu1 %v16887_v62  ;;  %v12585_v50 = vunpack.i.h.bf16 %v15303_v52  ;;  %v12584_v0 = vunpack.i.l.bf16 %v15303_v52  ;;  %v12474_v6 = vunpack.i.l.bf16 %v15065_v13  ;;  %v5133_v52 = vsel %vm1956_vm5, %v12564_v2, %v12554_v27 }
 0x3ea   : > { %v15651_v43 = vpack.c.bf16 %v12725_v24, %v12720_v59  ;;  %v15654_v12 = vsel %vm8927_vm1, %v12724_v16, %v12725_v24  ;;  %v12728_v26 = vpop.permute.xlu1 %12727  ;;  %v15668_v24 = vld [vmem:[%s16845_s4 + $0x200] sm:$0xff]  ;;  %v5134_v16 = vsel %vm1956_vm5, %v12554_v27, %v12555_v10  ;;  %v12589_v46 = vunpack.i.l.bf16 %v15322_v3 }
 0x3eb   : > { %10123 = vmatmul.mubr.msk.f32.gmra.mrb[46].mxu0 %vm3454_vm10, %v15642_v35  ;;  %v12730_v22 = vunpack.i.h.bf16 %v12728_v26  ;;  %v12729_v29 = vunpack.i.l.bf16 %v12728_v26  ;;  %v10747_v2 = vpack.c.bf16 %v5136_v9, %v5134_v16  ;;  %v5140_v1 = vsel %vm1956_vm5, %v12584_v0, %v12585_v50 }
 0x3ec   : > { %10409 = vmatmul.mubr.msk.f32.gmra.mrb[42].mxu1 %vm3454_vm10, %v10105_v8  ;;  %v12733_v59 = vpop.permute.xlu0 %12732  ;;  %4935 = vmatprep.mubr.f32.mxu0 %v16887_v62  ;;  %v12590_v8 = vunpack.i.h.bf16 %v15322_v3  ;;  %v12615_v27 = vunpack.i.h.bf16 %v15391_v57  ;;  %v16889_v3 = vunpack.i.h.bf16 %v15060_v34  ;;  %v8301_v50 = vsel %vm8299_vm2, %v12474_v6, %v16890_v18  ;;  %v15706_v34 = vld [vmem:[%s16845_s4 + $0x208] sm:$0xff] }
 0x3ed   : > { %v15672_v26 = vsel %vm8927_vm1, %v12729_v29, %v12730_v22  ;;  %v12735_v40 = vunpack.i.h.bf16 %v12733_v59  ;;  %v12734_v61 = vunpack.i.l.bf16 %v12733_v59  ;;  %7892 = vmatprep.mubr.f32.mxu1 %v16887_v62  ;;  %v12614_v29 = vunpack.i.l.bf16 %v15391_v57 }
 0x3ee   : > { %16888 = vst [vmem:[#allocation15_spill] sm:$0xff] %v15672_v26  ;;  %v15677_v31 = vpop.permute.xlu1 %12737  ;;  %v8300_v9 = vsel %vm8299_vm2, %v12469_v4, %v16889_v3  ;;  %v12495_v16 = vunpack.i.h.bf16 %v15099_v45  ;;  %v12494_v13 = vunpack.i.l.bf16 %v15099_v45  ;;  %v12500_v4 = vunpack.i.h.bf16 %v15109_v23 }
 0x3ef   : > { %v15683_v10 = vpack.c.bf16 %v12735_v40, %v12730_v22  ;;  %v15686_v59 = vsel %vm8927_vm1, %v12734_v61, %v12735_v40  ;;  %10140 = vmatmul.mubr.msk.f32.vlgmr.msra.gmra.mrb[16].mxu0 %vm3454_vm10, %v15668_v24  ;;  %v12499_v6 = vunpack.i.l.bf16 %v15109_v23  ;;  %v5137_v40 = vsel %vm1956_vm5, %v12589_v46, %v12579_v58 }
 0x3f0   : > { %10746 = vmatpush1.bf16.msra.mxu0 %v10745_v56  ;;  %10410 = vmatmul.mubr.msk.f32.gmra.mrb[44].mxu1 %vm3454_vm10, %v15617_v28  ;;  %v15701_v22 = vpop.permute.xlu0 %12742  ;;  %v10749_v56 = vpack.c.bf16 %v5135_v19, %v5133_v52  ;;  %v12605_v28 = vunpack.i.h.bf16 %v15362_v51  ;;  %v12604_v61 = vunpack.i.l.bf16 %v15362_v51  ;;  %v10751_v3 = vpack.c.bf16 %v5140_v1, %v5138_v54  ;;  %v15735_v1 = vld [vmem:[%s16845_s4 + $0x210] sm:$0xff] }
 0x3f1   : > { %10748 = vmatprep.subr.bf16.mxu0 %v10747_v2  ;;  %4941 = vmatprep.mubr.f32.mxu0 %v16887_v62  ;;  %v5139_v18 = vsel %vm1956_vm5, %v12590_v8, %v12584_v0  ;;  %v12610_v45 = vunpack.i.h.bf16 %v15400_v14  ;;  %v12609_v57 = vunpack.i.l.bf16 %v15400_v14  ;;  %v5144_v19 = vsel %vm1956_vm5, %v12614_v29, %v12615_v27 }
 0x3f2   : > { %7898 = vmatprep.mubr.f32.mxu1 %v16887_v62  ;;  %v12640_v58 = vunpack.i.h.bf16 %v15473_v11  ;;  %v12645_v52 = vunpack.i.h.bf16 %v15478_v30  ;;  %v8303_v0 = vsel %vm8299_vm2, %v12499_v6, %v12500_v4  ;;  %v12520_v2 = vunpack.i.h.bf16 %v15139_v15 }
 0x3f3   : > { %10141 = vmatmul.mubr.msk.f32.gmra.mrb[18].mxu0 %vm3454_vm10, %v15706_v34  ;;  %v15721_v23 = vpop.permute.xlu1 %12747  ;;  %v12519_v8 = vunpack.i.l.bf16 %v15139_v15  ;;  %v10889_v46 = vpack.c.bf16 %v8301_v50, %v8300_v9  ;;  %v12525_v27 = vunpack.i.h.bf16 %v15144_v36  ;;  %v5142_v54 = vsel %vm1956_vm5, %v12604_v61, %v12605_v28 }
 0x3f4   : > { %10750 = vmatpush1.bf16.msra.mxu0 %v10749_v56  ;;  %10411 = vmatmul.mubr.msk.f32.gmra.mrb[46].mxu1 %vm3454_vm10, %v15642_v35  ;;  %v15730_v14 = vpop.permute.xlu0 %12752  ;;  %v12524_v35 = vunpack.i.l.bf16 %v15144_v36  ;;  %v10753_v56 = vpack.c.bf16 %v5139_v18, %v5137_v40  ;;  %v8302_v51 = vsel %vm8299_vm2, %v12494_v13, %v12495_v16  ;;  %v5143_v6 = vsel %vm1956_vm5, %v12610_v45, %v12614_v29  ;;  %v10127_v13 = vld [vmem:[%s16845_s4 + $0x218] sm:$0xff] }
 0x3f5   : > { %10752 = vmatprep.subr.bf16.mxu0 %v10751_v3  ;;  %4947 = vmatprep.mubr.f32.mxu0 %v16887_v62  ;;  %v5141_v26 = vsel %vm1956_vm5, %v12609_v57, %v12604_v61  ;;  %v10755_v15 = vpack.c.bf16 %v5144_v19, %v5142_v54  ;;  %v10891_v36 = vpack.c.bf16 %v12500_v4, %v12495_v16  ;;  %v16891_v29 = vunpack.i.l.bf16 %v15473_v11 }
 0x3f6   : > { %8122 = vmatprep.mubr.f32.mxu1 %v16887_v62  ;;  %v16892_v40 = vunpack.i.l.bf16 %v15478_v30  ;;  %v10893_v61 = vpack.c.bf16 %v8303_v0, %v8302_v51  ;;  %v8305_v16 = vsel %vm8299_vm2, %v12524_v35, %v12525_v27  ;;  %v10757_v4 = vpack.c.bf16 %v5143_v6, %v5141_v26  ;;  %v10128_v0 = vld [vmem:[%s16845_s4 + $0x220] sm:$0xff] }
 0x3f7   : > { %10142 = vmatmul.mubr.msk.f32.gmra.mrb[20].mxu0 %vm3454_vm10, %v15735_v1  ;;  %v15750_v9 = vpop.permute.xlu1 %12757  ;;  %v5468_v57 = vsel %vm2284_vm6, %v16891_v29, %v12640_v58  ;;  %v12530_v3 = vunpack.i.h.bf16 %v15154_v39  ;;  %v12529_v18 = vunpack.i.l.bf16 %v15154_v39  ;;  %v10895_v19 = vpack.c.bf16 %v12525_v27, %v12520_v2  ;;  %v10129_v29 = vld [vmem:[%s16845_s4 + $0x228] sm:$0xff] }
 0x3f8   : > { %10754 = vmatpush1.bf16.msra.mxu0 %v10753_v56  ;;  %10428 = vmatmul.mubr.msk.f32.vlgmr.msra.gmra.mrb[16].mxu1 %vm3454_vm10, %v15668_v24  ;;  %v15754_v50 = vpop.permute.xlu0 %12762  ;;  %v5470_v28 = vsel %vm2284_vm6, %v16892_v40, %v12645_v52  ;;  %v8304_v24 = vsel %vm8299_vm2, %v12519_v8, %v12520_v2  ;;  %v12535_v51 = vunpack.i.h.bf16 %v15159_v7  ;;  %v12534_v26 = vunpack.i.l.bf16 %v15159_v7 }
 0x3f9   : > { %10890 = vmatpush1.bf16.msra.mxu1 %v10889_v46  ;;  %10756 = vmatprep.subr.bf16.mxu0 %v10755_v15  ;;  %v10759_v45 = vpack.c.bf16 %v5470_v28, %v5468_v57  ;;  %v8306_v8 = vsel %vm8299_vm2, %v12529_v18, %v12530_v3  ;;  %v10897_v27 = vpack.c.bf16 %v8305_v16, %v8304_v24  ;;  %v16894_v28 = vunpack.i.h.bf16 %v15263_v42  ;;  %v10130_v16 = vld [vmem:[%s16845_s4 + $0x230] sm:$0xff] }
 0x3fa   : > { %10892 = vmatprep.subr.bf16.mxu1 %v10891_v36  ;;  %4953 = vmatprep.mubr.f32.mxu0 %v16887_v62  ;;  %v8307_v56 = vsel %vm8299_vm2, %v12534_v26, %v12535_v51  ;;  %v10899_v15 = vpack.c.bf16 %v12535_v51, %v12530_v3  ;;  %v12664_v6 = vunpack.i.l.bf16 %v15512_v38  ;;  %vm9715_vm5 = vcmask 1048464  }
 0x3fb   : > { %8128 = vmatprep.mubr.f32.mxu1 %v16887_v62  ;;  %10143 = vmatmul.mubr.msk.f32.gmra.mrb[22].mxu0 %vm3454_vm10, %v10127_v13  ;;  %v15772_v58 = vpop.permute.xlu1 %12767  ;;  %v10901_v57 = vpack.c.bf16 %v8307_v56, %v8306_v8  ;;  %v10132_v8 = vld [vmem:[%s16845_s4 + $0x240] sm:$0xff] }
 0x3fc   : > { %10758 = vmatpush1.bf16.msra.mxu0 %v10757_v4  ;;  %10429 = vmatmul.mubr.msk.f32.gmra.mrb[18].mxu1 %vm3454_vm10, %v15706_v34  ;;  %v16870_v52 = vunpack.i.h.bf16 %v15772_v58  ;;  %v12769_v39 = vunpack.i.l.bf16 %v15772_v58  ;;  %v15780_v54 = vpop.permute.xlu0 %12772 }
 0x3fd   : > { %10894 = vmatpush1.bf16.msra.mxu1 %v10893_v61  ;;  %10760 = vmatprep.subr.bf16.mxu0 %v10759_v45  ;;  %v16869_v2 = vunpack.i.h.bf16 %v15780_v54  ;;  %v12774_v7 = vunpack.i.l.bf16 %v15780_v54  ;;  %v10131_v45 = vld [vmem:[%s16845_s4 + $0x238] sm:$0xff] }
 0x3fe   : > { %10896 = vmatprep.subr.bf16.mxu1 %v10895_v19  ;;  %v15790_v34 = vsel %vm9241_vm3, %v12769_v39, %v16870_v52  ;;  %4959 = vmatprep.mubr.f32.mxu0 %v16887_v62  ;;  %v12690_v52 = vunpack.i.h.bf16 %v15577_v37 }
 0x3ff   : > { %v15797_v46 = vsel %vm9241_vm3, %v12774_v7, %v16869_v2  ;;  %8134 = vmatprep.mubr.f32.mxu1 %v16887_v62  ;;  %10144 = vmatmul.mubr.msk.f32.gmra.mrb[24].mxu0 %vm3454_vm10, %v10128_v0  ;;  %v15801_v35 = vpop.permute.xlu1 %12777  ;;  %v12680_v2 = vunpack.i.h.bf16 %v15558_v53 }
 0x400   : > { %10430 = vmatmul.mubr.msk.f32.gmra.mrb[20].mxu1 %vm3454_vm10, %v15735_v1  ;;  %v15808_v36 = vpop.permute.xlu0 %12782  ;;  %4965 = vmatprep.mubr.f32.mxu0 %v16887_v62  ;;  %v16893_v1 = vunpack.i.h.bf16 %v15242_v44 }
 0x401   : > { %10898 = vmatpush1.bf16.msra.mxu1 %v10897_v27  ;;  %8140 = vmatprep.mubr.f32.mxu1 %v16887_v62 }
 0x402   : > { %10900 = vmatprep.subr.bf16.mxu1 %v10899_v15  ;;  %v10903_v61 = vpack.c.bf16 %v16894_v28, %v16893_v1 }
 0x403   : > { %10145 = vmatmul.mubr.msk.f32.gmra.mrb[26].mxu0 %vm3454_vm10, %v10129_v29  ;;  %v15816_v40 = vpop.permute.xlu1 %12787 }
 0x404   : > { %10431 = vmatmul.mubr.msk.f32.gmra.mrb[22].mxu1 %vm3454_vm10, %v10127_v13  ;;  %v12793_v24 = vpop.permute.xlu0 %12792  ;;  %4971 = vmatprep.mubr.f32.mxu0 %v16887_v62 }
 0x405   : > { %10902 = vmatpush1.bf16.msra.mxu1 %v10901_v57  ;;  %8146 = vmatprep.mubr.f32.mxu1 %v16887_v62  ;;  %v12795_v4 = vunpack.i.h.bf16 %v12793_v24  ;;  %v12794_v3 = vunpack.i.l.bf16 %v12793_v24 }
 0x406   : > { %10904 = vmatprep.subr.bf16.mxu1 %v10903_v61 }
 0x407   : > { %10146 = vmatmul.mubr.msk.f32.gmra.mrb[28].mxu0 %vm3454_vm10, %v10130_v16  ;;  %v12798_v44 = vpop.permute.xlu1 %12797  ;;  %v15838_v19 = vsel %vm9241_vm3, %v12794_v3, %v12795_v4  ;;  %v12654_v3 = vunpack.i.l.bf16 %v15495_v49 }
 0x408   : > { %10432 = vmatmul.mubr.msk.f32.gmra.mrb[24].mxu1 %vm3454_vm10, %v10128_v0  ;;  %v12800_v42 = vunpack.i.h.bf16 %v12798_v44  ;;  %v12799_v13 = vunpack.i.l.bf16 %v12798_v44  ;;  %v15830_v18 = vpop.permute.xlu0 %12802  ;;  %4977 = vmatprep.mubr.f32.mxu0 %v16887_v62 }
 0x409   : > { %8152 = vmatprep.mubr.f32.mxu1 %v16887_v62 }
 0x40a   : > { %v15841_v51 = vsel %vm9241_vm3, %v12799_v13, %v12800_v42  ;;  %v15843_v26 = vpack.c.bf16 %v12800_v42, %v12795_v4 }
 0x40b   : > { %10147 = vmatmul.mubr.msk.f32.gmra.mrb[30].mxu0 %vm3454_vm10, %v10131_v45  ;;  %v15848_v0 = vpop.permute.xlu1 %12812 }
 0x40c   : > { %10433 = vmatmul.mubr.msk.f32.gmra.mrb[26].mxu1 %vm3454_vm10, %v10129_v29  ;;  %v15851_v7 = vpop.permute.xlu0 %12807  ;;  %4983 = vmatprep.mubr.f32.mxu0 %v16887_v62  ;;  %v10133_v29 = vld [vmem:[%s16845_s4 + $0x248] sm:$0xff] }
 0x40d   : > { %8158 = vmatprep.mubr.f32.mxu1 %v16887_v62 }
 0x40f   : > { %10148 = vmatmul.mubr.msk.f32.gmra.mrb[32].mxu0 %vm3454_vm10, %v10132_v8  ;;  %v12818_v27 = vpop.permute.xlu1 %12817 }
 0x410   : > { %10434 = vmatmul.mubr.msk.f32.gmra.mrb[28].mxu1 %vm3454_vm10, %v10130_v16  ;;  %v12820_v56 = vunpack.i.h.bf16 %v12818_v27  ;;  %v12819_v15 = vunpack.i.l.bf16 %v12818_v27  ;;  %v12823_v57 = vpop.permute.xlu0 %12822  ;;  %4989 = vmatprep.mubr.f32.mxu0 %v16887_v62  ;;  %v10134_v27 = vld [vmem:[%s16845_s4 + $0x250] sm:$0xff] }
 0x411   : > { %v12825_v1 = vunpack.i.h.bf16 %v12823_v57  ;;  %v12824_v28 = vunpack.i.l.bf16 %v12823_v57  ;;  %8164 = vmatprep.mubr.f32.mxu1 %v16887_v62 }
 0x412   : > { %v15866_v61 = vsel %vm9241_vm3, %v12819_v15, %v12820_v56 }
 0x413   : > { %v15868_v24 = vpack.c.bf16 %v12825_v1, %v12820_v56  ;;  %v15871_v16 = vsel %vm9241_vm3, %v12824_v28, %v12825_v1  ;;  %10149 = vmatmul.mubr.msk.f32.gmra.mrb[34].mxu0 %vm3454_vm10, %v10133_v29  ;;  %v12828_v4 = vpop.permute.xlu1 %12827 }
 0x414   : > { %10435 = vmatmul.mubr.msk.f32.gmra.mrb[30].mxu1 %vm3454_vm10, %v10131_v45  ;;  %v12830_v44 = vunpack.i.h.bf16 %v12828_v4  ;;  %v12829_v42 = vunpack.i.l.bf16 %v12828_v4  ;;  %v12833_v13 = vpop.permute.xlu0 %12832  ;;  %4995 = vmatprep.mubr.f32.mxu0 %v16887_v62  ;;  %v10135_v4 = vld [vmem:[%s16845_s4 + $0x258] sm:$0xff] }
 0x415   : > { %v12835_v56 = vunpack.i.h.bf16 %v12833_v13  ;;  %v12834_v15 = vunpack.i.l.bf16 %v12833_v13  ;;  %8170 = vmatprep.mubr.f32.mxu1 %v16887_v62  ;;  %v12650_v13 = vunpack.i.h.bf16 %v15493_v47 }
 0x416   : > { %v15883_v57 = vsel %vm9241_vm3, %v12829_v42, %v12830_v44  ;;  %v12649_v42 = vunpack.i.l.bf16 %v15493_v47  ;;  %v12655_v47 = vunpack.i.h.bf16 %v15495_v49 }
 0x417   : > { %16895 = vst [vmem:[#allocation16_spill] sm:$0xff] %v15883_v57  ;;  %v15885_v1 = vpack.c.bf16 %v12835_v56, %v12830_v44  ;;  %v15888_v45 = vsel %vm9241_vm3, %v12834_v15, %v12835_v56  ;;  %10150 = vmatmul.mubr.msk.f32.gmra.mrb[36].mxu0 %vm3454_vm10, %v10134_v27  ;;  %v10136_v44 = vld [vmem:[%s16845_s4 + $0x260] sm:$0xff]  ;;  %v12659_v56 = vunpack.i.l.bf16 %v15510_v20  ;;  %v10139_v15 = vld [vmem:[%s16845_s4 + $0x278] sm:$0xff]  ;;  %v12715_v57 = vunpack.i.h.bf16 %v15605_v5 }
 0x418   : > { %16896 = vst [vmem:[#allocation17_spill] sm:$0xff] %v15888_v45  ;;  %10436 = vmatmul.mubr.msk.f32.gmra.mrb[32].mxu1 %vm3454_vm10, %v10132_v8  ;;  %5001 = vmatprep.mubr.f32.mxu0 %v16887_v62  ;;  %v10137_v8 = vld [vmem:[%s16845_s4 + $0x268] sm:$0xff]  ;;  %v12714_v45 = vunpack.i.l.bf16 %v15605_v5  ;;  %v12704_v5 = vunpack.i.l.bf16 %v15586_v32 }
 0x419   : > { %8176 = vmatprep.mubr.f32.mxu1 %v16887_v62 }
 0x41b   : > { %10151 = vmatmul.mubr.msk.f32.gmra.mrb[38].mxu0 %vm3454_vm10, %v10135_v4 }
 0x41c   : > { %10437 = vmatmul.mubr.msk.f32.gmra.mrb[34].mxu1 %vm3454_vm10, %v10133_v29  ;;  %5007 = vmatprep.mubr.f32.mxu0 %v16887_v62  ;;  %v10138_v29 = vld [vmem:[%s16845_s4 + $0x270] sm:$0xff] }
 0x41d   : > { %8182 = vmatprep.mubr.f32.mxu1 %v16887_v62 }
 0x41f   : > { %10152 = vmatmul.mubr.msk.f32.gmra.mrb[40].mxu0 %vm3454_vm10, %v10136_v44 }
 0x420   : > { %10438 = vmatmul.mubr.msk.f32.gmra.mrb[36].mxu1 %vm3454_vm10, %v10134_v27  ;;  %5013 = vmatprep.mubr.f32.mxu0 %v16887_v62  ;;  %v12660_v27 = vunpack.i.h.bf16 %v15510_v20  ;;  %v12665_v20 = vunpack.i.h.bf16 %v15512_v38 }
 0x421   : > { %8188 = vmatprep.mubr.f32.mxu1 %v16887_v62 }
 0x422   : > { %v5474_v49 = vsel %vm2284_vm6, %v12659_v56, %v12660_v27 }
 0x423   : > { %10153 = vmatmul.mubr.msk.f32.gmra.mrb[42].mxu0 %vm3454_vm10, %v10137_v8 }
 0x424   : > { %10439 = vmatmul.mubr.msk.f32.gmra.mrb[38].mxu1 %vm3454_vm10, %v10135_v4  ;;  %5019 = vmatprep.mubr.f32.mxu0 %v16887_v62  ;;  %v16897_v4 = vunpack.i.l.bf16 %v15473_v11  ;;  %v12679_v11 = vunpack.i.l.bf16 %v15558_v53  ;;  %v5472_v53 = vsel %vm2284_vm6, %v12654_v3, %v12655_v47  ;;  %v12709_v47 = vunpack.i.l.bf16 %v15607_v63 }
 0x425   : > { %8194 = vmatprep.mubr.f32.mxu1 %v16887_v62  ;;  %v10763_v27 = vpack.c.bf16 %v5474_v49, %v5472_v53  ;;  %v12745_v49 = vunpack.i.h.bf16 %v15701_v22 }
 0x426   : > { %v5467_v28 = vsel %vm2284_vm6, %v12649_v42, %v16897_v4  ;;  %v12685_v42 = vunpack.i.h.bf16 %v15562_v17  ;;  %v12684_v4 = vunpack.i.l.bf16 %v15562_v17  ;;  %v5471_v17 = vsel %vm2284_vm6, %v12664_v6, %v12654_v3  ;;  %v10157_v6 = vld [vmem:[%s16845_s4 + $0x288] sm:$0xff] }
 0x427   : > { %10154 = vmatmul.mubr.msk.f32.gmra.mrb[44].mxu0 %vm3454_vm10, %v10138_v29 }
 0x428   : > { %10440 = vmatmul.mubr.msk.f32.gmra.mrb[40].mxu1 %vm3454_vm10, %v10136_v44  ;;  %5025 = vmatprep.mubr.f32.mxu0 %v16887_v62  ;;  %v16898_v44 = vunpack.i.l.bf16 %v15478_v30  ;;  %v10156_v30 = vld [vmem:[%s16845_s4 + $0x280] sm:$0xff] }
 0x429   : > { %8200 = vmatprep.mubr.f32.mxu1 %v16887_v62 }
 0x42a   : > { %v5469_v39 = vsel %vm2284_vm6, %v12650_v13, %v16898_v44  ;;  %v5473_v13 = vsel %vm2284_vm6, %v12665_v20, %v12659_v56  ;;  %v12689_v44 = vunpack.i.l.bf16 %v15577_v37  ;;  %v5477_v56 = vsel %vm2284_vm6, %v12690_v52, %v12684_v4  ;;  %v10158_v52 = vld [vmem:[%s16845_s4 + $0x290] sm:$0xff] }
 0x42b   : > { %10155 = vmatmul.mubr.msk.f32.gmra.mrb[46].mxu0 %vm3454_vm10, %v10139_v15  ;;  %v10761_v38 = vpack.c.bf16 %v5469_v39, %v5467_v28  ;;  %v5478_v39 = vsel %vm2284_vm6, %v12684_v4, %v12685_v42  ;;  %v10765_v3 = vpack.c.bf16 %v5473_v13, %v5471_v17  ;;  %v5482_v20 = vsel %vm2284_vm6, %v12714_v45, %v12715_v57 }
 0x42c   : > { %10441 = vmatmul.mubr.msk.f32.gmra.mrb[42].mxu1 %vm3454_vm10, %v10137_v8  ;;  %5273 = vmatprep.mubr.f32.mxu0 %v16887_v62  ;;  %v5476_v8 = vsel %vm2284_vm6, %v12679_v11, %v12680_v2  ;;  %v5475_v37 = vsel %vm2284_vm6, %v12689_v44, %v12679_v11  ;;  %v12705_v2 = vunpack.i.h.bf16 %v15586_v32  ;;  %v12740_v42 = vunpack.i.h.bf16 %v15677_v31 }
 0x42d   : > { %8206 = vmatprep.mubr.f32.mxu1 %v16887_v62  ;;  %v10767_v28 = vpack.c.bf16 %v5478_v39, %v5476_v8  ;;  %v12739_v11 = vunpack.i.l.bf16 %v15677_v31  ;;  %v12744_v32 = vunpack.i.l.bf16 %v15701_v22  ;;  %v16899_v17 = vpack.c.bf16 %v15289_v33, %v15273_v55  ;;  %v10161_v33 = vld [vmem:[%s16845_s4 + $0x2a8] sm:$0xff]  ;;  %v10188_v22 = vld [vmem:[%s16845_s4 + $0x300] sm:$0xff] }
 0x42e   : > { %v5480_v57 = vsel %vm2284_vm6, %v12704_v5, %v12705_v2  ;;  %v16900_v55 = vpack.c.bf16 %v15382_v41, %v15379_v48  ;;  %v16901_v48 = vld [vmem:[#allocation3_spill] sm:$0xff]  ;;  %v16906_v39 = vld [vmem:[#allocation8_spill] sm:$0xff]  ;;  %v12779_v31 = vunpack.i.l.bf16 %v15801_v35 }
 0x42f   : > { %10172 = vmatmul.mubr.msk.f32.vlgmr.msra.gmra.mrb[16].mxu0 %vm3454_vm10, %v10156_v30  ;;  %v10771_v13 = vpack.c.bf16 %v5482_v20, %v5480_v57  ;;  %v5806_v53 = vsel %vm2612_vm7, %v12739_v11, %v12740_v42  ;;  %v16902_v41 = vpack.c.bf16 %v15439_v60, %v16901_v48  ;;  %v10162_v60 = vld [vmem:[%s16845_s4 + $0x2b0] sm:$0xff]  ;;  %v16909_v2 = vld [vmem:[#allocation4_spill] sm:$0xff]  ;;  %v10167_v20 = vld [vmem:[%s16845_s4 + $0x2d8] sm:$0xff]  ;;  %v12750_v57 = vunpack.i.h.bf16 %v15721_v23 }
 0x430   : > { %10762 = vmatpush1.bf16.msra.mxu0 %v10761_v38  ;;  %10442 = vmatmul.mubr.msk.f32.gmra.mrb[44].mxu1 %vm3454_vm10, %v10138_v29  ;;  %v12710_v29 = vunpack.i.h.bf16 %v15607_v63  ;;  %v10769_v63 = vpack.c.bf16 %v5477_v56, %v5475_v37  ;;  %v5479_v38 = vsel %vm2284_vm6, %v12709_v47, %v12704_v5  ;;  %v16908_v37 = vld [vmem:[#allocation6_spill] sm:$0xff]  ;;  %v10164_v56 = vld [vmem:[%s16845_s4 + $0x2c0] sm:$0xff]  ;;  %v10166_v47 = vld [vmem:[%s16845_s4 + $0x2d0] sm:$0xff]  ;;  %v12790_v48 = vunpack.i.h.bf16 %v15816_v40 }
 0x431   : > { %10764 = vmatprep.subr.bf16.mxu0 %v10763_v27  ;;  %5279 = vmatprep.mubr.f32.mxu0 %v16887_v62  ;;  %v10160_v27 = vld [vmem:[%s16845_s4 + $0x2a0] sm:$0xff]  ;;  %v16910_v5 = vpack.c.bf16 %v16908_v37, %v16909_v2 }
 0x432   : > { %8212 = vmatprep.mubr.f32.mxu1 %v16887_v62  ;;  %v5481_v4 = vsel %vm2284_vm6, %v12710_v29, %v12714_v45  ;;  %v5808_v45 = vsel %vm2612_vm7, %v12744_v32, %v12745_v49  ;;  %v10165_v29 = vld [vmem:[%s16845_s4 + $0x2c8] sm:$0xff]  ;;  %v10168_v42 = vld [vmem:[%s16845_s4 + $0x2e0] sm:$0xff]  ;;  %vm9718_vm6 = vcmask 457728  }
 0x433   : > { %10173 = vmatmul.mubr.msk.f32.gmra.mrb[18].mxu0 %vm3454_vm10, %v10157_v6  ;;  %v10773_v44 = vpack.c.bf16 %v5481_v4, %v5479_v38  ;;  %v10169_v49 = vld [vmem:[%s16845_s4 + $0x2e8] sm:$0xff]  ;;  %v12760_v4 = vunpack.i.h.bf16 %v15750_v9  ;;  %v12759_v38 = vunpack.i.l.bf16 %v15750_v9  ;;  %v12765_v9 = vunpack.i.h.bf16 %v15754_v50 }
 0x434   : > { %10766 = vmatpush1.bf16.msra.mxu0 %v10765_v3  ;;  %10443 = vmatmul.mubr.msk.f32.gmra.mrb[46].mxu1 %vm3454_vm10, %v10139_v15  ;;  %v10159_v15 = vld [vmem:[%s16845_s4 + $0x298] sm:$0xff] }
 0x435   : > { %10768 = vmatprep.subr.bf16.mxu0 %v10767_v28  ;;  %5285 = vmatprep.mubr.f32.mxu0 %v16887_v62  ;;  %v10163_v28 = vld [vmem:[%s16845_s4 + $0x2b8] sm:$0xff] }
 0x436   : > { %8436 = vmatprep.mubr.f32.mxu1 %v16887_v62 }
 0x437   : > { %10174 = vmatmul.mubr.msk.f32.gmra.mrb[20].mxu0 %vm3454_vm10, %v10158_v52 }
 0x438   : > { %10770 = vmatpush1.bf16.msra.mxu0 %v10769_v63  ;;  %10460 = vmatmul.mubr.msk.f32.vlgmr.msra.gmra.mrb[16].mxu1 %vm3454_vm10, %v10156_v30  ;;  %v10775_v30 = vpack.c.bf16 %v5808_v45, %v5806_v53  ;;  %v12749_v63 = vunpack.i.l.bf16 %v15721_v23  ;;  %v12755_v23 = vunpack.i.h.bf16 %v15730_v14  ;;  %v12754_v53 = vunpack.i.l.bf16 %v15730_v14 }
 0x439   : > { %10906 = vmatpush1.bf16.msra.mxu1 %v16899_v17  ;;  %10772 = vmatprep.subr.bf16.mxu0 %v10771_v13  ;;  %v10171_v13 = vld [vmem:[%s16845_s4 + $0x2f8] sm:$0xff]  ;;  %v5807_v45 = vsel %vm2612_vm7, %v12750_v57, %v12744_v32  ;;  %v12764_v17 = vunpack.i.l.bf16 %v15754_v50  ;;  %v5812_v14 = vsel %vm2612_vm7, %v12759_v38, %v12760_v4  ;;  %v5811_v32 = vsel %vm2612_vm7, %v12765_v9, %v12759_v38 }
 0x43a   : > { %10908 = vmatprep.subr.bf16.mxu1 %v15384_v25  ;;  %5291 = vmatprep.mubr.f32.mxu0 %v16887_v62  ;;  %v16903_v25 = vld [vmem:[#allocation5_spill] sm:$0xff]  ;;  %v10191_v4 = vld [vmem:[%s16845_s4 + $0x318] sm:$0xff] }
 0x43b   : > { %8442 = vmatprep.mubr.f32.mxu1 %v16887_v62  ;;  %10175 = vmatmul.mubr.msk.f32.gmra.mrb[22].mxu0 %vm3454_vm10, %v10159_v15 }
 0x43c   : > { %10774 = vmatpush1.bf16.msra.mxu0 %v10773_v44  ;;  %10461 = vmatmul.mubr.msk.f32.gmra.mrb[18].mxu1 %vm3454_vm10, %v10157_v6  ;;  %v16907_v6 = vunpack.i.h.bf16 %v16906_v39  ;;  %v12780_v44 = vunpack.i.h.bf16 %v15801_v35  ;;  %v5810_v35 = vsel %vm2612_vm7, %v12754_v53, %v12755_v23  ;;  %v16912_v23 = vld [vmem:[#allocation9_spill] sm:$0xff] }
 0x43d   : > { %10910 = vmatpush1.bf16.msra.mxu1 %v16900_v55  ;;  %10776 = vmatprep.subr.bf16.mxu0 %v10775_v30  ;;  %v12784_v30 = vunpack.i.l.bf16 %v15808_v36  ;;  %v10779_v55 = vpack.c.bf16 %v5812_v14, %v5810_v35  ;;  %v10193_v14 = vld [vmem:[%s16845_s4 + $0x328] sm:$0xff] }
 0x43e   : > { %10912 = vmatprep.subr.bf16.mxu1 %v15436_v21  ;;  %5297 = vmatprep.mubr.f32.mxu0 %v16887_v62  ;;  %v16904_v21 = vld [vmem:[#allocation7_spill] sm:$0xff] }
 0x43f   : > { %8448 = vmatprep.mubr.f32.mxu1 %v16887_v62  ;;  %10176 = vmatmul.mubr.msk.f32.gmra.mrb[24].mxu0 %vm3454_vm10, %v10160_v27  ;;  %v16905_v8 = vunpack.i.h.bf16 %v16904_v21  ;;  %v5815_v2 = vsel %vm2612_vm7, %v12790_v48, %v12784_v30  ;;  %v10199_v48 = vld [vmem:[%s16845_s4 + $0x358] sm:$0xff] }
 0x440   : > { %10462 = vmatmul.mubr.msk.f32.gmra.mrb[20].mxu1 %vm3454_vm10, %v10158_v52  ;;  %5303 = vmatprep.mubr.f32.mxu0 %v16887_v62  ;;  %v10170_v52 = vld [vmem:[%s16845_s4 + $0x2f0] sm:$0xff] }
 0x441   : > { %10914 = vmatpush1.bf16.msra.mxu1 %v16902_v41  ;;  %8454 = vmatprep.mubr.f32.mxu1 %v16887_v62  ;;  %v10919_v3 = vpack.c.bf16 %v16907_v6, %v16905_v8  ;;  %v12815_v41 = vunpack.i.h.bf16 %v15848_v0  ;;  %v10189_v8 = vld [vmem:[%s16845_s4 + $0x308] sm:$0xff]  ;;  %v16146_v6 = vpop.permute.xlu1 %12837 }
 0x442   : > { %10916 = vmatprep.subr.bf16.mxu1 %v16903_v25  ;;  %v12814_v25 = vunpack.i.l.bf16 %v15848_v0  ;;  %v12805_v0 = vunpack.i.h.bf16 %v15830_v18 }
 0x443   : > { %10177 = vmatmul.mubr.msk.f32.gmra.mrb[26].mxu0 %vm3454_vm10, %v10161_v33 }
 0x444   : > { %10463 = vmatmul.mubr.msk.f32.gmra.mrb[22].mxu1 %vm3454_vm10, %v10159_v15  ;;  %5309 = vmatprep.mubr.f32.mxu0 %v16887_v62  ;;  %v5805_v15 = vsel %vm2612_vm7, %v12749_v63, %v12739_v11  ;;  %v12785_v11 = vunpack.i.h.bf16 %v15808_v36  ;;  %v5809_v36 = vsel %vm2612_vm7, %v12764_v17, %v12754_v53 }
 0x445   : > { %10918 = vmatpush1.bf16.msra.mxu1 %v16910_v5  ;;  %8460 = vmatprep.mubr.f32.mxu1 %v16887_v62  ;;  %v10777_v50 = vpack.c.bf16 %v5807_v45, %v5805_v15  ;;  %v10781_v39 = vpack.c.bf16 %v5811_v32, %v5809_v36  ;;  %v12810_v5 = vunpack.i.h.bf16 %v15851_v7  ;;  %v16911_v15 = vld [vmem:[#allocation10_spill] sm:$0xff]  ;;  %v16914_v45 = vld [vmem:[#allocation13_spill] sm:$0xff]  ;;  %v16921_v32 = vunpack.i.h.bf16 %v15780_v54  ;;  %v16922_v36 = vld [vmem:[#allocation15_spill] sm:$0xff] }
 0x446   : > { %10920 = vmatprep.subr.bf16.mxu1 %v10919_v3  ;;  %v5816_v21 = vsel %vm2612_vm7, %v12784_v30, %v12785_v11  ;;  %v16148_v3 = vpop.permute.xlu0 %12842  ;;  %v16913_v53 = vpack.c.bf16 %v16911_v15, %v16912_v23  ;;  %v16916_v11 = vld [vmem:[#allocation11_spill] sm:$0xff]  ;;  %v10198_v54 = vld [vmem:[%s16845_s4 + $0x350] sm:$0xff] }
 0x447   : > { %10178 = vmatmul.mubr.msk.f32.gmra.mrb[28].mxu0 %vm3454_vm10, %v10162_v60 }
 0x448   : > { %10464 = vmatmul.mubr.msk.f32.gmra.mrb[24].mxu1 %vm3454_vm10, %v10160_v27  ;;  %5315 = vmatprep.mubr.f32.mxu0 %v16887_v62  ;;  %v12789_v27 = vunpack.i.l.bf16 %v15816_v40 }
 0x449   : > { %8466 = vmatprep.mubr.f32.mxu1 %v16887_v62 }
 0x44a   : > { %v5813_v40 = vsel %vm2612_vm7, %v12789_v27, %v12779_v31  ;;  %v16923_v27 = vpack.c.bf16 %v15686_v59, %v16922_v36  ;;  %v10196_v59 = vld [vmem:[%s16845_s4 + $0x340] sm:$0xff] }
 0x44b   : > { %10179 = vmatmul.mubr.msk.f32.gmra.mrb[30].mxu0 %vm3454_vm10, %v10163_v28 }
 0x44c   : > { %10465 = vmatmul.mubr.msk.f32.gmra.mrb[26].mxu1 %vm3454_vm10, %v10161_v33  ;;  %5321 = vmatprep.mubr.f32.mxu0 %v16887_v62  ;;  %v5814_v33 = vsel %vm2612_vm7, %v12779_v31, %v12780_v44  ;;  %v10192_v44 = vld [vmem:[%s16845_s4 + $0x320] sm:$0xff]  ;;  %v16915_v31 = vld [vmem:[#allocation12_spill] sm:$0xff] }
 0x44d   : > { %8472 = vmatprep.mubr.f32.mxu1 %v16887_v62  ;;  %v10783_v37 = vpack.c.bf16 %v5816_v21, %v5814_v33  ;;  %v16917_v30 = vpack.c.bf16 %v16915_v31, %v16916_v11  ;;  %v12853_v33 = vpop.permute.xlu0 %12852 }
 0x44f   : > { %10180 = vmatmul.mubr.msk.f32.gmra.mrb[32].mxu0 %vm3454_vm10, %v10164_v56 }
 0x450   : > { %10466 = vmatmul.mubr.msk.f32.gmra.mrb[28].mxu1 %vm3454_vm10, %v10162_v60  ;;  %5327 = vmatprep.mubr.f32.mxu0 %v16887_v62  ;;  %v12804_v60 = vunpack.i.l.bf16 %v15830_v18  ;;  %v12844_v18 = vunpack.i.l.bf16 %v16148_v3 }
 0x451   : > { %8478 = vmatprep.mubr.f32.mxu1 %v16887_v62  ;;  %v12863_v21 = vpop.permute.xlu0 %12862 }
 0x453   : > { %10181 = vmatmul.mubr.msk.f32.gmra.mrb[34].mxu0 %vm3454_vm10, %v10165_v29 }
 0x454   : > { %10467 = vmatmul.mubr.msk.f32.gmra.mrb[30].mxu1 %vm3454_vm10, %v10163_v28  ;;  %5333 = vmatprep.mubr.f32.mxu0 %v16887_v62  ;;  %v12809_v28 = vunpack.i.l.bf16 %v15851_v7  ;;  %v10785_v7 = vpack.c.bf16 %v5815_v2, %v5813_v40 }
 0x455   : > { %8484 = vmatprep.mubr.f32.mxu1 %v16887_v62  ;;  %v12873_v40 = vpop.permute.xlu0 %12872 }
 0x456   : > { %v5817_v63 = vsel %vm2612_vm7, %v12809_v28, %v12804_v60  ;;  %v12874_v15 = vunpack.i.l.bf16 %v12873_v40 }
 0x457   : > { %10182 = vmatmul.mubr.msk.f32.gmra.mrb[36].mxu0 %vm3454_vm10, %v10166_v47 }
 0x458   : > { %10468 = vmatmul.mubr.msk.f32.gmra.mrb[32].mxu1 %vm3454_vm10, %v10164_v56  ;;  %5339 = vmatprep.mubr.f32.mxu0 %v16887_v62  ;;  %v5820_v56 = vsel %vm2612_vm7, %v12814_v25, %v12815_v41 }
 0x459   : > { %8490 = vmatprep.mubr.f32.mxu1 %v16887_v62 }
 0x45b   : > { %10183 = vmatmul.mubr.msk.f32.gmra.mrb[38].mxu0 %vm3454_vm10, %v10167_v20 }
 0x45c   : > { %10469 = vmatmul.mubr.msk.f32.gmra.mrb[34].mxu1 %vm3454_vm10, %v10165_v29  ;;  %5345 = vmatprep.mubr.f32.mxu0 %v16887_v62  ;;  %v12840_v29 = vunpack.i.h.bf16 %v16146_v6 }
 0x45d   : > { %8496 = vmatprep.mubr.f32.mxu1 %v16887_v62 }
 0x45f   : > { %10184 = vmatmul.mubr.msk.f32.gmra.mrb[40].mxu0 %vm3454_vm10, %v10168_v42 }
 0x460   : > { %10470 = vmatmul.mubr.msk.f32.gmra.mrb[36].mxu1 %vm3454_vm10, %v10166_v47  ;;  %5351 = vmatprep.mubr.f32.mxu0 %v16887_v62  ;;  %v12839_v47 = vunpack.i.l.bf16 %v16146_v6  ;;  %v10220_v6 = vld [vmem:[%s16845_s4 + $0x380] sm:$0xff] }
 0x461   : > { %8502 = vmatprep.mubr.f32.mxu1 %v16887_v62 }
 0x462   : > { %v6144_v38 = vsel %vm2940_vm8, %v12839_v47, %v12840_v29 }
 0x463   : > { %10185 = vmatmul.mubr.msk.f32.gmra.mrb[42].mxu0 %vm3454_vm10, %v10169_v49 }
 0x464   : > { %10471 = vmatmul.mubr.msk.f32.gmra.mrb[38].mxu1 %vm3454_vm10, %v10167_v20  ;;  %5357 = vmatprep.mubr.f32.mxu0 %v16887_v62  ;;  %v12845_v20 = vunpack.i.h.bf16 %v16148_v3 }
 0x465   : > { %8508 = vmatprep.mubr.f32.mxu1 %v16887_v62 }
 0x467   : > { %10186 = vmatmul.mubr.msk.f32.gmra.mrb[44].mxu0 %vm3454_vm10, %v10170_v52 }
 0x468   : > { %10472 = vmatmul.mubr.msk.f32.gmra.mrb[40].mxu1 %vm3454_vm10, %v10168_v42  ;;  %5363 = vmatprep.mubr.f32.mxu0 %v16887_v62  ;;  %v10190_v42 = vld [vmem:[%s16845_s4 + $0x310] sm:$0xff] }
 0x469   : > { %8514 = vmatprep.mubr.f32.mxu1 %v16887_v62 }
 0x46b   : > { %10187 = vmatmul.mubr.msk.f32.gmra.mrb[46].mxu0 %vm3454_vm10, %v10171_v13 }
 0x46c   : > { %10473 = vmatmul.mubr.msk.f32.gmra.mrb[42].mxu1 %vm3454_vm10, %v10169_v49  ;;  %5611 = vmatprep.mubr.f32.mxu0 %v16887_v62  ;;  %v5818_v49 = vsel %vm2612_vm7, %v12804_v60, %v12805_v0  ;;  %v10202_v0 = vld [vmem:[%s16845_s4 + $0x370] sm:$0xff] }
 0x46d   : > { %8520 = vmatprep.mubr.f32.mxu1 %v16887_v62  ;;  %v10787_v57 = vpack.c.bf16 %v5820_v56, %v5818_v49  ;;  %v10203_v56 = vld [vmem:[%s16845_s4 + $0x378] sm:$0xff]  ;;  %v12865_v49 = vunpack.i.h.bf16 %v12863_v21 }
 0x46f   : > { %10204 = vmatmul.mubr.msk.f32.vlgmr.msra.gmra.mrb[16].mxu0 %vm3454_vm10, %v10188_v22 }
 0x470   : > { %10778 = vmatpush1.bf16.msra.mxu0 %v10777_v50  ;;  %10474 = vmatmul.mubr.msk.f32.gmra.mrb[44].mxu1 %vm3454_vm10, %v10170_v52  ;;  %v5819_v52 = vsel %vm2612_vm7, %v12810_v5, %v12814_v25  ;;  %v10200_v25 = vld [vmem:[%s16845_s4 + $0x360] sm:$0xff] }
 0x471   : > { %10780 = vmatprep.subr.bf16.mxu0 %v10779_v55  ;;  %5617 = vmatprep.mubr.f32.mxu0 %v16887_v62  ;;  %v10789_v9 = vpack.c.bf16 %v5819_v52, %v5817_v63  ;;  %v12848_v55 = vpop.permute.xlu1 %12847  ;;  %v12864_v52 = vunpack.i.l.bf16 %v12863_v21  ;;  %v12883_v63 = vpop.permute.xlu0 %12882  ;;  %v16924_v21 = vpack.c.bf16 %v15797_v46, %v15790_v34  ;;  %v16925_v34 = vpack.c.bf16 %v15841_v51, %v15838_v19  ;;  %v10225_v46 = vld [vmem:[%s16845_s4 + $0x3a8] sm:$0xff]  ;;  %v10226_v51 = vld [vmem:[%s16845_s4 + $0x3b0] sm:$0xff] }
 0x472   : > { %8526 = vmatprep.mubr.f32.mxu1 %v16887_v62  ;;  %v12849_v60 = vunpack.i.l.bf16 %v12848_v55  ;;  %v16926_v19 = vpack.c.bf16 %v15871_v16, %v15866_v61  ;;  %v10227_v61 = vld [vmem:[%s16845_s4 + $0x3b8] sm:$0xff]  ;;  %v10228_v16 = vld [vmem:[%s16845_s4 + $0x3c0] sm:$0xff] }
 0x473   : > { %10205 = vmatmul.mubr.msk.f32.gmra.mrb[18].mxu0 %vm3454_vm10, %v10189_v8 }
 0x474   : > { %10782 = vmatpush1.bf16.msra.mxu0 %v10781_v39  ;;  %10475 = vmatmul.mubr.msk.f32.gmra.mrb[46].mxu1 %vm3454_vm10, %v10171_v13  ;;  %v6146_v13 = vsel %vm2940_vm8, %v12844_v18, %v12845_v20  ;;  %v6143_v29 = vsel %vm2940_vm8, %v12849_v60, %v12839_v47  ;;  %v12855_v20 = vunpack.i.h.bf16 %v12853_v33  ;;  %v10231_v60 = vld [vmem:[%s16845_s4 + $0x3d8] sm:$0xff] }
 0x475   : > { %10784 = vmatprep.subr.bf16.mxu0 %v10783_v37  ;;  %5623 = vmatprep.mubr.f32.mxu0 %v16887_v62  ;;  %v10791_v17 = vpack.c.bf16 %v6146_v13, %v6144_v38  ;;  %v12858_v41 = vpop.permute.xlu1 %12857  ;;  %v12850_v37 = vunpack.i.h.bf16 %v12848_v55  ;;  %v12875_v13 = vunpack.i.h.bf16 %v12873_v40 }
 0x476   : > { %8750 = vmatprep.mubr.f32.mxu1 %v16887_v62  ;;  %v12860_v2 = vunpack.i.h.bf16 %v12858_v41  ;;  %v12859_v5 = vunpack.i.l.bf16 %v12858_v41 }
 0x477   : > { %10206 = vmatmul.mubr.msk.f32.gmra.mrb[20].mxu0 %vm3454_vm10, %v10190_v42  ;;  %v6154_v31 = vsel %vm2940_vm8, %v12874_v15, %v12875_v13  ;;  %v10263_v13 = vld [vmem:[%s16845_s4 + $0x458] sm:$0xff] }
 0x478   : > { %10786 = vmatpush1.bf16.msra.mxu0 %v10785_v7  ;;  %10492 = vmatmul.mubr.msk.f32.vlgmr.msra.gmra.mrb[16].mxu1 %vm3454_vm10, %v10188_v22  ;;  %v16918_v22 = vld [vmem:[#allocation14_spill] sm:$0xff]  ;;  %v6145_v7 = vsel %vm2940_vm8, %v12850_v37, %v12844_v18  ;;  %v6149_v23 = vsel %vm2940_vm8, %v12865_v49, %v12859_v5  ;;  %v10232_v37 = vld [vmem:[%s16845_s4 + $0x3e0] sm:$0xff]  ;;  %v10257_v49 = vld [vmem:[%s16845_s4 + $0x428] sm:$0xff] }
 0x479   : > { %10922 = vmatpush1.bf16.msra.mxu1 %v16913_v53  ;;  %10788 = vmatprep.subr.bf16.mxu0 %v10787_v57  ;;  %v16919_v50 = vpack.c.bf16 %v15654_v12, %v16918_v22  ;;  %v10194_v12 = vld [vmem:[%s16845_s4 + $0x330] sm:$0xff]  ;;  %v12868_v39 = vpop.permute.xlu1 %12867  ;;  %v6150_v57 = vsel %vm2940_vm8, %v12859_v5, %v12860_v2  ;;  %v10793_v18 = vpack.c.bf16 %v6145_v7, %v6143_v29  ;;  %v10221_v22 = vld [vmem:[%s16845_s4 + $0x388] sm:$0xff]  ;;  %v10256_v7 = vld [vmem:[%s16845_s4 + $0x420] sm:$0xff] }
 0x47a   : > { %10924 = vmatprep.subr.bf16.mxu1 %v16914_v45  ;;  %5629 = vmatprep.mubr.f32.mxu0 %v16887_v62  ;;  %v12869_v38 = vunpack.i.l.bf16 %v12868_v39  ;;  %v10233_v2 = vld [vmem:[%s16845_s4 + $0x3e8] sm:$0xff]  ;;  %v10234_v5 = vld [vmem:[%s16845_s4 + $0x3f0] sm:$0xff] }
 0x47b   : > { %8756 = vmatprep.mubr.f32.mxu1 %v16887_v62  ;;  %10207 = vmatmul.mubr.msk.f32.gmra.mrb[22].mxu0 %vm3454_vm10, %v10191_v4  ;;  %v10253_v29 = vld [vmem:[%s16845_s4 + $0x408] sm:$0xff] }
 0x47c   : > { %10790 = vmatpush1.bf16.msra.mxu0 %v10789_v9  ;;  %10493 = vmatmul.mubr.msk.f32.gmra.mrb[18].mxu1 %vm3454_vm10, %v10189_v8  ;;  %v10201_v8 = vld [vmem:[%s16845_s4 + $0x368] sm:$0xff] }
 0x47d   : > { %10926 = vmatpush1.bf16.msra.mxu1 %v16917_v30  ;;  %10792 = vmatprep.subr.bf16.mxu0 %v10791_v17  ;;  %v12878_v28 = vpop.permute.xlu1 %12877 }
 0x47e   : > { %10928 = vmatprep.subr.bf16.mxu1 %v15651_v43  ;;  %5635 = vmatprep.mubr.f32.mxu0 %v16887_v62  ;;  %v16920_v43 = vunpack.i.h.bf16 %v15772_v58  ;;  %v10197_v58 = vld [vmem:[%s16845_s4 + $0x348] sm:$0xff]  ;;  %v12880_v45 = vunpack.i.h.bf16 %v12878_v28  ;;  %v12879_v17 = vunpack.i.l.bf16 %v12878_v28  ;;  %v10235_v28 = vld [vmem:[%s16845_s4 + $0x3f8] sm:$0xff] }
 0x47f   : > { %8762 = vmatprep.mubr.f32.mxu1 %v16887_v62  ;;  %10208 = vmatmul.mubr.msk.f32.gmra.mrb[24].mxu0 %vm3454_vm10, %v10192_v44 }
 0x480   : > { %10494 = vmatmul.mubr.msk.f32.gmra.mrb[20].mxu1 %vm3454_vm10, %v10190_v42  ;;  %5641 = vmatprep.mubr.f32.mxu0 %v16887_v62  ;;  %v10935_v35 = vpack.c.bf16 %v16921_v32, %v16920_v43  ;;  %v12854_v42 = vunpack.i.l.bf16 %v12853_v33  ;;  %v12885_v43 = vunpack.i.h.bf16 %v12883_v63  ;;  %v12884_v32 = vunpack.i.l.bf16 %v12883_v63  ;;  %v10259_v63 = vld [vmem:[%s16845_s4 + $0x438] sm:$0xff] }
 0x481   : > { %10930 = vmatpush1.bf16.msra.mxu1 %v16919_v50  ;;  %8768 = vmatprep.mubr.f32.mxu1 %v16887_v62  ;;  %v12888_v3 = vpop.permute.xlu1 %12887  ;;  %v6153_v36 = vsel %vm2940_vm8, %v12880_v45, %v12874_v15  ;;  %v10264_v15 = vld [vmem:[%s16845_s4 + $0x460] sm:$0xff] }
 0x482   : > { %10932 = vmatprep.subr.bf16.mxu1 %v15683_v10  ;;  %v10195_v10 = vld [vmem:[%s16845_s4 + $0x338] sm:$0xff]  ;;  %v6148_v47 = vsel %vm2940_vm8, %v12854_v42, %v12855_v20  ;;  %v6147_v53 = vsel %vm2940_vm8, %v12864_v52, %v12854_v42  ;;  %v12890_v11 = vunpack.i.h.bf16 %v12888_v3  ;;  %v12889_v30 = vunpack.i.l.bf16 %v12888_v3  ;;  %v10254_v20 = vld [vmem:[%s16845_s4 + $0x410] sm:$0xff] }
 0x483   : > { %10209 = vmatmul.mubr.msk.f32.gmra.mrb[26].mxu0 %vm3454_vm10, %v10193_v14  ;;  %v10795_v9 = vpack.c.bf16 %v6150_v57, %v6148_v47  ;;  %v10797_v50 = vpack.c.bf16 %v6149_v23, %v6147_v53  ;;  %v6156_v55 = vsel %vm2940_vm8, %v12884_v32, %v12885_v43  ;;  %v10255_v42 = vld [vmem:[%s16845_s4 + $0x418] sm:$0xff]  ;;  %v10258_v52 = vld [vmem:[%s16845_s4 + $0x430] sm:$0xff]  ;;  %v10260_v57 = vld [vmem:[%s16845_s4 + $0x440] sm:$0xff] }
 0x484   : > { %10495 = vmatmul.mubr.msk.f32.gmra.mrb[22].mxu1 %vm3454_vm10, %v10191_v4  ;;  %5647 = vmatprep.mubr.f32.mxu0 %v16887_v62  ;;  %v12870_v4 = vunpack.i.h.bf16 %v12868_v39  ;;  %v10224_v39 = vld [vmem:[%s16845_s4 + $0x3a0] sm:$0xff]  ;;  %v10266_v3 = vld [vmem:[%s16845_s4 + $0x470] sm:$0xff]  ;;  %v10267_v47 = vld [vmem:[%s16845_s4 + $0x478] sm:$0xff] }
 0x485   : > { %10934 = vmatpush1.bf16.msra.mxu1 %v16923_v27  ;;  %8774 = vmatprep.mubr.f32.mxu1 %v16887_v62 }
 0x486   : > { %10936 = vmatprep.subr.bf16.mxu1 %v10935_v35 }
 0x487   : > { %10210 = vmatmul.mubr.msk.f32.gmra.mrb[28].mxu0 %vm3454_vm10, %v10194_v12 }
 0x488   : > { %10496 = vmatmul.mubr.msk.f32.gmra.mrb[24].mxu1 %vm3454_vm10, %v10192_v44  ;;  %5653 = vmatprep.mubr.f32.mxu0 %v16887_v62  ;;  %v6152_v44 = vsel %vm2940_vm8, %v12869_v38, %v12870_v4  ;;  %v10261_v4 = vld [vmem:[%s16845_s4 + $0x448] sm:$0xff] }
 0x489   : > { %8780 = vmatprep.mubr.f32.mxu1 %v16887_v62  ;;  %v10799_v35 = vpack.c.bf16 %v6154_v31, %v6152_v44 }
 0x48b   : > { %10211 = vmatmul.mubr.msk.f32.gmra.mrb[30].mxu0 %vm3454_vm10, %v10195_v10 }
 0x48c   : > { %10497 = vmatmul.mubr.msk.f32.gmra.mrb[26].mxu1 %vm3454_vm10, %v10193_v14  ;;  %5659 = vmatprep.mubr.f32.mxu0 %v16887_v62  ;;  %v12893_v14 = vpop.permute.xlu0 %12892 }
 0x48d   : > { %8786 = vmatprep.mubr.f32.mxu1 %v16887_v62  ;;  %v12895_v27 = vunpack.i.h.bf16 %v12893_v14 }
 0x48f   : > { %10212 = vmatmul.mubr.msk.f32.gmra.mrb[32].mxu0 %vm3454_vm10, %v10196_v59  ;;  %v6157_v33 = vsel %vm2940_vm8, %v12895_v27, %v12889_v30 }
 0x490   : > { %10498 = vmatmul.mubr.msk.f32.gmra.mrb[28].mxu1 %vm3454_vm10, %v10194_v12  ;;  %5665 = vmatprep.mubr.f32.mxu0 %v16887_v62  ;;  %v6151_v12 = vsel %vm2940_vm8, %v12879_v17, %v12869_v38  ;;  %v10262_v38 = vld [vmem:[%s16845_s4 + $0x450] sm:$0xff]  ;;  %v16554_v23 = vpop.permute.xlu0 %3389 }
 0x491   : > { %8792 = vmatprep.mubr.f32.mxu1 %v16887_v62 }
 0x493   : > { %10213 = vmatmul.mubr.msk.f32.gmra.mrb[34].mxu0 %vm3454_vm10, %v10197_v58 }
 0x494   : > { %10499 = vmatmul.mubr.msk.f32.gmra.mrb[30].mxu1 %vm3454_vm10, %v10195_v10  ;;  %5671 = vmatprep.mubr.f32.mxu0 %v16887_v62  ;;  %v12894_v10 = vunpack.i.l.bf16 %v12893_v14 }
 0x495   : > { %8798 = vmatprep.mubr.f32.mxu1 %v16887_v62 }
 0x497   : > { %10214 = vmatmul.mubr.msk.f32.gmra.mrb[36].mxu0 %vm3454_vm10, %v10198_v54 }
 0x498   : > { %10500 = vmatmul.mubr.msk.f32.gmra.mrb[32].mxu1 %vm3454_vm10, %v10196_v59  ;;  %5677 = vmatprep.mubr.f32.mxu0 %v16887_v62  ;;  %v10222_v59 = vld [vmem:[%s16845_s4 + $0x390] sm:$0xff] }
 0x499   : > { %8804 = vmatprep.mubr.f32.mxu1 %v16887_v62 }
 0x49b   : > { %10215 = vmatmul.mubr.msk.f32.gmra.mrb[38].mxu0 %vm3454_vm10, %v10199_v48 }
 0x49c   : > { %10501 = vmatmul.mubr.msk.f32.gmra.mrb[34].mxu1 %vm3454_vm10, %v10197_v58  ;;  %5683 = vmatprep.mubr.f32.mxu0 %v16887_v62  ;;  %v6158_v58 = vsel %vm2940_vm8, %v12889_v30, %v12890_v11 }
 0x49d   : > { %8810 = vmatprep.mubr.f32.mxu1 %v16887_v62  ;;  %v10803_v41 = vpack.c.bf16 %v6158_v58, %v6156_v55 }
 0x49f   : > { %10216 = vmatmul.mubr.msk.f32.gmra.mrb[40].mxu0 %vm3454_vm10, %v10200_v25 }
 0x4a0   : > { %10502 = vmatmul.mubr.msk.f32.gmra.mrb[36].mxu1 %vm3454_vm10, %v10198_v54  ;;  %5689 = vmatprep.mubr.f32.mxu0 %v16887_v62  ;;  %v10801_v54 = vpack.c.bf16 %v6153_v36, %v6151_v12 }
 0x4a1   : > { %8816 = vmatprep.mubr.f32.mxu1 %v16887_v62 }
 0x4a3   : > { %10217 = vmatmul.mubr.msk.f32.gmra.mrb[42].mxu0 %vm3454_vm10, %v10201_v8 }
 0x4a4   : > { %10503 = vmatmul.mubr.msk.f32.gmra.mrb[38].mxu1 %vm3454_vm10, %v10199_v48  ;;  %5695 = vmatprep.mubr.f32.mxu0 %v16887_v62  ;;  %v6155_v48 = vsel %vm2940_vm8, %v12894_v10, %v12884_v32 }
 0x4a5   : > { %8822 = vmatprep.mubr.f32.mxu1 %v16887_v62 }
 0x4a7   : > { %10218 = vmatmul.mubr.msk.f32.gmra.mrb[44].mxu0 %vm3454_vm10, %v10202_v0 }
 0x4a8   : > { %10504 = vmatmul.mubr.msk.f32.gmra.mrb[40].mxu1 %vm3454_vm10, %v10200_v25  ;;  %5701 = vmatprep.mubr.f32.mxu0 %v16887_v62  ;;  %v10223_v25 = vld [vmem:[%s16845_s4 + $0x398] sm:$0xff] }
 0x4a9   : > { %8828 = vmatprep.mubr.f32.mxu1 %v16887_v62 }
 0x4ab   : > { %10219 = vmatmul.mubr.msk.f32.gmra.mrb[46].mxu0 %vm3454_vm10, %v10203_v56 }
 0x4ac   : > { %10505 = vmatmul.mubr.msk.f32.gmra.mrb[42].mxu1 %vm3454_vm10, %v10201_v8  ;;  %5949 = vmatprep.mubr.f32.mxu0 %v16887_v62  ;;  %v10805_v8 = vpack.c.bf16 %v6157_v33, %v6155_v48 }
 0x4ad   : > { %8834 = vmatprep.mubr.f32.mxu1 %v16887_v62 }
 0x4af   : > { %10236 = vmatmul.mubr.msk.f32.vlgmr.msra.gmra.mrb[16].mxu0 %vm3454_vm10, %v10220_v6 }
 0x4b0   : > { %10794 = vmatpush1.bf16.msra.mxu0 %v10793_v18  ;;  %10506 = vmatmul.mubr.msk.f32.gmra.mrb[44].mxu1 %vm3454_vm10, %v10202_v0  ;;  %v10230_v0 = vld [vmem:[%s16845_s4 + $0x3d0] sm:$0xff]  ;;  %v16552_v18 = vpop.permute.xlu1 %3384 }
 0x4b1   : > { %10796 = vmatprep.subr.bf16.mxu0 %v10795_v9  ;;  %5955 = vmatprep.mubr.f32.mxu0 %v16887_v62  ;;  %v16558_v9 = vpop.permute.xlu0 %3399 }
 0x4b2   : > { %8840 = vmatprep.mubr.f32.mxu1 %v16887_v62 }
 0x4b3   : > { %10237 = vmatmul.mubr.msk.f32.gmra.mrb[18].mxu0 %vm3454_vm10, %v10221_v22 }
 0x4b4   : > { %10798 = vmatpush1.bf16.msra.mxu0 %v10797_v50  ;;  %10507 = vmatmul.mubr.msk.f32.gmra.mrb[46].mxu1 %vm3454_vm10, %v10203_v56  ;;  %v10252_v56 = vld [vmem:[%s16845_s4 + $0x400] sm:$0xff]  ;;  %v16556_v53 = vpop.permute.xlu1 %3394 }
 0x4b5   : > { %10800 = vmatprep.subr.bf16.mxu0 %v10799_v35  ;;  %5961 = vmatprep.mubr.f32.mxu0 %v16887_v62  ;;  %v16562_v17 = vpop.permute.xlu0 %3409 }
 0x4b6   : > { %9064 = vmatprep.mubr.f32.mxu1 %v16887_v62 }
 0x4b7   : > { %10238 = vmatmul.mubr.msk.f32.gmra.mrb[20].mxu0 %vm3454_vm10, %v10222_v59 }
 0x4b8   : > { %10802 = vmatpush1.bf16.msra.mxu0 %v10801_v54  ;;  %10524 = vmatmul.mubr.msk.f32.vlgmr.msra.gmra.mrb[16].mxu1 %vm3454_vm10, %v10220_v6  ;;  %v10265_v6 = vld [vmem:[%s16845_s4 + $0x468] sm:$0xff]  ;;  %v16560_v45 = vpop.permute.xlu1 %3404 }
 0x4b9   : > { %10938 = vmatpush1.bf16.msra.mxu1 %v16924_v21  ;;  %10804 = vmatprep.subr.bf16.mxu0 %v10803_v41  ;;  %v16566_v14 = vpop.permute.xlu0 %3419 }
 0x4ba   : > { %10940 = vmatprep.subr.bf16.mxu1 %v15843_v26  ;;  %5967 = vmatprep.mubr.f32.mxu0 %v16887_v62  ;;  %v16927_v26 = vld [vmem:[#allocation17_spill] sm:$0xff] }
 0x4bb   : > { %9070 = vmatprep.mubr.f32.mxu1 %v16887_v62  ;;  %10239 = vmatmul.mubr.msk.f32.gmra.mrb[22].mxu0 %vm3454_vm10, %v10223_v25 }
 0x4bc   : > { %10806 = vmatpush1.bf16.msra.mxu0 %v10805_v8  ;;  %10525 = vmatmul.mubr.msk.f32.gmra.mrb[18].mxu1 %vm3454_vm10, %v10221_v22  ;;  %v16564_v11 = vpop.permute.xlu1 %3414 }
 0x4bd   : > { %10942 = vmatpush1.bf16.msra.mxu1 %v16925_v34  ;;  %5973 = vmatprep.mubr.f32.mxu0 %v16887_v62  ;;  %v3350_v36 = vpop.permute.xlu0 %3349 }
 0x4be   : > { %10944 = vmatprep.subr.bf16.mxu1 %v15868_v24  ;;  %9076 = vmatprep.mubr.f32.mxu1 %v16887_v62  ;;  %v16928_v24 = vld [vmem:[#allocation16_spill] sm:$0xff] }
 0x4bf   : > { %10240 = vmatmul.mubr.msk.f32.gmra.mrb[24].mxu0 %vm3454_vm10, %v10224_v39  ;;  %v16929_v40 = vpack.c.bf16 %v16927_v26, %v16928_v24 }
 0x4c0   : > { %10526 = vmatmul.mubr.msk.f32.gmra.mrb[20].mxu1 %vm3454_vm10, %v10222_v59  ;;  %5979 = vmatprep.mubr.f32.mxu0 %v16887_v62  ;;  %v3345_v22 = vpop.permute.xlu1 %3344 }
 0x4c1   : > { %10946 = vmatpush1.bf16.msra.mxu1 %v16926_v19  ;;  %9082 = vmatprep.mubr.f32.mxu1 %v16887_v62 }
 0x4c2   : > { %10948 = vmatprep.subr.bf16.mxu1 %v15885_v1  ;;  %v10229_v1 = vld [vmem:[%s16845_s4 + $0x3c8] sm:$0xff] }
 0x4c3   : > { %10241 = vmatmul.mubr.msk.f32.gmra.mrb[26].mxu0 %vm3454_vm10, %v10225_v46 }
 0x4c4   : > { %10527 = vmatmul.mubr.msk.f32.gmra.mrb[22].mxu1 %vm3454_vm10, %v10223_v25  ;;  %5985 = vmatprep.mubr.f32.mxu0 %v16887_v62  ;;  %v3355_v55 = vpop.permute.xlu1 %3354 }
 0x4c5   : > { %10950 = vmatpush1.bf16.msra.mxu1 %v16929_v40  ;;  %9088 = vmatprep.mubr.f32.mxu1 %v16887_v62 }
 0x4c7   : > { %10242 = vmatmul.mubr.msk.f32.gmra.mrb[28].mxu0 %vm3454_vm10, %v10226_v51 }
 0x4c8   : > { %10528 = vmatmul.mubr.msk.f32.gmra.mrb[24].mxu1 %vm3454_vm10, %v10224_v39  ;;  %5991 = vmatprep.mubr.f32.mxu0 %v16887_v62 }
 0x4c9   : > { %9094 = vmatprep.mubr.f32.mxu1 %v16887_v62 }
 0x4cb   : > { %10243 = vmatmul.mubr.msk.f32.gmra.mrb[30].mxu0 %vm3454_vm10, %v10227_v61 }
 0x4cc   : > { %10529 = vmatmul.mubr.msk.f32.gmra.mrb[26].mxu1 %vm3454_vm10, %v10225_v46  ;;  %5997 = vmatprep.mubr.f32.mxu0 %v16887_v62  ;;  %v3360_v46 = vpop.permute.xlu0 %3359 }
 0x4cd   : > { %9100 = vmatprep.mubr.f32.mxu1 %v16887_v62 }
 0x4cf   : > { %10244 = vmatmul.mubr.msk.f32.gmra.mrb[32].mxu0 %vm3454_vm10, %v10228_v16 }
 0x4d0   : > { %10530 = vmatmul.mubr.msk.f32.gmra.mrb[28].mxu1 %vm3454_vm10, %v10226_v51  ;;  %6003 = vmatprep.mubr.f32.mxu0 %v16887_v62 }
 0x4d1   : > { %9106 = vmatprep.mubr.f32.mxu1 %v16887_v62 }
 0x4d3   : > { %10245 = vmatmul.mubr.msk.f32.gmra.mrb[34].mxu0 %vm3454_vm10, %v10229_v1 }
 0x4d4   : > { %10531 = vmatmul.mubr.msk.f32.gmra.mrb[30].mxu1 %vm3454_vm10, %v10227_v61  ;;  %6009 = vmatprep.mubr.f32.mxu0 %v16887_v62 }
 0x4d5   : > { %9112 = vmatprep.mubr.f32.mxu1 %v16887_v62 }
 0x4d7   : > { %10246 = vmatmul.mubr.msk.f32.gmra.mrb[36].mxu0 %vm3454_vm10, %v10230_v0 }
 0x4d8   : > { %10532 = vmatmul.mubr.msk.f32.gmra.mrb[32].mxu1 %vm3454_vm10, %v10228_v16  ;;  %6015 = vmatprep.mubr.f32.mxu0 %v16887_v62 }
 0x4d9   : > { %9118 = vmatprep.mubr.f32.mxu1 %v16887_v62 }
 0x4db   : > { %10247 = vmatmul.mubr.msk.f32.gmra.mrb[38].mxu0 %vm3454_vm10, %v10231_v60 }
 0x4dc   : > { %10533 = vmatmul.mubr.msk.f32.gmra.mrb[34].mxu1 %vm3454_vm10, %v10229_v1  ;;  %6021 = vmatprep.mubr.f32.mxu0 %v16887_v62 }
 0x4dd   : > { %9124 = vmatprep.mubr.f32.mxu1 %v16887_v62 }
 0x4df   : > { %10248 = vmatmul.mubr.msk.f32.gmra.mrb[40].mxu0 %vm3454_vm10, %v10232_v37 }
 0x4e0   : > { %10534 = vmatmul.mubr.msk.f32.gmra.mrb[36].mxu1 %vm3454_vm10, %v10230_v0  ;;  %6027 = vmatprep.mubr.f32.mxu0 %v16887_v62  ;;  %v3365_v0 = vpop.permute.xlu1 %3364 }
 0x4e1   : > { %9130 = vmatprep.mubr.f32.mxu1 %v16887_v62 }
 0x4e3   : > { %10249 = vmatmul.mubr.msk.f32.gmra.mrb[42].mxu0 %vm3454_vm10, %v10233_v2 }
 0x4e4   : > { %10535 = vmatmul.mubr.msk.f32.gmra.mrb[38].mxu1 %vm3454_vm10, %v10231_v60  ;;  %6033 = vmatprep.mubr.f32.mxu0 %v16887_v62 }
 0x4e5   : > { %9136 = vmatprep.mubr.f32.mxu1 %v16887_v62 }
 0x4e7   : > { %10250 = vmatmul.mubr.msk.f32.gmra.mrb[44].mxu0 %vm3454_vm10, %v10234_v5 }
 0x4e8   : > { %10536 = vmatmul.mubr.msk.f32.gmra.mrb[40].mxu1 %vm3454_vm10, %v10232_v37  ;;  %6039 = vmatprep.mubr.f32.mxu0 %v16887_v62 }
 0x4e9   : > { %9142 = vmatprep.mubr.f32.mxu1 %v16887_v62 }
 0x4eb   : > { %10251 = vmatmul.mubr.msk.f32.gmra.mrb[46].mxu0 %vm3454_vm10, %v10235_v28 }
 0x4ec   : > { %10537 = vmatmul.mubr.msk.f32.gmra.mrb[42].mxu1 %vm3454_vm10, %v10233_v2  ;;  %6287 = vmatprep.mubr.f32.mxu0 %v16887_v62 }
 0x4ed   : > { %9148 = vmatprep.mubr.f32.mxu1 %v16887_v62 }
 0x4ef   : > { %10268 = vmatmul.mubr.msk.f32.vlgmr.msra.gmra.mrb[16].mxu0 %vm3454_vm10, %v10252_v56 }
 0x4f0   : > { %10538 = vmatmul.mubr.msk.f32.gmra.mrb[44].mxu1 %vm3454_vm10, %v10234_v5  ;;  %6293 = vmatprep.mubr.f32.mxu0 %v16887_v62 }
 0x4f1   : > { %9154 = vmatprep.mubr.f32.mxu1 %v16887_v62 }
 0x4f3   : > { %10269 = vmatmul.mubr.msk.f32.gmra.mrb[18].mxu0 %vm3454_vm10, %v10253_v29 }
 0x4f4   : > { %10539 = vmatmul.mubr.msk.f32.gmra.mrb[46].mxu1 %vm3454_vm10, %v10235_v28  ;;  %6299 = vmatprep.mubr.f32.mxu0 %v16887_v62 }
 0x4f5   : > { %9378 = vmatprep.mubr.f32.mxu1 %v16887_v62 }
 0x4f7   : > { %10270 = vmatmul.mubr.msk.f32.gmra.mrb[20].mxu0 %vm3454_vm10, %v10254_v20 }
 0x4f8   : > { %10556 = vmatmul.mubr.msk.f32.vlgmr.msra.gmra.mrb[16].mxu1 %vm3454_vm10, %v10252_v56  ;;  %6305 = vmatprep.mubr.f32.mxu0 %v16887_v62 }
 0x4f9   : > { %9384 = vmatprep.mubr.f32.mxu1 %v16887_v62 }
 0x4fb   : > { %10271 = vmatmul.mubr.msk.f32.gmra.mrb[22].mxu0 %vm3454_vm10, %v10255_v42 }
 0x4fc   : > { %10557 = vmatmul.mubr.msk.f32.gmra.mrb[18].mxu1 %vm3454_vm10, %v10253_v29  ;;  %6311 = vmatprep.mubr.f32.mxu0 %v16887_v62 }
 0x4fd   : > { %9390 = vmatprep.mubr.f32.mxu1 %v16887_v62 }
 0x4ff   : > { %10272 = vmatmul.mubr.msk.f32.gmra.mrb[24].mxu0 %vm3454_vm10, %v10256_v7 }
 0x500   : > { %10558 = vmatmul.mubr.msk.f32.gmra.mrb[20].mxu1 %vm3454_vm10, %v10254_v20  ;;  %6317 = vmatprep.mubr.f32.mxu0 %v16887_v62 }
 0x501   : > { %9396 = vmatprep.mubr.f32.mxu1 %v16887_v62 }
 0x503   : > { %10273 = vmatmul.mubr.msk.f32.gmra.mrb[26].mxu0 %vm3454_vm10, %v10257_v49 }
 0x504   : > { %10559 = vmatmul.mubr.msk.f32.gmra.mrb[22].mxu1 %vm3454_vm10, %v10255_v42  ;;  %6323 = vmatprep.mubr.f32.mxu0 %v16887_v62 }
 0x505   : > { %9402 = vmatprep.mubr.f32.mxu1 %v16887_v62 }
 0x507   : > { %10274 = vmatmul.mubr.msk.f32.gmra.mrb[28].mxu0 %vm3454_vm10, %v10258_v52 }
 0x508   : > { %10560 = vmatmul.mubr.msk.f32.gmra.mrb[24].mxu1 %vm3454_vm10, %v10256_v7  ;;  %6329 = vmatprep.mubr.f32.mxu0 %v16887_v62 }
 0x509   : > { %9408 = vmatprep.mubr.f32.mxu1 %v16887_v62 }
 0x50b   : > { %10275 = vmatmul.mubr.msk.f32.gmra.mrb[30].mxu0 %vm3454_vm10, %v10259_v63 }
 0x50c   : > { %10561 = vmatmul.mubr.msk.f32.gmra.mrb[26].mxu1 %vm3454_vm10, %v10257_v49  ;;  %6335 = vmatprep.mubr.f32.mxu0 %v16887_v62  ;;  %v16572_v49 = vpop.permute.xlu0 %3369 }
 0x50d   : > { %9414 = vmatprep.mubr.f32.mxu1 %v16887_v62 }
 0x50f   : > { %10276 = vmatmul.mubr.msk.f32.gmra.mrb[32].mxu0 %vm3454_vm10, %v10260_v57 }
 0x510   : > { %10562 = vmatmul.mubr.msk.f32.gmra.mrb[28].mxu1 %vm3454_vm10, %v10258_v52  ;;  %6341 = vmatprep.mubr.f32.mxu0 %v16887_v62 }
 0x511   : > { %9420 = vmatprep.mubr.f32.mxu1 %v16887_v62 }
 0x513   : > { %10277 = vmatmul.mubr.msk.f32.gmra.mrb[34].mxu0 %vm3454_vm10, %v10261_v4 }
 0x514   : > { %10563 = vmatmul.mubr.msk.f32.gmra.mrb[30].mxu1 %vm3454_vm10, %v10259_v63  ;;  %6347 = vmatprep.mubr.f32.mxu0 %v16887_v62 }
 0x515   : > { %9426 = vmatprep.mubr.f32.mxu1 %v16887_v62 }
 0x517   : > { %10278 = vmatmul.mubr.msk.f32.gmra.mrb[36].mxu0 %vm3454_vm10, %v10262_v38 }
 0x518   : > { %10564 = vmatmul.mubr.msk.f32.gmra.mrb[32].mxu1 %vm3454_vm10, %v10260_v57  ;;  %6353 = vmatprep.mubr.f32.mxu0 %v16887_v62 }
 0x519   : > { %9432 = vmatprep.mubr.f32.mxu1 %v16887_v62 }
 0x51b   : > { %10279 = vmatmul.mubr.msk.f32.gmra.mrb[38].mxu0 %vm3454_vm10, %v10263_v13 }
 0x51c   : > { %10565 = vmatmul.mubr.msk.f32.gmra.mrb[34].mxu1 %vm3454_vm10, %v10261_v4  ;;  %6359 = vmatprep.mubr.f32.mxu0 %v16887_v62 }
 0x51d   : > { %9438 = vmatprep.mubr.f32.mxu1 %v16887_v62 }
 0x51f   : > { %10280 = vmatmul.mubr.msk.f32.gmra.mrb[40].mxu0 %vm3454_vm10, %v10264_v15 }
 0x520   : > { %10566 = vmatmul.mubr.msk.f32.gmra.mrb[36].mxu1 %vm3454_vm10, %v10262_v38  ;;  %6365 = vmatprep.mubr.f32.mxu0 %v16887_v62 }
 0x521   : > { %9444 = vmatprep.mubr.f32.mxu1 %v16887_v62 }
 0x523   : > { %10281 = vmatmul.mubr.msk.f32.gmra.mrb[42].mxu0 %vm3454_vm10, %v10265_v6 }
 0x524   : > { %10567 = vmatmul.mubr.msk.f32.gmra.mrb[38].mxu1 %vm3454_vm10, %v10263_v13  ;;  %6371 = vmatprep.mubr.f32.mxu0 %v16887_v62 }
 0x525   : > { %9450 = vmatprep.mubr.f32.mxu1 %v16887_v62 }
 0x527   : > { %10282 = vmatmul.mubr.msk.f32.gmra.mrb[44].mxu0 %vm3454_vm10, %v10266_v3 }
 0x528   : > { %10568 = vmatmul.mubr.msk.f32.gmra.mrb[40].mxu1 %vm3454_vm10, %v10264_v15  ;;  %6377 = vmatprep.mubr.f32.mxu0 %v16887_v62 }
 0x529   : > { %9456 = vmatprep.mubr.f32.mxu1 %v16887_v62 }
 0x52b   : > { %10283 = vmatmul.mubr.msk.f32.gmra.mrb[46].mxu0 %vm3454_vm10, %v10267_v47 }
 0x52c   : > { %10569 = vmatmul.mubr.msk.f32.gmra.mrb[42].mxu1 %vm3454_vm10, %v10265_v6 }
 0x52d   : > { %9462 = vmatprep.mubr.f32.mxu1 %v16887_v62 }
 0x530   : > { %10570 = vmatmul.mubr.msk.f32.gmra.mrb[44].mxu1 %vm3454_vm10, %v10266_v3 }
 0x531   : > { %9468 = vmatprep.mubr.f32.mxu1 %v16887_v62 }
 0x534   : > { %10571 = vmatmul.mubr.msk.f32.gmra.mrb[46].mxu1 %vm3454_vm10, %v10267_v47 }
 0x5c2   : > { %v6289_v44 = vpop.f32.mrb[16].mxu0 }
 0x5c3   : > { %v6291_v31 = vpop.f32.mrb[17].mxu0  ;;  %v10983_v12 = vadd.f32 %v6289_v44, %v3345_v22 }
 0x5c4   : > { %v10984_v27 = vadd.f32 %v6291_v31, %v3345_v22 }
 0x5c5   : > { %12896 = vtanh.f32 %v10983_v12 }
 0x5c6   : > { %v6295_v30 = vpop.f32.mrb[18].mxu0  ;;  %12898 = vtanh.f32 %v10984_v27 }
 0x5c7   : > { %v6297_v62 = vpop.f32.mrb[19].mxu0  ;;  %v10985_v59 = vadd.f32 %v6295_v30, %v3350_v36  ;;  %v16586_v30 = vpop.permute.xlu1 %3374 }
 0x5c8   : > { %v10986_v33 = vadd.f32 %v6297_v62, %v3350_v36 }
 0x5c9   : > { %12900 = vtanh.f32 %v10985_v59 }
 0x5ca   : > { %v6301_v50 = vpop.f32.mrb[20].mxu0  ;;  %12902 = vtanh.f32 %v10986_v33 }
 0x5cb   : > { %v9380_v43 = vpop.f32.mrb[16].mxu1  ;;  %v6303_v32 = vpop.f32.mrb[21].mxu0  ;;  %v10987_v41 = vadd.f32 %v6301_v50, %v3355_v55 }
 0x5cc   : > { %v9382_v35 = vpop.f32.mrb[17].mxu1  ;;  %v11015_v25 = vadd.f32 %v9380_v43, %v3345_v22  ;;  %v10988_v8 = vadd.f32 %v6303_v32, %v3355_v55 }
 0x5cd   : > { %v11016_v19 = vadd.f32 %v9382_v35, %v3345_v22  ;;  %12904 = vtanh.f32 %v10987_v41 }
 0x5ce   : > { %v6307_v10 = vpop.f32.mrb[22].mxu0  ;;  %12906 = vtanh.f32 %v11015_v25 }
 0x5cf   : > { %v9386_v58 = vpop.f32.mrb[18].mxu1  ;;  %v6309_v54 = vpop.f32.mrb[23].mxu0  ;;  %v10989_v26 = vadd.f32 %v6307_v10, %v3360_v46  ;;  %12908 = vtanh.f32 %v10988_v8 }
 0x5d0   : > { %v9388_v48 = vpop.f32.mrb[19].mxu1  ;;  %v11017_v24 = vadd.f32 %v9386_v58, %v3350_v36  ;;  %v10990_v61 = vadd.f32 %v6309_v54, %v3360_v46  ;;  %12910 = vtanh.f32 %v11016_v19  ;;  %v16568_v56 = vpop.eup %12896 }
 0x5d1   : > { %v11018_v60 = vadd.f32 %v9388_v48, %v3350_v36  ;;  %12912 = vtanh.f32 %v10989_v26  ;;  %v16570_v7 = vpop.eup %12898 }
 0x5d2   : > { %v6313_v21 = vpop.f32.mrb[24].mxu0  ;;  %12914 = vtanh.f32 %v11017_v24  ;;  %v16617_v24 = vpop.permute.xlu0 %3379 }
 0x5d3   : > { %v9392_v39 = vpop.f32.mrb[20].mxu1  ;;  %v6315_v34 = vpop.f32.mrb[25].mxu0  ;;  %v10991_v2 = vadd.f32 %v6313_v21, %v3365_v0  ;;  %12916 = vtanh.f32 %v10990_v61 }
 0x5d4   : > { %v9394_v51 = vpop.f32.mrb[21].mxu1  ;;  %v11019_v5 = vadd.f32 %v9392_v39, %v3355_v55  ;;  %v10992_v29 = vadd.f32 %v6315_v34, %v3365_v0  ;;  %12918 = vtanh.f32 %v11018_v60  ;;  %v16574_v57 = vpop.eup %12900 }
 0x5d5   : > { %v11020_v52 = vadd.f32 %v9394_v51, %v3355_v55  ;;  %12920 = vtanh.f32 %v10991_v2  ;;  %v16577_v38 = vpop.eup %12902 }
 0x5d6   : > { %v6319_v40 = vpop.f32.mrb[26].mxu0  ;;  %12922 = vtanh.f32 %v11019_v5 }
 0x5d7   : > { %v9398_v16 = vpop.f32.mrb[22].mxu1  ;;  %v6321_v1 = vpop.f32.mrb[27].mxu0  ;;  %v10993_v4 = vadd.f32 %v6319_v40, %v16572_v49  ;;  %12924 = vtanh.f32 %v10992_v29 }
 0x5d8   : > { %v9400_v37 = vpop.f32.mrb[23].mxu1  ;;  %v11021_v13 = vadd.f32 %v9398_v16, %v3360_v46  ;;  %v16579_v6 = vpop.eup %12904  ;;  %v10994_v3 = vadd.f32 %v6321_v1, %v16572_v49  ;;  %12926 = vtanh.f32 %v11020_v52 }
 0x5d9   : > { %v16584_v31 = vpop.eup %12906  ;;  %v11022_v62 = vadd.f32 %v9400_v37, %v3360_v46  ;;  %12928 = vtanh.f32 %v10993_v4 }
 0x5da   : > { %v6325_v28 = vpop.f32.mrb[28].mxu0  ;;  %v16590_v50 = vpop.eup %12908  ;;  %12930 = vtanh.f32 %v11021_v13 }
 0x5db   : > { %v9404_v20 = vpop.f32.mrb[24].mxu1  ;;  %v6327_v42 = vpop.f32.mrb[29].mxu0  ;;  %v10995_v43 = vadd.f32 %v6325_v28, %v16586_v30  ;;  %12932 = vtanh.f32 %v10994_v3 }
 0x5dc   : > { %v9406_v63 = vpop.f32.mrb[25].mxu1  ;;  %v16593_v32 = vpop.eup %12910  ;;  %v11023_v35 = vadd.f32 %v9404_v20, %v3365_v0  ;;  %12934 = vtanh.f32 %v11022_v62  ;;  %v10996_v48 = vadd.f32 %v6327_v42, %v16586_v30 }
 0x5dd   : > { %v16595_v36 = vpop.eup %12912  ;;  %12936 = vtanh.f32 %v10995_v43  ;;  %v11024_v21 = vadd.f32 %v9406_v63, %v3365_v0 }
 0x5de   : > { %v6331_v15 = vpop.f32.mrb[30].mxu0  ;;  %v16600_v58 = vpop.eup %12914  ;;  %12938 = vtanh.f32 %v11023_v35 }
 0x5df   : > { %v9410_v47 = vpop.f32.mrb[26].mxu1  ;;  %v16582_v44 = vpop.f32.mrb[31].mxu0  ;;  %v10997_v1 = vadd.f32 %v6331_v15, %v16617_v24 }
 0x5e0   : > { %v16588_v22 = vpop.f32.mrb[27].mxu1  ;;  %v16605_v33 = vpop.eup %12916  ;;  %v11025_v37 = vadd.f32 %v9410_v47, %v16572_v49 }
 0x5e1   : > { %v16608_v25 = vpop.eup %12918 }
 0x5e2   : > { %v6337_v12 = vpop.f32.mrb[32].mxu0  ;;  %v16610_v34 = vpop.eup %12920 }
 0x5e3   : > { %v10999_v27 = vadd.f32 %v6337_v12, %v16552_v18  ;;  %v16598_v10 = vpop.f32.mrb[28].mxu1  ;;  %v6339_v59 = vpop.f32.mrb[33].mxu0 }
 0x5e4   : > { %v11000_v54 = vadd.f32 %v6339_v59, %v16552_v18  ;;  %v16603_v55 = vpop.f32.mrb[29].mxu1  ;;  %v16615_v26 = vpop.eup %12922 }
 0x5e5   : > { %v10284_v41 = vmul.f32 -1.442695, %v10999_v27  ;;  %v16622_v16 = vpop.eup %12924 }
 0x5e6   : > { %v10285_v8 = vmul.f32 -1.442695, %v11000_v54  ;;  %v6343_v39 = vpop.f32.mrb[34].mxu0  ;;  %v16625_v60 = vpop.eup %12926 }
 0x5e7   : > { %12940 = vpow2.f32 %v10284_v41  ;;  %v11001_v46 = vadd.f32 %v6343_v39, %v16554_v23  ;;  %v16613_v19 = vpop.f32.mrb[30].mxu1  ;;  %v6345_v51 = vpop.f32.mrb[35].mxu0 }
 0x5e8   : > { %16930 = vst [vmem:[#allocation3_spill] sm:$0xff] %v16613_v19  ;;  %12942 = vpow2.f32 %v10285_v8  ;;  %v11002_v40 = vadd.f32 %v6345_v51, %v16554_v23  ;;  %v16620_v61 = vpop.f32.mrb[31].mxu1  ;;  %v16628_v28 = vpop.eup %12928 }
 0x5e9   : > { %16931 = vst [vmem:[#allocation5_spill] sm:$0xff] %v16620_v61  ;;  %12944 = vtanh.f32 %v10996_v48  ;;  %v10286_v0 = vmul.f32 -1.442695, %v11001_v46  ;;  %v16631_v52 = vpop.eup %12930 }
 0x5ea   : > { %12946 = vtanh.f32 %v11024_v21  ;;  %v10287_v2 = vmul.f32 -1.442695, %v11002_v40  ;;  %v6349_v5 = vpop.f32.mrb[36].mxu0  ;;  %v16635_v15 = vpop.eup %12932 }
 0x5eb   : > { %12948 = vpow2.f32 %v10286_v0  ;;  %v11003_v29 = vadd.f32 %v6349_v5, %v16556_v53  ;;  %v9428_v20 = vpop.f32.mrb[32].mxu1  ;;  %v6351_v42 = vpop.f32.mrb[37].mxu0 }
 0x5ec   : > { %12950 = vpow2.f32 %v10287_v2  ;;  %v11031_v63 = vadd.f32 %v9428_v20, %v16552_v18  ;;  %v11004_v4 = vadd.f32 %v6351_v42, %v16556_v53  ;;  %v9430_v13 = vpop.f32.mrb[33].mxu1  ;;  %v16638_v62 = vpop.eup %12934 }
 0x5ed   : > { %12952 = vtanh.f32 %v10997_v1  ;;  %v10288_v3 = vmul.f32 -1.442695, %v11003_v29  ;;  %v11032_v47 = vadd.f32 %v9430_v13, %v16552_v18  ;;  %v16640_v27 = vpop.eup %12936 }
 0x5ee   : > { %12954 = vtanh.f32 %v11025_v37  ;;  %v10572_v43 = vmul.f32 -1.442695, %v11031_v63  ;;  %v10289_v35 = vmul.f32 -1.442695, %v11004_v4  ;;  %v6355_v12 = vpop.f32.mrb[38].mxu0  ;;  %v16643_v21 = vpop.eup %12938 }
 0x5ef   : > { %12956 = vpow2.f32 %v10288_v3  ;;  %v10573_v59 = vmul.f32 -1.442695, %v11032_v47  ;;  %v11005_v54 = vadd.f32 %v6355_v12, %v16558_v9  ;;  %v9434_v48 = vpop.f32.mrb[34].mxu1  ;;  %v6357_v41 = vpop.f32.mrb[39].mxu0 }
 0x5f0   : > { %12958 = vpow2.f32 %v10572_v43  ;;  %v11033_v8 = vadd.f32 %v9434_v48, %v16554_v23  ;;  %v11006_v18 = vadd.f32 %v6357_v41, %v16558_v9  ;;  %v9436_v39 = vpop.f32.mrb[35].mxu1 }
 0x5f1   : > { %v12941_v46 = vpop.eup %12940  ;;  %12960 = vpow2.f32 %v10289_v35  ;;  %v10290_v51 = vmul.f32 -1.442695, %v11005_v54  ;;  %v11034_v37 = vadd.f32 %v9436_v39, %v16554_v23 }
 0x5f2   : > { %v12943_v40 = vpop.eup %12942  ;;  %v6464_v1 = vadd.f32 1.0, %v12941_v46  ;;  %12962 = vpow2.f32 %v10573_v59  ;;  %v10574_v0 = vmul.f32 -1.442695, %v11033_v8  ;;  %v6361_v2 = vpop.f32.mrb[40].mxu0  ;;  %v10291_v20 = vmul.f32 -1.442695, %v11006_v18 }
 0x5f3   : > { %v16648_v5 = vpop.eup %12944  ;;  %v6465_v29 = vadd.f32 1.0, %v12943_v40  ;;  %12964 = vpow2.f32 %v10290_v51  ;;  %v11007_v42 = vadd.f32 %v6361_v2, %v16560_v45  ;;  %v9440_v63 = vpop.f32.mrb[36].mxu1  ;;  %v10575_v23 = vmul.f32 -1.442695, %v11034_v37 }
 0x5f4   : > { %v6363_v4 = vpop.f32.mrb[41].mxu0  ;;  %v16651_v13 = vpop.eup %12946  ;;  %12966 = vrcp.f32 %v6464_v1  ;;  %v11035_v51 = vadd.f32 %v9440_v63, %v16556_v53 }
 0x5f5   : > { %v9442_v3 = vpop.f32.mrb[37].mxu1  ;;  %v12949_v47 = vpop.eup %12948  ;;  %12968 = vrcp.f32 %v6465_v29  ;;  %v10292_v48 = vmul.f32 -1.442695, %v11007_v42 }
 0x5f6   : > { %v12951_v43 = vpop.eup %12950  ;;  %v6466_v35 = vadd.f32 1.0, %v12949_v47  ;;  %12970 = vpow2.f32 %v10574_v0  ;;  %v6367_v12 = vpop.f32.mrb[42].mxu0  ;;  %v11008_v0 = vadd.f32 %v6363_v4, %v16560_v45 }
 0x5f7   : > { %v16653_v59 = vpop.eup %12952  ;;  %v6467_v54 = vadd.f32 1.0, %v12951_v43  ;;  %12972 = vpow2.f32 %v10291_v20  ;;  %v9446_v41 = vpop.f32.mrb[38].mxu1 }
 0x5f8   : > { %16932 = vst [vmem:[#allocation7_spill] sm:$0xff] %v16653_v59  ;;  %v6369_v8 = vpop.f32.mrb[43].mxu0  ;;  %v16655_v18 = vpop.eup %12954  ;;  %12974 = vrcp.f32 %v6466_v35 }
 0x5f9   : > { %16933 = vst [vmem:[#allocation8_spill] sm:$0xff] %v16655_v18  ;;  %v9448_v39 = vpop.f32.mrb[39].mxu1  ;;  %v12957_v46 = vpop.eup %12956  ;;  %12976 = vrcp.f32 %v6467_v54  ;;  %v11010_v61 = vadd.f32 %v6369_v8, %v16562_v17 }
 0x5fa   : > { %v12959_v40 = vpop.eup %12958  ;;  %v6468_v1 = vadd.f32 1.0, %v12957_v46  ;;  %12978 = vpow2.f32 %v10575_v23  ;;  %v6373_v37 = vpop.f32.mrb[44].mxu0  ;;  %v10576_v46 = vmul.f32 -1.442695, %v11035_v51  ;;  %v11036_v23 = vadd.f32 %v9442_v3, %v16556_v53 }
 0x5fb   : > { %v12961_v2 = vpop.eup %12960  ;;  %v9555_v29 = vadd.f32 1.0, %v12959_v40  ;;  %12980 = vpow2.f32 %v10292_v48  ;;  %v9452_v20 = vpop.f32.mrb[40].mxu1  ;;  %v10293_v40 = vmul.f32 -1.442695, %v11008_v0 }
 0x5fc   : > { %v16660_v42 = vpop.f32.mrb[45].mxu0  ;;  %v12963_v47 = vpop.eup %12962  ;;  %12982 = vrcp.f32 %v6468_v1  ;;  %v6469_v43 = vadd.f32 1.0, %v12961_v2  ;;  %v11009_v1 = vadd.f32 %v6367_v12, %v16562_v17 }
 0x5fd   : > { %v16662_v35 = vpop.f32.mrb[41].mxu1  ;;  %v12965_v54 = vpop.eup %12964  ;;  %12984 = vrcp.f32 %v9555_v29  ;;  %v9556_v63 = vadd.f32 1.0, %v12963_v47 }
 0x5fe   : > { %v12967_v4 = vpop.eup %12966  ;;  %12986 = vrcp.f32 %v6469_v43  ;;  %v6470_v48 = vadd.f32 1.0, %v12965_v54  ;;  %v16671_v2 = vpop.f32.mrb[46].mxu0  ;;  %v10577_v54 = vmul.f32 -1.442695, %v11036_v23  ;;  %v10294_v59 = vmul.f32 -1.442695, %v11009_v1 }
 0x5ff   : > { %v12969_v18 = vpop.eup %12968  ;;  %v6528_v29 = vadd.f32 %v12967_v4, %v16568_v56  ;;  %12988 = vrcp.f32 %v9556_v63  ;;  %v16674_v51 = vpop.f32.mrb[42].mxu1  ;;  %v11037_v56 = vadd.f32 %v9446_v41, %v16558_v9  ;;  %v11011_v41 = vadd.f32 %v6373_v37, %v16564_v11 }
 0x600   : > { %v16676_v53 = vpop.f32.mrb[47].mxu0  ;;  %v12971_v3 = vpop.eup %12970  ;;  %12990 = vrcp.f32 %v6470_v48  ;;  %v6529_v0 = vadd.f32 %v12969_v18, %v16570_v7  ;;  %v11038_v7 = vadd.f32 %v9448_v39, %v16558_v9  ;;  %v10295_v39 = vmul.f32 -1.442695, %v11010_v61 }
 0x601   : > { %v16678_v47 = vpop.f32.mrb[43].mxu1  ;;  %v12973_v43 = vpop.eup %12972  ;;  %6544 = vst [vmem:[%s16668_s22] sm:$0xff] %v6528_v29  ;;  %v9557_v12 = vadd.f32 1.0, %v12971_v3  ;;  %12992 = vpow2.f32 %v10576_v46  ;;  %v10578_v29 = vmul.f32 -1.442695, %v11037_v56 }
 0x602   : > { %v12975_v63 = vpop.eup %12974  ;;  %v6471_v4 = vadd.f32 1.0, %v12973_v43  ;;  %12994 = vpow2.f32 %v10293_v40  ;;  %6546 = vst.msk [vmem:[%s16668_s22 + $0x8] sm:$0xff] %vm6545_vm4, %v6529_v0  ;;  %v10579_v43 = vmul.f32 -1.442695, %v11038_v7 }
 0x603   : > { %v12977_v48 = vpop.eup %12976  ;;  %v6530_v19 = vadd.f32 %v12975_v63, %v16574_v57  ;;  %12996 = vrcp.f32 %v9557_v12  ;;  %v16688_v18 = vpop.f32.mrb[44].mxu1  ;;  %v11039_v57 = vadd.f32 %v9452_v20, %v16560_v45  ;;  %v10296_v12 = vmul.f32 -1.442695, %v11011_v41 }
 0x604   : > { %v12979_v46 = vpop.eup %12978  ;;  %12998 = vrcp.f32 %v6471_v4  ;;  %v16691_v23 = vpop.f32.mrb[45].mxu1  ;;  %v6531_v40 = vadd.f32 %v12977_v48, %v16577_v38  ;;  %v11012_v20 = vadd.f32 %v16660_v42, %v16564_v11 }
 0x605   : > { %v12981_v8 = vpop.eup %12980  ;;  %6547 = vst [vmem:[%s16668_s22 + $0x20] sm:$0xff] %v6530_v19  ;;  %v9558_v1 = vadd.f32 1.0, %v12979_v46  ;;  %13000 = vpow2.f32 %v10577_v54  ;;  %v10580_v56 = vmul.f32 -1.442695, %v11039_v57 }
 0x606   : > { %v12983_v3 = vpop.eup %12982  ;;  %v6472_v9 = vadd.f32 1.0, %v12981_v8  ;;  %13002 = vpow2.f32 %v10294_v59  ;;  %6548 = vst.msk [vmem:[%s16668_s22 + $0x28] sm:$0xff] %vm6545_vm4, %v6531_v40 }
 0x607   : > { %v12985_v0 = vpop.eup %12984  ;;  %v6532_v37 = vadd.f32 %v12983_v3, %v16579_v6  ;;  %13004 = vrcp.f32 %v9558_v1  ;;  %v16699_v38 = vpop.f32.mrb[46].mxu1  ;;  %v11040_v6 = vadd.f32 %v16662_v35, %v16560_v45  ;;  %v10297_v45 = vmul.f32 -1.442695, %v11012_v20 }
 0x608   : > { %v12987_v19 = vpop.eup %12986  ;;  %13006 = vrcp.f32 %v6472_v9  ;;  %v16703_v54 = vpop.f32.mrb[47].mxu1  ;;  %v9619_v61 = vadd.f32 %v12985_v0, %v16584_v31  ;;  %v11042_v20 = vadd.f32 %v16678_v47, %v16562_v17  ;;  %v11044_v47 = vadd.f32 %v16691_v23, %v16564_v11 }
 0x609   : > { %v12989_v59 = vpop.eup %12988  ;;  %6549 = vst [vmem:[%s16668_s22 + $0x40] sm:$0xff] %v6532_v37  ;;  %13008 = vpow2.f32 %v10578_v29  ;;  %v6533_v63 = vadd.f32 %v12987_v19, %v16590_v50  ;;  %v11013_v50 = vadd.f32 %v16671_v2, %v16566_v14 }
 0x60a   : > { %v12991_v4 = vpop.eup %12990  ;;  %13010 = vpow2.f32 %v10295_v39  ;;  %9651 = vrot.lane.b32.xlu1 %v9619_v61, %s13115_s23  ;;  %v9620_v42 = vadd.f32 %v12989_v59, %v16593_v32  ;;  %v10581_v32 = vmul.f32 -1.442695, %v11040_v6  ;;  %v10585_v23 = vmul.f32 -1.442695, %v11044_v47 }
 0x60b   : > { %v12993_v48 = vpop.eup %12992  ;;  %v6534_v31 = vadd.f32 %v12991_v4, %v16595_v36  ;;  %13012 = vpow2.f32 %v10579_v43  ;;  %6550 = vst.msk [vmem:[%s16668_s22 + $0x48] sm:$0xff] %vm6545_vm4, %v6533_v63  ;;  %v11041_v36 = vadd.f32 %v16674_v51, %v16562_v17  ;;  %v10298_v3 = vmul.f32 -1.442695, %v11013_v50 }
 0x60c   : > { %v12995_v7 = vpop.eup %12994  ;;  %v9559_v46 = vadd.f32 1.0, %v12993_v48  ;;  %13014 = vpow2.f32 %v10296_v12  ;;  %9653 = vrot.lane.b32.xlu0 %v9620_v42, %s13115_s23  ;;  %v11014_v43 = vadd.f32 %v16676_v53, %v16566_v14  ;;  %v11043_v53 = vadd.f32 %v16688_v18, %v16564_v11 }
 0x60d   : > { %v12997_v35 = vpop.eup %12996  ;;  %6551 = vst [vmem:[%s16668_s22 + $0x60] sm:$0xff] %v6534_v31  ;;  %v6473_v41 = vadd.f32 1.0, %v12995_v7  ;;  %13016 = vpow2.f32 %v10580_v56  ;;  %v10582_v51 = vmul.f32 -1.442695, %v11041_v36  ;;  %v10583_v17 = vmul.f32 -1.442695, %v11042_v20 }
 0x60e   : > { %v12999_v40 = vpop.eup %12998  ;;  %13018 = vrcp.f32 %v9559_v46  ;;  %v9621_v8 = vadd.f32 %v12997_v35, %v16600_v58  ;;  %v10299_v63 = vmul.f32 -1.442695, %v11014_v43  ;;  %v10584_v18 = vmul.f32 -1.442695, %v11043_v53 }
 0x60f   : > { %v13001_v1 = vpop.eup %13000  ;;  %13020 = vrcp.f32 %v6473_v41  ;;  %v6535_v29 = vadd.f32 %v12999_v40, %v16605_v33  ;;  %v11045_v35 = vadd.f32 %v16699_v38, %v16566_v14 }
 0x610   : > { %v13003_v2 = vpop.eup %13002  ;;  %v9560_v57 = vadd.f32 1.0, %v13001_v1  ;;  %13022 = vpow2.f32 %v10297_v45  ;;  %9655 = vrot.lane.b32.xlu1 %v9621_v8, %s13115_s23 }
 0x611   : > { %v13005_v9 = vpop.eup %13004  ;;  %v6474_v39 = vadd.f32 1.0, %v13003_v2  ;;  %13024 = vpow2.f32 %v10581_v32  ;;  %6552 = vst.msk [vmem:[%s16668_s22 + $0x68] sm:$0xff] %vm6545_vm4, %v6535_v29  ;;  %v10586_v1 = vmul.f32 -1.442695, %v11045_v35 }
 0x612   : > { %v13007_v0 = vpop.eup %13006  ;;  %13026 = vrcp.f32 %v9560_v57  ;;  %v9622_v58 = vadd.f32 %v13005_v9, %v16608_v25 }
 0x613   : > { %v13009_v37 = vpop.eup %13008  ;;  %v6536_v33 = vadd.f32 %v13007_v0, %v16610_v34  ;;  %13028 = vrcp.f32 %v6474_v39  ;;  %v11026_v39 = vadd.f32 %v16588_v22, %v16572_v49  ;;  %v11027_v49 = vadd.f32 %v16598_v10, %v16586_v30 }
 0x614   : > { %v13011_v19 = vpop.eup %13010  ;;  %v9561_v12 = vadd.f32 1.0, %v13009_v37  ;;  %13030 = vpow2.f32 %v10298_v3  ;;  %9657 = vrot.lane.b32.xlu0 %v9622_v58, %s13115_s23 }
 0x615   : > { %v13013_v61 = vpop.eup %13012  ;;  %6553 = vst [vmem:[%s16668_s22 + $0x80] sm:$0xff] %v6536_v33  ;;  %v6475_v59 = vadd.f32 1.0, %v13011_v19  ;;  %13032 = vpow2.f32 %v10582_v51 }
 0x616   : > { %v13015_v25 = vpop.eup %13014  ;;  %13034 = vrcp.f32 %v9561_v12  ;;  %v9562_v56 = vadd.f32 1.0, %v13013_v61  ;;  %v16934_v12 = vld [vmem:[#allocation3_spill] sm:$0xff] }
 0x617   : > { %v13017_v34 = vpop.eup %13016  ;;  %13036 = vrcp.f32 %v6475_v59  ;;  %v6476_v6 = vadd.f32 1.0, %v13015_v25  ;;  %v11029_v20 = vadd.f32 %v16934_v12, %v16617_v24 }
 0x618   : > { %v13019_v4 = vpop.eup %13018  ;;  %13038 = vrcp.f32 %v9562_v56  ;;  %v9563_v42 = vadd.f32 1.0, %v13017_v34  ;;  %v16936_v56 = vld [vmem:[#allocation7_spill] sm:$0xff] }
 0x619   : > { %v13021_v48 = vpop.eup %13020  ;;  %13040 = vrcp.f32 %v6476_v6  ;;  %v9623_v31 = vadd.f32 %v13019_v4, %v16615_v26  ;;  %v11046_v26 = vadd.f32 %v16703_v54, %v16566_v14  ;;  %v16937_v6 = vld [vmem:[#allocation8_spill] sm:$0xff] }
 0x61a   : > { %v13023_v7 = vpop.eup %13022  ;;  %13042 = vrcp.f32 %v9563_v42  ;;  %v6537_v46 = vadd.f32 %v13021_v48, %v16622_v16 }
 0x61b   : > { %v13025_v45 = vpop.eup %13024  ;;  %v6477_v50 = vadd.f32 1.0, %v13023_v7  ;;  %13044 = vpow2.f32 %v10299_v63  ;;  %9659 = vrot.lane.b32.xlu1 %v9623_v31, %s13115_s23  ;;  %v10587_v14 = vmul.f32 -1.442695, %v11046_v26 }
 0x61c   : > { %v13027_v41 = vpop.eup %13026  ;;  %v9564_v11 = vadd.f32 1.0, %v13025_v45  ;;  %13046 = vpow2.f32 %v10583_v17  ;;  %6554 = vst.msk [vmem:[%s16668_s22 + $0x88] sm:$0xff] %vm6545_vm4, %v6537_v46 }
 0x61d   : > { %v13029_v16 = vpop.eup %13028  ;;  %13048 = vrcp.f32 %v6477_v50  ;;  %v9624_v32 = vadd.f32 %v13027_v41, %v16625_v60 }
 0x61e   : > { %v13031_v36 = vpop.eup %13030  ;;  %v6538_v40 = vadd.f32 %v13029_v16, %v16628_v28  ;;  %13050 = vrcp.f32 %v9564_v11  ;;  %v10998_v28 = vadd.f32 %v16582_v44, %v16617_v24 }
 0x61f   : > { %v13033_v38 = vpop.eup %13032  ;;  %v6478_v8 = vadd.f32 1.0, %v13031_v36  ;;  %13052 = vpow2.f32 %v10584_v18  ;;  %9661 = vrot.lane.b32.xlu0 %v9624_v32, %s13115_s23 }
 0x620   : > { %v13035_v29 = vpop.eup %13034  ;;  %6555 = vst [vmem:[%s16668_s22 + $0xa0] sm:$0xff] %v6538_v40  ;;  %v9565_v2 = vadd.f32 1.0, %v13033_v38  ;;  %13054 = vpow2.f32 %v10585_v23 }
 0x621   : > { %v13037_v54 = vpop.eup %13036  ;;  %13056 = vrcp.f32 %v6478_v8  ;;  %v9625_v60 = vadd.f32 %v13035_v29, %v16631_v52 }
 0x622   : > { %v13039_v57 = vpop.eup %13038  ;;  %13058 = vrcp.f32 %v9565_v2  ;;  %v6539_v3 = vadd.f32 %v13037_v54, %v16635_v15 }
 0x623   : > { %v13041_v9 = vpop.eup %13040  ;;  %13060 = vpow2.f32 %v10586_v1  ;;  %9663 = vrot.lane.b32.xlu1 %v9625_v60, %s13115_s23  ;;  %v9626_v51 = vadd.f32 %v13039_v57, %v16638_v62 }
 0x624   : > { %v13043_v0 = vpop.eup %13042  ;;  %v6540_v52 = vadd.f32 %v13041_v9, %v16640_v27  ;;  %13062 = vpow2.f32 %v10587_v14  ;;  %6556 = vst.msk [vmem:[%s16668_s22 + $0xa8] sm:$0xff] %vm6545_vm4, %v6539_v3  ;;  %v11028_v27 = vadd.f32 %v16603_v55, %v16586_v30  ;;  %v16935_v55 = vld [vmem:[#allocation5_spill] sm:$0xff] }
 0x625   : > { %v13045_v44 = vpop.eup %13044  ;;  %9665 = vrot.lane.b32.xlu0 %v9626_v51, %s13115_s23  ;;  %v9627_v15 = vadd.f32 %v13043_v0, %v16643_v21  ;;  %13064 = vtanh.f32 %v10998_v28  ;;  %v11030_v59 = vadd.f32 %v16935_v55, %v16617_v24 }
 0x626   : > { %v13047_v58 = vpop.eup %13046  ;;  %6557 = vst [vmem:[%s16668_s22 + $0xc0] sm:$0xff] %v6540_v52  ;;  %v6479_v22 = vadd.f32 1.0, %v13045_v44  ;;  %13066 = vtanh.f32 %v11026_v39 }
 0x627   : > { %v13049_v62 = vpop.eup %13048  ;;  %v9566_v37 = vadd.f32 1.0, %v13047_v58  ;;  %9667 = vrot.lane.b32.xlu1 %v9627_v15, %s13115_s23 }
 0x628   : > { %v13051_v33 = vpop.eup %13050  ;;  %13068 = vrcp.f32 %v6479_v22  ;;  %v6541_v21 = vadd.f32 %v13049_v62, %v16648_v5 }
 0x629   : > { %v13053_v43 = vpop.eup %13052  ;;  %13070 = vrcp.f32 %v9566_v37  ;;  %v9628_v19 = vadd.f32 %v13051_v33, %v16651_v13 }
 0x62a   : > { %v13055_v10 = vpop.eup %13054  ;;  %13072 = vtanh.f32 %v11027_v49  ;;  %v9567_v61 = vadd.f32 1.0, %v13053_v43  ;;  %6558 = vst.msk [vmem:[%s16668_s22 + $0xc8] sm:$0xff] %vm6545_vm4, %v6541_v21 }
 0x62b   : > { %v13057_v30 = vpop.eup %13056  ;;  %13074 = vtanh.f32 %v11028_v27  ;;  %v9568_v25 = vadd.f32 1.0, %v13055_v10  ;;  %9669 = vrot.lane.b32.xlu0 %v9628_v19, %s13115_s23 }
 0x62c   : > { %v13059_v5 = vpop.eup %13058  ;;  %v6542_v13 = vadd.f32 %v13057_v30, %v16936_v56  ;;  %13076 = vrcp.f32 %v9567_v61 }
 0x62d   : > { %v13061_v34 = vpop.eup %13060  ;;  %13078 = vrcp.f32 %v9568_v25  ;;  %v9629_v63 = vadd.f32 %v13059_v5, %v16937_v6 }
 0x62e   : > { %v13063_v53 = vpop.eup %13062  ;;  %13080 = vtanh.f32 %v11029_v20  ;;  %6559 = vst [vmem:[%s16668_s22 + $0xe0] sm:$0xff] %v6542_v13  ;;  %v9569_v4 = vadd.f32 1.0, %v13061_v34 }
 0x62f   : > { %13082 = vtanh.f32 %v11030_v59  ;;  %v9570_v42 = vadd.f32 1.0, %v13063_v53  ;;  %9671 = vrot.lane.b32.xlu1 %v9629_v63, %s13115_s23  ;;  %v13065_v24 = vpop.eup %13064 }
 0x630   : > { %13084 = vrcp.f32 %v9569_v4  ;;  %v13067_v17 = vpop.eup %13066 }
 0x631   : > { %13086 = vrcp.f32 %v9570_v42 }
 0x632   : > { %v13069_v47 = vpop.eup %13068 }
 0x633   : > { %v13071_v48 = vpop.eup %13070  ;;  %v6543_v31 = vadd.f32 %v13069_v47, %v13065_v24 }
 0x634   : > { %v13073_v7 = vpop.eup %13072  ;;  %v9630_v46 = vadd.f32 %v13071_v48, %v13067_v17 }
 0x635   : > { %v13075_v45 = vpop.eup %13074  ;;  %6560 = vst.msk [vmem:[%s16668_s22 + $0xe8] sm:$0xff] %vm6545_vm4, %v6543_v31 }
 0x636   : > { %v13077_v50 = vpop.eup %13076  ;;  %9673 = vrot.lane.b32.xlu0 %v9630_v46, %s13115_s23 }
 0x637   : > { %v13079_v18 = vpop.eup %13078  ;;  %v9631_v35 = vadd.f32 %v13077_v50, %v13073_v7 }
 0x638   : > { %v13081_v41 = vpop.eup %13080  ;;  %v9632_v11 = vadd.f32 %v13079_v18, %v13075_v45 }
 0x639   : > { %v13083_v23 = vpop.eup %13082  ;;  %9675 = vrot.lane.b32.xlu1 %v9631_v35, %s13115_s23 }
 0x63a   : > { %v13085_v26 = vpop.eup %13084  ;;  %9677 = vrot.lane.b32.xlu0 %v9632_v11, %s13115_s23 }
 0x63b   : > { %v13087_v16 = vpop.eup %13086  ;;  %v9633_v32 = vadd.f32 %v13085_v26, %v13081_v41 }
 0x63c   : > { %v9634_v36 = vadd.f32 %v13087_v16, %v13083_v23 }
 0x63d   : > { %9679 = vrot.lane.b32.xlu1 %v9633_v32, %s13115_s23 }
 0x63e   : > { %9681 = vrot.lane.b32.xlu0 %v9634_v36, %s13115_s23 }
 0x67c   : > { %v9652_v40 = vpop.permute.xlu1 %9651 }
 0x67d   : > { %9716 = vst.msk [vmem:[%s16668_s22 + $0x8] sm:$0xff] %vm9715_vm5, %v9652_v40 }
 0x67e   : > { %v9654_v38 = vpop.permute.xlu0 %9653 }
 0x67f   : > { %v9683_v8 = vsel %vm6545_vm4, %v9652_v40, %v9654_v38  ;;  %9719 = vst.msk [vmem:[%s16668_s22 + $0x18] sm:$0xff] %vm9718_vm6, %v9654_v38 }
 0x680   : > { %9717 = vst [vmem:[%s16668_s22 + $0x10] sm:$0xff] %v9683_v8 }
 0x682   : > { %v9656_v1 = vpop.permute.xlu1 %9655 }
 0x683   : > { %9720 = vst.msk [vmem:[%s16668_s22 + $0x28] sm:$0xff] %vm9715_vm5, %v9656_v1 }
 0x686   : > { %v9658_v29 = vpop.permute.xlu0 %9657 }
 0x687   : > { %v9684_v2 = vsel %vm6545_vm4, %v9656_v1, %v9658_v29  ;;  %9722 = vst.msk [vmem:[%s16668_s22 + $0x38] sm:$0xff] %vm9718_vm6, %v9658_v29 }
 0x688   : > { %9721 = vst [vmem:[%s16668_s22 + $0x30] sm:$0xff] %v9684_v2 }
 0x68d   : > { %v9660_v14 = vpop.permute.xlu1 %9659 }
 0x68e   : > { %9723 = vst.msk [vmem:[%s16668_s22 + $0x48] sm:$0xff] %vm9715_vm5, %v9660_v14 }
 0x691   : > { %v9662_v54 = vpop.permute.xlu0 %9661 }
 0x692   : > { %v9685_v60 = vsel %vm6545_vm4, %v9660_v14, %v9662_v54  ;;  %9725 = vst.msk [vmem:[%s16668_s22 + $0x58] sm:$0xff] %vm9718_vm6, %v9662_v54 }
 0x693   : > { %9724 = vst [vmem:[%s16668_s22 + $0x50] sm:$0xff] %v9685_v60 }
 0x695   : > { %v9664_v57 = vpop.permute.xlu1 %9663 }
 0x696   : > { %9726 = vst.msk [vmem:[%s16668_s22 + $0x68] sm:$0xff] %vm9715_vm5, %v9664_v57 }
 0x697   : > { %v9666_v28 = vpop.permute.xlu0 %9665 }
 0x698   : > { %v9686_v3 = vsel %vm6545_vm4, %v9664_v57, %v9666_v28  ;;  %9728 = vst.msk [vmem:[%s16668_s22 + $0x78] sm:$0xff] %vm9718_vm6, %v9666_v28 }
 0x699   : > { %9727 = vst [vmem:[%s16668_s22 + $0x70] sm:$0xff] %v9686_v3  ;;  %v9668_v9 = vpop.permute.xlu1 %9667 }
 0x69a   : > { %9729 = vst.msk [vmem:[%s16668_s22 + $0x88] sm:$0xff] %vm9715_vm5, %v9668_v9 }
 0x69d   : > { %v9670_v39 = vpop.permute.xlu0 %9669 }
 0x69e   : > { %v9687_v51 = vsel %vm6545_vm4, %v9668_v9, %v9670_v39  ;;  %9731 = vst.msk [vmem:[%s16668_s22 + $0x98] sm:$0xff] %vm9718_vm6, %v9670_v39 }
 0x69f   : > { %9730 = vst [vmem:[%s16668_s22 + $0x90] sm:$0xff] %v9687_v51 }
 0x6a1   : > { %v9672_v0 = vpop.permute.xlu1 %9671 }
 0x6a2   : > { %9732 = vst.msk [vmem:[%s16668_s22 + $0xa8] sm:$0xff] %vm9715_vm5, %v9672_v0 }
 0x6a8   : > { %v9674_v52 = vpop.permute.xlu0 %9673 }
 0x6a9   : > { %v9688_v44 = vsel %vm6545_vm4, %v9672_v0, %v9674_v52  ;;  %9734 = vst.msk [vmem:[%s16668_s22 + $0xb8] sm:$0xff] %vm9718_vm6, %v9674_v52 }
 0x6aa   : > { %9733 = vst [vmem:[%s16668_s22 + $0xb0] sm:$0xff] %v9688_v44 }
 0x6ab   : > { %v9676_v15 = vpop.permute.xlu1 %9675 }
 0x6ac   : > { %9735 = vst.msk [vmem:[%s16668_s22 + $0xc8] sm:$0xff] %vm9715_vm5, %v9676_v15  ;;  %v9678_v58 = vpop.permute.xlu0 %9677 }
 0x6ad   : > { %v9689_v49 = vsel %vm6545_vm4, %v9676_v15, %v9678_v58  ;;  %9737 = vst.msk [vmem:[%s16668_s22 + $0xd8] sm:$0xff] %vm9718_vm6, %v9678_v58 }
 0x6ae   : > { %9736 = vst [vmem:[%s16668_s22 + $0xd0] sm:$0xff] %v9689_v49 }
 0x6af   : > { %v9680_v22 = vpop.permute.xlu1 %9679 }
 0x6b0   : > { %9738 = vst.msk [vmem:[%s16668_s22 + $0xe8] sm:$0xff] %vm9715_vm5, %v9680_v22  ;;  %v9682_v62 = vpop.permute.xlu0 %9681 }
 0x6b1   : > { %v9690_v27 = vsel %vm6545_vm4, %v9680_v22, %v9682_v62  ;;  %9740 = vst.msk [vmem:[%s16668_s22 + $0xf8] sm:$0xff] %vm9718_vm6, %v9682_v62 }
 0x6b2   : > { %9739 = vst [vmem:[%s16668_s22 + $0xf0] sm:$0xff] %v9690_v27 }
 0x6b3 PF: > { %s16_s21 = sadd.s32 1, %s13094_s21  }
 0x6b4   : > { %p13_p4 = scmp.ge.s32.totalorder %s16_s21, 4  }
 0x6b6   :  { %15 = sbr.rel (!%p13_p4) target bundleno = 1 (0x1), region = 90 }

</bundles_post_ra>
